<compile_context>
chip_gen: v5e
topology: v5e:2x2
jax: 0.10.0
libtpu: 0.0.40
codegen_flags: <defaults>
</compile_context>

<pallas_src>
import functools

import numpy as np
import jax
import jax.numpy as jnp
from jax import lax
from jax.experimental import pallas as pl
from jax.experimental.pallas import tpu as pltpu


def _round_up(x, m):
    return ((x + m - 1) // m) * m


# ----------------------------------------------------------------------------
# Fused ContactCNN kernel
# ----------------------------------------------------------------------------
def _fused_kernel(z0_ref, z1_ref, valid_ref, w1_ref, b1_ref, sh1_ref,
                  w2_ref, sh2_ref, out_ref, tpad_ref, *, TN, TNH, W):
    P = W // 2
    M = z1_ref.shape[1]
    H = w1_ref.shape[1]

    row0 = pl.program_id(1) * TN
    if TN % 8 == 0:
        row0 = pl.multiple_of(row0, 8)

    z0b = z0_ref[0, pl.ds(row0, TNH), :]            # (TNH, Dp)   tile rows + halo
    z1b = z1_ref[0]                                 # (M,   Dp)
    vmask = valid_ref[pl.ds(row0, TNH), :]          # (TNH, 1)    1.0 on real rows

    # ---- stage 1: broadcast features -> fused 1x1 conv (single MXU matmul)
    #      -> ReLU -> BatchNorm shift (scale folded into weights/bias).
    dif = jnp.abs(z0b[:, None, :] - z1b[None, :, :])          # (TNH, M, Dp)
    mul = z0b[:, None, :] * z1b[None, :, :]                   # (TNH, M, Dp)
    cat = jnp.concatenate([dif, mul], axis=-1)                # (TNH, M, 2*Dp)
    cat2 = cat.reshape(TNH * M, cat.shape[-1])                # (R, 2*Dp)
    hid = jnp.dot(cat2, w1_ref[...], preferred_element_type=jnp.float32)
    hid = jnp.maximum(hid + b1_ref[...], 0.0) + sh1_ref[...]  # (R, H)

    # ---- stage 2a: per-tap channel contraction on the MXU.
    hid3 = hid.reshape(TNH, M, H)                             # (TNH, M, H)
    w2b = jnp.broadcast_to(w2_ref[...][None, :, :], (TNH, W * W, H))
    # batched  (49, H) @ (M, H)^T  per row  ->  (TNH, 49, M), M lane-dense.
    tap3 = lax.dot_general(w2b, hid3, (((2,), (2,)), ((0,), (0,))),
                           preferred_element_type=jnp.float32)
    tap3 = tap3 * vmask[:, :, None]     # zero hidden rows outside [0, N)

    # ---- stage 2b: column-zero-padded per-tap map in VMEM scratch.
    tpad_ref[:, :, 0:P] = jnp.zeros((TNH, W * W, P), jnp.float32)
    tpad_ref[:, :, P + M:] = jnp.zeros((TNH, W * W, P), jnp.float32)
    tpad_ref[:, :, P:P + M] = tap3

    # ---- stage 2c: 49 statically shifted adds, then BN2 shift + sigmoid.
    acc = jnp.zeros((TN, 1, M), jnp.float32)
    for di in range(W):
        for dj in range(W):
            t = di * W + dj
            acc = acc + tpad_ref[di:di + TN, t:t + 1, dj:dj + M]
    out = jax.nn.sigmoid(acc + sh2_ref[0, 0])                 # (TN, 1, M)
    out_ref[0] = out.astype(out_ref.dtype)


def _choose_tile_n(N, M, Dp, H, W, budget_bytes=8 << 20):
    """Largest row-tile whose in-kernel intermediates fit a VMEM budget."""
    def est(tn):
        tnh = _round_up(tn + W - 1, 8)
        vals = 4 * tnh * M * Dp + 2 * tnh * M * (H + W * W)
        scr = tnh * _round_up(W * W, 8) * _round_up(M + W - 1, 128)
        return 4 * (vals + scr)

    if N <= 8 or est(N) <= budget_bytes:
        return N
    tn = min(256, max(8, (N // 8) * 8))
    while tn > 8 and est(tn) > budget_bytes:
        tn -= 8
    return tn


def contact_cnn_forward(z0, z1, params, tile_n=None):
    """z0: (B, N, D), z1: (B, M, D)  ->  contact map (B, 1, N, M)."""
    Bsz, N, D = z0.shape
    M = z1.shape[1]
    W = int(params["width"])
    P = W // 2
    w1s, b1s, sh1 = params["w1s"], params["b1s"], params["sh1"]
    w2t, sh2 = params["w2t"], params["sh2"]
    Dp = w1s.shape[0] // 2
    H = w1s.shape[1]

    TN = tile_n if tile_n is not None else _choose_tile_n(N, M, Dp, H, W)
    TN = min(TN, N)
    if TN != N:
        TN = max(8, (TN // 8) * 8)
    nt = -(-N // TN)
    TNH = _round_up(TN + W - 1, 8)
    Npad = (nt - 1) * TN + TNH

    # Zero-pad z0 rows by the conv halo (+ alignment slack) and both embeds
    # along D up to a 128-lane boundary (padded lanes have zero weights).
    z0p = jnp.zeros((Bsz, Npad, Dp), jnp.float32)
    z0p = z0p.at[:, P:P + N, :D].set(z0.astype(jnp.float32))
    z1p = jnp.zeros((Bsz, M, Dp), jnp.float32)
    z1p = z1p.at[:, :, :D].set(z1.astype(jnp.float32))
    valid = jnp.zeros((Npad, 1), jnp.float32).at[P:P + N, :].set(1.0)

    kernel = functools.partial(_fused_kernel, TN=TN, TNH=TNH, W=W)
    out = pl.pallas_call(
        kernel,
        out_shape=jax.ShapeDtypeStruct((Bsz, N, 1, M), jnp.float32),
        grid=(Bsz, nt),
        in_specs=[
            pl.BlockSpec((1, Npad, Dp), lambda b, n: (b, 0, 0)),
            pl.BlockSpec((1, M, Dp), lambda b, n: (b, 0, 0)),
            pl.BlockSpec((Npad, 1), lambda b, n: (0, 0)),
            pl.BlockSpec((2 * Dp, H), lambda b, n: (0, 0)),
            pl.BlockSpec((1, H), lambda b, n: (0, 0)),
            pl.BlockSpec((1, H), lambda b, n: (0, 0)),
            pl.BlockSpec((W * W, H), lambda b, n: (0, 0)),
            pl.BlockSpec((1, 1), lambda b, n: (0, 0)),
        ],
        out_specs=pl.BlockSpec((1, TN, 1, M), lambda b, n: (b, n, 0, 0)),
        scratch_shapes=[pltpu.VMEM((TNH, W * W, M + 2 * P), jnp.float32)],
        compiler_params=pltpu.CompilerParams(
            dimension_semantics=("parallel", "parallel")),
    )(z0p, z1p, valid, w1s, b1s, sh1, w2t, sh2)
    return jnp.transpose(out, (0, 2, 1, 3))          # (B, 1, N, M)


# ----------------------------------------------------------------------------
# Parameter construction (mirrors the PyTorch __init__; BN eval defaults)
# ----------------------------------------------------------------------------
def init_params(key, D, H, width=7, eps=1e-5):
    k1, k2 = jax.random.split(key)

    # FullyConnected: Conv2d(2D, H, 1), weight ~ N(0,1), bias = 0; BatchNorm2d(H).
    w1 = jax.random.normal(k1, (H, 2 * D), jnp.float32)
    bias1 = jnp.zeros((H,), jnp.float32)
    scale1 = jnp.ones((H,), jnp.float32) / jnp.sqrt(1.0 + eps)   # gamma/sqrt(var+eps)
    shift1 = jnp.zeros((H,), jnp.float32)                        # beta - mean*scale

    # ContactCNN: Conv2d(H, 1, width, padding=width//2), symmetrized; BatchNorm2d(1).
    w2 = jax.random.normal(k2, (1, H, width, width), jnp.float32)
    w2 = 0.5 * (w2 + jnp.swapaxes(w2, 2, 3))                     # clip()
    bias2 = jnp.float32(0.0)
    scale2 = jnp.float32(1.0) / jnp.sqrt(1.0 + eps)
    beta2 = jnp.float32(0.0)
    mean2 = jnp.float32(0.0)

    # --- kernel-layout parameters (BN scales folded in) ---
    Dp = _round_up(D, 128)
    w1s = jnp.zeros((2 * Dp, H), jnp.float32)
    w1s = w1s.at[:D, :].set(jnp.transpose(w1[:, :D]) * scale1[None, :])       # |z0-z1|
    w1s = w1s.at[Dp:Dp + D, :].set(jnp.transpose(w1[:, D:]) * scale1[None, :])  # z0*z1
    b1s = (bias1 * scale1)[None, :]
    sh1 = shift1[None, :]
    w2t = jnp.transpose(w2[0] * scale2, (1, 2, 0)).reshape(width * width, H)  # (49, H)
    sh2 = jnp.full((1, 1), (bias2 - mean2) * scale2 + beta2, jnp.float32)

    return dict(width=width, Dp=Dp,
                w1s=w1s, b1s=b1s, sh1=sh1, w2t=w2t, sh2=sh2,
                # raw params for the pure-JAX reference
                w1=w1, bias1_v=bias1, scale1_v=scale1, shift1_v=shift1,
                w2=w2, bias2=bias2, scale2=scale2, beta2=beta2, mean2=mean2)


# ----------------------------------------------------------------------------
# Pure-JAX reference (mirrors the PyTorch forward, NCHW)
# ----------------------------------------------------------------------------
def reference_forward(z0, z1, params):
    hp = lax.Precision.HIGHEST
    z0t = jnp.swapaxes(z0, 1, 2)                        # (B, D, N)
    z1t = jnp.swapaxes(z1, 1, 2)                        # (B, D, M)
    dif = jnp.abs(z0t[:, :, :, None] - z1t[:, :, None, :])
    mul = z0t[:, :, :, None] * z1t[:, :, None, :]
    cat = jnp.concatenate([dif, mul], axis=1)           # (B, 2D, N, M)
    c = jnp.einsum("hc,bcnm->bhnm", params["w1"], cat, precision=hp)
    c = c + params["bias1_v"][None, :, None, None]
    c = jnp.maximum(c, 0.0)
    c = (c * params["scale1_v"][None, :, None, None]
         + params["shift1_v"][None, :, None, None])
    pad = params["width"] // 2
    out = lax.conv_general_dilated(
        c, params["w2"], window_strides=(1, 1),
        padding=[(pad, pad), (pad, pad)],
        dimension_numbers=("NCHW", "OIHW", "NCHW"), precision=hp)
    out = out + params["bias2"]
    out = (out - params["mean2"]) * params["scale2"] + params["beta2"]
    return jax.nn.sigmoid(out)


if __name__ == "__main__":
    Bsz, N, M, D, H, width = 2, 16, 24, 16, 32, 7

    key = jax.random.PRNGKey(0)
    kz0, kz1, kp = jax.random.split(key, 3)
    z0 = jax.random.normal(kz0, (Bsz, N, D), jnp.float32)
    z1 = jax.random.normal(kz1, (Bsz, M, D), jnp.float32)
    params = init_params(kp, D, H, width)

    # tile_n=8 exercises the row-tiled (multi-grid-step) path with halo rows.
    out = contact_cnn_forward(z0, z1, params, tile_n=8)
    out = jax.block_until_ready(out)
    assert out.shape == (Bsz, 1, N, M), out.shape

    ref = reference_forward(z0, z1, params)
    np.testing.assert_allclose(np.asarray(out), np.asarray(ref),
                               rtol=2e-3, atol=2e-3)
    print("KERNEL_OK")
</pallas_src>

<mosaic_0001>
module attributes {stable_mosaic.version = 11 : i64} {
  func.func @_fused_kernel(%arg0: i32, %arg1: i32, %arg2: memref<1x24x128xf32, #tpu.memory_space<vmem>>, %arg3: memref<1x24x128xf32, #tpu.memory_space<vmem>>, %arg4: memref<24x1xf32, #tpu.memory_space<vmem>>, %arg5: memref<256x32xf32, #tpu.memory_space<vmem>>, %arg6: memref<1x32xf32, #tpu.memory_space<vmem>>, %arg7: memref<1x32xf32, #tpu.memory_space<vmem>>, %arg8: memref<49x32xf32, #tpu.memory_space<vmem>>, %arg9: memref<1x1xf32, #tpu.memory_space<vmem>>, %arg10: memref<1x8x1x24xf32, #tpu.memory_space<vmem>>, %arg11: memref<16x49x30xf32, #tpu.memory_space<vmem>>) attributes {dimension_semantics = [#tpu.dimension_semantics<parallel>, #tpu.dimension_semantics<parallel>], iteration_bounds = array<i64: 2, 2>, scalar_prefetch = 0 : i64, scratch_operands = 1 : i64, tpu.core_type = #tpu.core_type<tc>, window_params = [{transform_indices = @transform_0, window_bounds = array<i64: 1, 24, 128>}, {transform_indices = @transform_1, window_bounds = array<i64: 1, 24, 128>}, {pipeline_mode = #tpu.pipeline_mode<synchronous>, transform_indices = @transform_2, window_bounds = array<i64: 24, 1>}, {pipeline_mode = #tpu.pipeline_mode<synchronous>, transform_indices = @transform_3, window_bounds = array<i64: 256, 32>}, {pipeline_mode = #tpu.pipeline_mode<synchronous>, transform_indices = @transform_4, window_bounds = array<i64: 1, 32>}, {pipeline_mode = #tpu.pipeline_mode<synchronous>, transform_indices = @transform_5, window_bounds = array<i64: 1, 32>}, {pipeline_mode = #tpu.pipeline_mode<synchronous>, transform_indices = @transform_6, window_bounds = array<i64: 49, 32>}, {pipeline_mode = #tpu.pipeline_mode<synchronous>, transform_indices = @transform_7, window_bounds = array<i64: 1, 1>}, {transform_indices = @transform_8, window_bounds = array<i64: 1, 8, 1, 24>}]} {
    %c8_i32 = arith.constant 8 : i32
    %0 = arith.muli %arg1, %c8_i32 : i32
    %1 = tpu.assume_multiple %0, 8 : i32
    %c0 = arith.constant 0 : index
    %2 = arith.index_cast %1 : i32 to index
    %c0_0 = arith.constant 0 : index
    %3 = vector.load %arg2[%c0, %2, %c0_0] : memref<1x24x128xf32, #tpu.memory_space<vmem>>, vector<1x16x128xf32>
    %4 = vector.shape_cast %3 : vector<1x16x128xf32> to vector<16x128xf32>
    %c0_1 = arith.constant 0 : index
    %c0_2 = arith.constant 0 : index
    %c0_3 = arith.constant 0 : index
    %5 = vector.load %arg3[%c0_1, %c0_2, %c0_3] : memref<1x24x128xf32, #tpu.memory_space<vmem>>, vector<1x24x128xf32>
    %6 = vector.shape_cast %5 : vector<1x24x128xf32> to vector<24x128xf32>
    %7 = arith.index_cast %1 : i32 to index
    %c0_4 = arith.constant 0 : index
    %8 = vector.load %arg4[%7, %c0_4] : memref<24x1xf32, #tpu.memory_space<vmem>>, vector<16x1xf32>
    %9 = vector.shape_cast %4 : vector<16x128xf32> to vector<16x1x128xf32>
    %10 = vector.shape_cast %6 : vector<24x128xf32> to vector<1x24x128xf32>
    %11 = vector.broadcast %9 : vector<16x1x128xf32> to vector<16x24x128xf32>
    %12 = vector.broadcast %10 : vector<1x24x128xf32> to vector<16x24x128xf32>
    %13 = arith.subf %11, %12 : vector<16x24x128xf32>
    %14 = math.absf %13 : vector<16x24x128xf32>
    %15 = vector.shape_cast %4 : vector<16x128xf32> to vector<16x1x128xf32>
    %16 = vector.shape_cast %6 : vector<24x128xf32> to vector<1x24x128xf32>
    %17 = vector.broadcast %15 : vector<16x1x128xf32> to vector<16x24x128xf32>
    %18 = vector.broadcast %16 : vector<1x24x128xf32> to vector<16x24x128xf32>
    %19 = arith.mulf %17, %18 : vector<16x24x128xf32>
    %20 = tpu.concatenate %14, %19 in 2 : vector<16x24x128xf32>, vector<16x24x128xf32> -> vector<16x24x256xf32>
    %21 = vector.shape_cast %20 : vector<16x24x256xf32> to vector<384x256xf32>
    %c0_5 = arith.constant 0 : index
    %c0_6 = arith.constant 0 : index
    %22 = vector.load %arg5[%c0_5, %c0_6] : memref<256x32xf32, #tpu.memory_space<vmem>>, vector<256x32xf32>
    %cst = arith.constant dense<0.000000e+00> : vector<384x32xf32>
    %23 = tpu.matmul %21, %22, %cst {dimension_numbers = #tpu.dot_dimension_numbers<[1], [0], [0], [1], [0, 0, 1, 1], [], []>} : vector<384x256xf32>, vector<256x32xf32>, vector<384x32xf32> -> vector<384x32xf32>
    %c0_7 = arith.constant 0 : index
    %c0_8 = arith.constant 0 : index
    %24 = vector.load %arg6[%c0_7, %c0_8] : memref<1x32xf32, #tpu.memory_space<vmem>>, vector<1x32xf32>
    %25 = vector.broadcast %24 : vector<1x32xf32> to vector<384x32xf32>
    %26 = arith.addf %23, %25 : vector<384x32xf32>
    %cst_9 = arith.constant 0.000000e+00 : f32
    %27 = vector.broadcast %cst_9 : f32 to vector<384x32xf32>
    %28 = arith.maximumf %26, %27 : vector<384x32xf32>
    %c0_10 = arith.constant 0 : index
    %c0_11 = arith.constant 0 : index
    %29 = vector.load %arg7[%c0_10, %c0_11] : memref<1x32xf32, #tpu.memory_space<vmem>>, vector<1x32xf32>
    %30 = vector.broadcast %29 : vector<1x32xf32> to vector<384x32xf32>
    %31 = arith.addf %28, %30 : vector<384x32xf32>
    %32 = vector.shape_cast %31 : vector<384x32xf32> to vector<16x24x32xf32>
    %c0_12 = arith.constant 0 : index
    %c0_13 = arith.constant 0 : index
    %33 = vector.load %arg8[%c0_12, %c0_13] : memref<49x32xf32, #tpu.memory_space<vmem>>, vector<49x32xf32>
    %34 = vector.shape_cast %33 : vector<49x32xf32> to vector<1x49x32xf32>
    %35 = vector.shape_cast %34 : vector<1x49x32xf32> to vector<1x49x32xf32>
    %36 = vector.broadcast %35 : vector<1x49x32xf32> to vector<16x49x32xf32>
    %cst_14 = arith.constant dense<0.000000e+00> : vector<16x49x24xf32>
    %37 = tpu.matmul %36, %32, %cst_14 {dimension_numbers = #tpu.dot_dimension_numbers<[2], [2], [1], [1], [0, 0, 0, 1, 1, 1], [0], [0]>} : vector<16x49x32xf32>, vector<16x24x32xf32>, vector<16x49x24xf32> -> vector<16x49x24xf32>
    %38 = vector.shape_cast %8 : vector<16x1xf32> to vector<16x1x1xf32>
    %39 = vector.broadcast %38 : vector<16x1x1xf32> to vector<16x49x24xf32>
    %40 = arith.mulf %37, %39 : vector<16x49x24xf32>
    %cst_15 = arith.constant 0.000000e+00 : f32
    %41 = vector.broadcast %cst_15 : f32 to vector<16x49x3xf32>
    %c0_16 = arith.constant 0 : index
    %c0_17 = arith.constant 0 : index
    %c0_18 = arith.constant 0 : index
    %42 = vector.load %arg11[%c0_16, %c0_17, %c0_18] : memref<16x49x30xf32, #tpu.memory_space<vmem>>, vector<16x49x3xf32>
    tpu.vector_store %arg11[%c0_16, %c0_17, %c0_18], %41 {strides = array<i32>} : memref<16x49x30xf32, #tpu.memory_space<vmem>>, vector<16x49x3xf32>,
    %cst_19 = arith.constant 0.000000e+00 : f32
    %43 = vector.broadcast %cst_19 : f32 to vector<16x49x3xf32>
    %c0_20 = arith.constant 0 : index
    %c0_21 = arith.constant 0 : index
    %c27 = arith.constant 27 : index
    %44 = vector.load %arg11[%c0_20, %c0_21, %c27] : memref<16x49x30xf32, #tpu.memory_space<vmem>>, vector<16x49x3xf32>
    tpu.vector_store %arg11[%c0_20, %c0_21, %c27], %43 {strides = array<i32>} : memref<16x49x30xf32, #tpu.memory_space<vmem>>, vector<16x49x3xf32>,
    %c0_22 = arith.constant 0 : index
    %c0_23 = arith.constant 0 : index
    %c3 = arith.constant 3 : index
    %45 = vector.load %arg11[%c0_22, %c0_23, %c3] : memref<16x49x30xf32, #tpu.memory_space<vmem>>, vector<16x49x24xf32>
    tpu.vector_store %arg11[%c0_22, %c0_23, %c3], %40 {strides = array<i32>} : memref<16x49x30xf32, #tpu.memory_space<vmem>>, vector<16x49x24xf32>,
    %cst_24 = arith.constant 0.000000e+00 : f32
    %46 = vector.broadcast %cst_24 : f32 to vector<8x1x24xf32>
    %c0_25 = arith.constant 0 : index
    %c0_26 = arith.constant 0 : index
    %c0_27 = arith.constant 0 : index
    %47 = vector.load %arg11[%c0_25, %c0_26, %c0_27] : memref<16x49x30xf32, #tpu.memory_space<vmem>>, vector<8x1x24xf32>
    %48 = arith.addf %46, %47 : vector<8x1x24xf32>
    %c0_28 = arith.constant 0 : index
    %c1 = arith.constant 1 : index
    %c1_29 = arith.constant 1 : index
    %49 = vector.load %arg11[%c0_28, %c1, %c1_29] : memref<16x49x30xf32, #tpu.memory_space<vmem>>, vector<8x1x24xf32>
    %50 = arith.addf %48, %49 : vector<8x1x24xf32>
    %c0_30 = arith.constant 0 : index
    %c2 = arith.constant 2 : index
    %c2_31 = arith.constant 2 : index
    %51 = vector.load %arg11[%c0_30, %c2, %c2_31] : memref<16x49x30xf32, #tpu.memory_space<vmem>>, vector<8x1x24xf32>
    %52 = arith.addf %50, %51 : vector<8x1x24xf32>
    %c0_32 = arith.constant 0 : index
    %c3_33 = arith.constant 3 : index
    %c3_34 = arith.constant 3 : index
    %53 = vector.load %arg11[%c0_32, %c3_33, %c3_34] : memref<16x49x30xf32, #tpu.memory_space<vmem>>, vector<8x1x24xf32>
    %54 = arith.addf %52, %53 : vector<8x1x24xf32>
    %c0_35 = arith.constant 0 : index
    %c4 = arith.constant 4 : index
    %c4_36 = arith.constant 4 : index
    %55 = vector.load %arg11[%c0_35, %c4, %c4_36] : memref<16x49x30xf32, #tpu.memory_space<vmem>>, vector<8x1x24xf32>
    %56 = arith.addf %54, %55 : vector<8x1x24xf32>
    %c0_37 = arith.constant 0 : index
    %c5 = arith.constant 5 : index
    %c5_38 = arith.constant 5 : index
    %57 = vector.load %arg11[%c0_37, %c5, %c5_38] : memref<16x49x30xf32, #tpu.memory_space<vmem>>, vector<8x1x24xf32>
    %58 = arith.addf %56, %57 : vector<8x1x24xf32>
    %c0_39 = arith.constant 0 : index
    %c6 = arith.constant 6 : index
    %c6_40 = arith.constant 6 : index
    %59 = vector.load %arg11[%c0_39, %c6, %c6_40] : memref<16x49x30xf32, #tpu.memory_space<vmem>>, vector<8x1x24xf32>
    %60 = arith.addf %58, %59 : vector<8x1x24xf32>
    %c1_41 = arith.constant 1 : index
    %c7 = arith.constant 7 : index
    %c0_42 = arith.constant 0 : index
    %61 = vector.load %arg11[%c1_41, %c7, %c0_42] : memref<16x49x30xf32, #tpu.memory_space<vmem>>, vector<8x1x24xf32>
    %62 = arith.addf %60, %61 : vector<8x1x24xf32>
    %c1_43 = arith.constant 1 : index
    %c8 = arith.constant 8 : index
    %c1_44 = arith.constant 1 : index
    %63 = vector.load %arg11[%c1_43, %c8, %c1_44] : memref<16x49x30xf32, #tpu.memory_space<vmem>>, vector<8x1x24xf32>
    %64 = arith.addf %62, %63 : vector<8x1x24xf32>
    %c1_45 = arith.constant 1 : index
    %c9 = arith.constant 9 : index
    %c2_46 = arith.constant 2 : index
    %65 = vector.load %arg11[%c1_45, %c9, %c2_46] : memref<16x49x30xf32, #tpu.memory_space<vmem>>, vector<8x1x24xf32>
    %66 = arith.addf %64, %65 : vector<8x1x24xf32>
    %c1_47 = arith.constant 1 : index
    %c10 = arith.constant 10 : index
    %c3_48 = arith.constant 3 : index
    %67 = vector.load %arg11[%c1_47, %c10, %c3_48] : memref<16x49x30xf32, #tpu.memory_space<vmem>>, vector<8x1x24xf32>
    %68 = arith.addf %66, %67 : vector<8x1x24xf32>
    %c1_49 = arith.constant 1 : index
    %c11 = arith.constant 11 : index
    %c4_50 = arith.constant 4 : index
    %69 = vector.load %arg11[%c1_49, %c11, %c4_50] : memref<16x49x30xf32, #tpu.memory_space<vmem>>, vector<8x1x24xf32>
    %70 = arith.addf %68, %69 : vector<8x1x24xf32>
    %c1_51 = arith.constant 1 : index
    %c12 = arith.constant 12 : index
    %c5_52 = arith.constant 5 : index
    %71 = vector.load %arg11[%c1_51, %c12, %c5_52] : memref<16x49x30xf32, #tpu.memory_space<vmem>>, vector<8x1x24xf32>
    %72 = arith.addf %70, %71 : vector<8x1x24xf32>
    %c1_53 = arith.constant 1 : index
    %c13 = arith.constant 13 : index
    %c6_54 = arith.constant 6 : index
    %73 = vector.load %arg11[%c1_53, %c13, %c6_54] : memref<16x49x30xf32, #tpu.memory_space<vmem>>, vector<8x1x24xf32>
    %74 = arith.addf %72, %73 : vector<8x1x24xf32>
    %c2_55 = arith.constant 2 : index
    %c14 = arith.constant 14 : index
    %c0_56 = arith.constant 0 : index
    %75 = vector.load %arg11[%c2_55, %c14, %c0_56] : memref<16x49x30xf32, #tpu.memory_space<vmem>>, vector<8x1x24xf32>
    %76 = arith.addf %74, %75 : vector<8x1x24xf32>
    %c2_57 = arith.constant 2 : index
    %c15 = arith.constant 15 : index
    %c1_58 = arith.constant 1 : index
    %77 = vector.load %arg11[%c2_57, %c15, %c1_58] : memref<16x49x30xf32, #tpu.memory_space<vmem>>, vector<8x1x24xf32>
    %78 = arith.addf %76, %77 : vector<8x1x24xf32>
    %c2_59 = arith.constant 2 : index
    %c16 = arith.constant 16 : index
    %c2_60 = arith.constant 2 : index
    %79 = vector.load %arg11[%c2_59, %c16, %c2_60] : memref<16x49x30xf32, #tpu.memory_space<vmem>>, vector<8x1x24xf32>
    %80 = arith.addf %78, %79 : vector<8x1x24xf32>
    %c2_61 = arith.constant 2 : index
    %c17 = arith.constant 17 : index
    %c3_62 = arith.constant 3 : index
    %81 = vector.load %arg11[%c2_61, %c17, %c3_62] : memref<16x49x30xf32, #tpu.memory_space<vmem>>, vector<8x1x24xf32>
    %82 = arith.addf %80, %81 : vector<8x1x24xf32>
    %c2_63 = arith.constant 2 : index
    %c18 = arith.constant 18 : index
    %c4_64 = arith.constant 4 : index
    %83 = vector.load %arg11[%c2_63, %c18, %c4_64] : memref<16x49x30xf32, #tpu.memory_space<vmem>>, vector<8x1x24xf32>
    %84 = arith.addf %82, %83 : vector<8x1x24xf32>
    %c2_65 = arith.constant 2 : index
    %c19 = arith.constant 19 : index
    %c5_66 = arith.constant 5 : index
    %85 = vector.load %arg11[%c2_65, %c19, %c5_66] : memref<16x49x30xf32, #tpu.memory_space<vmem>>, vector<8x1x24xf32>
    %86 = arith.addf %84, %85 : vector<8x1x24xf32>
    %c2_67 = arith.constant 2 : index
    %c20 = arith.constant 20 : index
    %c6_68 = arith.constant 6 : index
    %87 = vector.load %arg11[%c2_67, %c20, %c6_68] : memref<16x49x30xf32, #tpu.memory_space<vmem>>, vector<8x1x24xf32>
    %88 = arith.addf %86, %87 : vector<8x1x24xf32>
    %c3_69 = arith.constant 3 : index
    %c21 = arith.constant 21 : index
    %c0_70 = arith.constant 0 : index
    %89 = vector.load %arg11[%c3_69, %c21, %c0_70] : memref<16x49x30xf32, #tpu.memory_space<vmem>>, vector<8x1x24xf32>
    %90 = arith.addf %88, %89 : vector<8x1x24xf32>
    %c3_71 = arith.constant 3 : index
    %c22 = arith.constant 22 : index
    %c1_72 = arith.constant 1 : index
    %91 = vector.load %arg11[%c3_71, %c22, %c1_72] : memref<16x49x30xf32, #tpu.memory_space<vmem>>, vector<8x1x24xf32>
    %92 = arith.addf %90, %91 : vector<8x1x24xf32>
    %c3_73 = arith.constant 3 : index
    %c23 = arith.constant 23 : index
    %c2_74 = arith.constant 2 : index
    %93 = vector.load %arg11[%c3_73, %c23, %c2_74] : memref<16x49x30xf32, #tpu.memory_space<vmem>>, vector<8x1x24xf32>
    %94 = arith.addf %92, %93 : vector<8x1x24xf32>
    %c3_75 = arith.constant 3 : index
    %c24 = arith.constant 24 : index
    %c3_76 = arith.constant 3 : index
    %95 = vector.load %arg11[%c3_75, %c24, %c3_76] : memref<16x49x30xf32, #tpu.memory_space<vmem>>, vector<8x1x24xf32>
    %96 = arith.addf %94, %95 : vector<8x1x24xf32>
    %c3_77 = arith.constant 3 : index
    %c25 = arith.constant 25 : index
    %c4_78 = arith.constant 4 : index
    %97 = vector.load %arg11[%c3_77, %c25, %c4_78] : memref<16x49x30xf32, #tpu.memory_space<vmem>>, vector<8x1x24xf32>
    %98 = arith.addf %96, %97 : vector<8x1x24xf32>
    %c3_79 = arith.constant 3 : index
    %c26 = arith.constant 26 : index
    %c5_80 = arith.constant 5 : index
    %99 = vector.load %arg11[%c3_79, %c26, %c5_80] : memref<16x49x30xf32, #tpu.memory_space<vmem>>, vector<8x1x24xf32>
    %100 = arith.addf %98, %99 : vector<8x1x24xf32>
    %c3_81 = arith.constant 3 : index
    %c27_82 = arith.constant 27 : index
    %c6_83 = arith.constant 6 : index
    %101 = vector.load %arg11[%c3_81, %c27_82, %c6_83] : memref<16x49x30xf32, #tpu.memory_space<vmem>>, vector<8x1x24xf32>
    %102 = arith.addf %100, %101 : vector<8x1x24xf32>
    %c4_84 = arith.constant 4 : index
    %c28 = arith.constant 28 : index
    %c0_85 = arith.constant 0 : index
    %103 = vector.load %arg11[%c4_84, %c28, %c0_85] : memref<16x49x30xf32, #tpu.memory_space<vmem>>, vector<8x1x24xf32>
    %104 = arith.addf %102, %103 : vector<8x1x24xf32>
    %c4_86 = arith.constant 4 : index
    %c29 = arith.constant 29 : index
    %c1_87 = arith.constant 1 : index
    %105 = vector.load %arg11[%c4_86, %c29, %c1_87] : memref<16x49x30xf32, #tpu.memory_space<vmem>>, vector<8x1x24xf32>
    %106 = arith.addf %104, %105 : vector<8x1x24xf32>
    %c4_88 = arith.constant 4 : index
    %c30 = arith.constant 30 : index
    %c2_89 = arith.constant 2 : index
    %107 = vector.load %arg11[%c4_88, %c30, %c2_89] : memref<16x49x30xf32, #tpu.memory_space<vmem>>, vector<8x1x24xf32>
    %108 = arith.addf %106, %107 : vector<8x1x24xf32>
    %c4_90 = arith.constant 4 : index
    %c31 = arith.constant 31 : index
    %c3_91 = arith.constant 3 : index
    %109 = vector.load %arg11[%c4_90, %c31, %c3_91] : memref<16x49x30xf32, #tpu.memory_space<vmem>>, vector<8x1x24xf32>
    %110 = arith.addf %108, %109 : vector<8x1x24xf32>
    %c4_92 = arith.constant 4 : index
    %c32 = arith.constant 32 : index
    %c4_93 = arith.constant 4 : index
    %111 = vector.load %arg11[%c4_92, %c32, %c4_93] : memref<16x49x30xf32, #tpu.memory_space<vmem>>, vector<8x1x24xf32>
    %112 = arith.addf %110, %111 : vector<8x1x24xf32>
    %c4_94 = arith.constant 4 : index
    %c33 = arith.constant 33 : index
    %c5_95 = arith.constant 5 : index
    %113 = vector.load %arg11[%c4_94, %c33, %c5_95] : memref<16x49x30xf32, #tpu.memory_space<vmem>>, vector<8x1x24xf32>
    %114 = arith.addf %112, %113 : vector<8x1x24xf32>
    %c4_96 = arith.constant 4 : index
    %c34 = arith.constant 34 : index
    %c6_97 = arith.constant 6 : index
    %115 = vector.load %arg11[%c4_96, %c34, %c6_97] : memref<16x49x30xf32, #tpu.memory_space<vmem>>, vector<8x1x24xf32>
    %116 = arith.addf %114, %115 : vector<8x1x24xf32>
    %c5_98 = arith.constant 5 : index
    %c35 = arith.constant 35 : index
    %c0_99 = arith.constant 0 : index
    %117 = vector.load %arg11[%c5_98, %c35, %c0_99] : memref<16x49x30xf32, #tpu.memory_space<vmem>>, vector<8x1x24xf32>
    %118 = arith.addf %116, %117 : vector<8x1x24xf32>
    %c5_100 = arith.constant 5 : index
    %c36 = arith.constant 36 : index
    %c1_101 = arith.constant 1 : index
    %119 = vector.load %arg11[%c5_100, %c36, %c1_101] : memref<16x49x30xf32, #tpu.memory_space<vmem>>, vector<8x1x24xf32>
    %120 = arith.addf %118, %119 : vector<8x1x24xf32>
    %c5_102 = arith.constant 5 : index
    %c37 = arith.constant 37 : index
    %c2_103 = arith.constant 2 : index
    %121 = vector.load %arg11[%c5_102, %c37, %c2_103] : memref<16x49x30xf32, #tpu.memory_space<vmem>>, vector<8x1x24xf32>
    %122 = arith.addf %120, %121 : vector<8x1x24xf32>
    %c5_104 = arith.constant 5 : index
    %c38 = arith.constant 38 : index
    %c3_105 = arith.constant 3 : index
    %123 = vector.load %arg11[%c5_104, %c38, %c3_105] : memref<16x49x30xf32, #tpu.memory_space<vmem>>, vector<8x1x24xf32>
    %124 = arith.addf %122, %123 : vector<8x1x24xf32>
    %c5_106 = arith.constant 5 : index
    %c39 = arith.constant 39 : index
    %c4_107 = arith.constant 4 : index
    %125 = vector.load %arg11[%c5_106, %c39, %c4_107] : memref<16x49x30xf32, #tpu.memory_space<vmem>>, vector<8x1x24xf32>
    %126 = arith.addf %124, %125 : vector<8x1x24xf32>
    %c5_108 = arith.constant 5 : index
    %c40 = arith.constant 40 : index
    %c5_109 = arith.constant 5 : index
    %127 = vector.load %arg11[%c5_108, %c40, %c5_109] : memref<16x49x30xf32, #tpu.memory_space<vmem>>, vector<8x1x24xf32>
    %128 = arith.addf %126, %127 : vector<8x1x24xf32>
    %c5_110 = arith.constant 5 : index
    %c41 = arith.constant 41 : index
    %c6_111 = arith.constant 6 : index
    %129 = vector.load %arg11[%c5_110, %c41, %c6_111] : memref<16x49x30xf32, #tpu.memory_space<vmem>>, vector<8x1x24xf32>
    %130 = arith.addf %128, %129 : vector<8x1x24xf32>
    %c6_112 = arith.constant 6 : index
    %c42 = arith.constant 42 : index
    %c0_113 = arith.constant 0 : index
    %131 = vector.load %arg11[%c6_112, %c42, %c0_113] : memref<16x49x30xf32, #tpu.memory_space<vmem>>, vector<8x1x24xf32>
    %132 = arith.addf %130, %131 : vector<8x1x24xf32>
    %c6_114 = arith.constant 6 : index
    %c43 = arith.constant 43 : index
    %c1_115 = arith.constant 1 : index
    %133 = vector.load %arg11[%c6_114, %c43, %c1_115] : memref<16x49x30xf32, #tpu.memory_space<vmem>>, vector<8x1x24xf32>
    %134 = arith.addf %132, %133 : vector<8x1x24xf32>
    %c6_116 = arith.constant 6 : index
    %c44 = arith.constant 44 : index
    %c2_117 = arith.constant 2 : index
    %135 = vector.load %arg11[%c6_116, %c44, %c2_117] : memref<16x49x30xf32, #tpu.memory_space<vmem>>, vector<8x1x24xf32>
    %136 = arith.addf %134, %135 : vector<8x1x24xf32>
    %c6_118 = arith.constant 6 : index
    %c45 = arith.constant 45 : index
    %c3_119 = arith.constant 3 : index
    %137 = vector.load %arg11[%c6_118, %c45, %c3_119] : memref<16x49x30xf32, #tpu.memory_space<vmem>>, vector<8x1x24xf32>
    %138 = arith.addf %136, %137 : vector<8x1x24xf32>
    %c6_120 = arith.constant 6 : index
    %c46 = arith.constant 46 : index
    %c4_121 = arith.constant 4 : index
    %139 = vector.load %arg11[%c6_120, %c46, %c4_121] : memref<16x49x30xf32, #tpu.memory_space<vmem>>, vector<8x1x24xf32>
    %140 = arith.addf %138, %139 : vector<8x1x24xf32>
    %c6_122 = arith.constant 6 : index
    %c47 = arith.constant 47 : index
    %c5_123 = arith.constant 5 : index
    %141 = vector.load %arg11[%c6_122, %c47, %c5_123] : memref<16x49x30xf32, #tpu.memory_space<vmem>>, vector<8x1x24xf32>
    %142 = arith.addf %140, %141 : vector<8x1x24xf32>
    %c6_124 = arith.constant 6 : index
    %c48 = arith.constant 48 : index
    %c6_125 = arith.constant 6 : index
    %143 = vector.load %arg11[%c6_124, %c48, %c6_125] : memref<16x49x30xf32, #tpu.memory_space<vmem>>, vector<8x1x24xf32>
    %144 = arith.addf %142, %143 : vector<8x1x24xf32>
    %c0_126 = arith.constant 0 : index
    %c0_127 = arith.constant 0 : index
    %145 = vector.load %arg9[%c0_126, %c0_127] : memref<1x1xf32, #tpu.memory_space<vmem>>, vector<1x1xf32>
    %146 = vector.extract %145[0, 0] : f32 from vector<1x1xf32>
    %147 = vector.broadcast %146 : f32 to vector<8x1x24xf32>
    %148 = arith.addf %144, %147 : vector<8x1x24xf32>
    %149 = arith.negf %148 : vector<8x1x24xf32>
    %150 = math.exp %149 : vector<8x1x24xf32>
    %cst_128 = arith.constant 1.000000e+00 : f32
    %151 = vector.broadcast %cst_128 : f32 to vector<8x1x24xf32>
    %152 = arith.addf %151, %150 : vector<8x1x24xf32>
    %153 = arith.divf %151, %152 : vector<8x1x24xf32>
    %c0_129 = arith.constant 0 : index
    %c0_130 = arith.constant 0 : index
    %c0_131 = arith.constant 0 : index
    %c0_132 = arith.constant 0 : index
    %154 = vector.load %arg10[%c0_129, %c0_130, %c0_131, %c0_132] : memref<1x8x1x24xf32, #tpu.memory_space<vmem>>, vector<1x8x1x24xf32>
    %155 = vector.shape_cast %154 : vector<1x8x1x24xf32> to vector<8x1x24xf32>
    %156 = vector.shape_cast %153 : vector<8x1x24xf32> to vector<1x8x1x24xf32>
    tpu.vector_store %arg10[%c0_129, %c0_130, %c0_131, %c0_132], %156 {strides = array<i32>} : memref<1x8x1x24xf32, #tpu.memory_space<vmem>>, vector<1x8x1x24xf32>,
    return
  }
  func.func @transform_0(%arg0: i32, %arg1: i32) -> (i32, i32, i32) {
    %c0_i32 = arith.constant 0 : i32
    %c0_i32_0 = arith.constant 0 : i32
    %c0_i32_1 = arith.constant 0 : i32
    return %arg0, %c0_i32, %c0_i32_0 : i32, i32, i32
  }
  func.func @transform_1(%arg0: i32, %arg1: i32) -> (i32, i32, i32) {
    %c0_i32 = arith.constant 0 : i32
    %c0_i32_0 = arith.constant 0 : i32
    %c0_i32_1 = arith.constant 0 : i32
    return %arg0, %c0_i32, %c0_i32_0 : i32, i32, i32
  }
  func.func @transform_2(%arg0: i32, %arg1: i32) -> (i32, i32) {
    %c0_i32 = arith.constant 0 : i32
    %c0_i32_0 = arith.constant 0 : i32
    %c0_i32_1 = arith.constant 0 : i32
    return %c0_i32, %c0_i32_0 : i32, i32
  }
  func.func @transform_3(%arg0: i32, %arg1: i32) -> (i32, i32) {
    %c0_i32 = arith.constant 0 : i32
    %c0_i32_0 = arith.constant 0 : i32
    %c0_i32_1 = arith.constant 0 : i32
    return %c0_i32, %c0_i32_0 : i32, i32
  }
  func.func @transform_4(%arg0: i32, %arg1: i32) -> (i32, i32) {
    %c0_i32 = arith.constant 0 : i32
    %c0_i32_0 = arith.constant 0 : i32
    %c0_i32_1 = arith.constant 0 : i32
    return %c0_i32, %c0_i32_0 : i32, i32
  }
  func.func @transform_5(%arg0: i32, %arg1: i32) -> (i32, i32) {
    %c0_i32 = arith.constant 0 : i32
    %c0_i32_0 = arith.constant 0 : i32
    %c0_i32_1 = arith.constant 0 : i32
    return %c0_i32, %c0_i32_0 : i32, i32
  }
  func.func @transform_6(%arg0: i32, %arg1: i32) -> (i32, i32) {
    %c0_i32 = arith.constant 0 : i32
    %c0_i32_0 = arith.constant 0 : i32
    %c0_i32_1 = arith.constant 0 : i32
    return %c0_i32, %c0_i32_0 : i32, i32
  }
  func.func @transform_7(%arg0: i32, %arg1: i32) -> (i32, i32) {
    %c0_i32 = arith.constant 0 : i32
    %c0_i32_0 = arith.constant 0 : i32
    %c0_i32_1 = arith.constant 0 : i32
    return %c0_i32, %c0_i32_0 : i32, i32
  }
  func.func @transform_8(%arg0: i32, %arg1: i32) -> (i32, i32, i32, i32) {
    %c0_i32 = arith.constant 0 : i32
    %c0_i32_0 = arith.constant 0 : i32
    %c0_i32_1 = arith.constant 0 : i32
    return %arg0, %arg1, %c0_i32, %c0_i32_0 : i32, i32, i32, i32
  }
}

</mosaic_0001>

<bundles_post_ra>
// kernel: tpu_custom_call.1
= control target key start
LH: loop header
LB: loop body
LE: loop exit
PB: predicated region body
PF: predicated region fallthrough
CT: control target
= control target key end

     0   :  { %s8236_s0 = inlined_call_operand.vmem [shape: f32[2,24,128], index: 0, kind: input, shape index: {}]   ;;  %s8237_s1 = inlined_call_operand.vmem [shape: f32[2,24,128], index: 1, kind: input, shape index: {}]   ;;  %s8238_s2 = inlined_call_operand.vmem [shape: f32[24,1], index: 2, kind: input, shape index: {}]   ;;  %s8239_s3 = inlined_call_operand.vmem [shape: f32[256,32], index: 3, kind: input, shape index: {}]   ;;  %s8240_s4 = inlined_call_operand.vmem [shape: f32[1,32], index: 4, kind: input, shape index: {}]   ;;  %s8241_s5 = inlined_call_operand.vmem [shape: f32[1,32], index: 5, kind: input, shape index: {}]   ;;  %s8242_s6 = inlined_call_operand.vmem [shape: f32[49,32], index: 6, kind: input, shape index: {}]   ;;  %s8243_s7 = inlined_call_operand.<no memory space> [shape: f32[1,1], index: 7, kind: input, shape index: {}]   ;;  %s8244_s8 = inlined_call_operand.hbm [shape: f32[2,16,1,24], index: 8, kind: output, shape index: {}]  }
   0x1   :  { %v13_v0 = vstv %s8243_s7 }
   0x2   :  { %14 = vst [vmem:[#allocation3] sm:$0x1] %v13_v0 }
   0x3   :  { %15 = vsyncpa [#allocation5], 0 }
   0x4   :  { %17 = vsyncpa [#allocation5 + $0x1], 0  ;;  %s5678_s29 = smov 0   ;;  %s5680_s30 = smov 0  }
   0x5   :  { %s5682_s9 = smov 0   ;;  %s5684_s10 = smov 0  }
   0x6   :  { %s5686_s11 = smov 0   ;;  %s5688_s12 = smov 0  }
   0x7   :  { %s5690_s13 = smov 0   ;;  %s5692_s14 = smov 0  }
   0x8 LB: > { %8248 = sst [smem:[#allocation7_spill]] %s5613_s13  ;;  %s5194_s7 = sadd.s32 4294967295, %s5617_s14   ;;  %s5617_s14 = sphi %s5692_s14, %s23_s14   ;;  %s5613_s13 = sphi %s5690_s13, %s8483_s13   ;;  %s5609_s12 = sphi %s5688_s12, %s8488_s12   ;;  %s5605_s11 = sphi %s5686_s11, %s8481_s11   ;;  %s5601_s10 = sphi %s5684_s10, %s8487_s10   ;;  %s5597_s9 = sphi %s5682_s9, %s8486_s9   ;;  %s5593_s30 = sphi %s5680_s30, %s8485_s30   ;;  %s5589_s29 = sphi %s5678_s29, %s8484_s29  }
   0x9   : > { %s5195_s15 = sadd.s32 4294967294, %s5617_s14   ;;  %s32_s16 = sadd.s32 1, %s5609_s12 }
   0xa   : > { %p33_p0 = scmp.ge.s32.totalorder %s32_s16, 2  ;;  %s35_s17 = sadd.s32 1, %s5613_s13 }
   0xb   : > { %p232_p1 = scmp.ne.s32.totalorder %s5597_s9, %s5593_s30  ;;  %p233_p2 = scmp.eq.s32.totalorder %s5194_s7, 3 }
   0xc   : > { %s8490_s16 = smov (%p33_p0, %s32_s16), 0  ;;  %s8492_s17 = smov (!%p33_p0, %s35_s17), %s5613_s13 }
   0xd   : > { %8249 = sst [smem:[#allocation8_spill]] %s8490_s16  ;;  %s218_s18 = ssub.s32 %s5609_s12, %s8490_s16 }
   0xe   : > { %p5729_p3 = por %p233_p2, %p232_p1  ;;  %p37_p4 = scmp.ge.s32.totalorder %s8492_s17, 2 }
   0xf   : > { %p238_p5 = scmp.ne.s32.totalorder %s5593_s30, %s5589_s29  ;;  %p239_p6 = scmp.eq.s32.totalorder %s5195_s15, 3 }
  0x10   : > { %p5198_p7 = scmp.ge.s32.totalorder %s5617_s14, 1  ;;  %s8494_s17 = smov (%p37_p4, %s8492_s17), 0 }
  0x11   : > { %8251 = sst [smem:[#allocation9_spill]] %s8494_s17  ;;  %p5738_p8 = por %p239_p6, %p238_p5 }
  0x12   : > { %p291_p9 = scmp.lt.s32.totalorder %s5617_s14, 5  ;;  %s217_s21 = ssub.s32 %s5613_s13, %s8494_s17 }
  0x13   : > { %s222_s22 = sadd.s32 1, %s5597_s9  ;;  %s219_s23 = sor.u32 %s218_s18, %s217_s21 }
  0x14   : > { %p292_p10 = pnand %p5198_p7, %p291_p9  ;;  %p220_p11 = scmp.eq.s32.totalorder %s219_s23, 0 }
  0x16   : > { %s5747_s24 = scalar_select %p220_p11, %s5597_s9, %s222_s22  }
  0x17   : > { %295 = sbr.rel (%p292_p10) target bundleno = 1828 (0x724), region = 52 }
  0x1c   : > { %v558_v1 = vld [vmem:[%s8239_s3 + $0x78] sm:$0xff]  ;;  %v557_v3 = vld [vmem:[%s8239_s3 + $0x70] sm:$0xff]  ;;  %p330_p12 = scmp.lt.s32.totalorder %s5605_s11, 1  ;;  %v556_v5 = vld [vmem:[%s8239_s3 + $0x68] sm:$0xff]  ;;  %s5803_s18 = sshll.u32 %s5601_s10, 3  ;;  %vm1008_vm0 = vcmask 261120  }
  0x1d   : > { %v574_v2 = vld [vmem:[%s8239_s3 + $0xf8] sm:$0xff]  ;;  %579 = vmatpush.msra.mxu0 %v558_v1  ;;  %v573_v4 = vld [vmem:[%s8239_s3 + $0xf0] sm:$0xff]  ;;  %v572_v6 = vld [vmem:[%s8239_s3 + $0xe8] sm:$0xff]  ;;  %s5920_s10 = scalar_lea.vmem %s8238_s2, %s5803_s18  ;;  %vm1990_vm1 = vcmask 23552   ;;  %vm2104_vm2 = vcmask 244952   ;;  %vm2666_vm3 = vcmask 220184  }
  0x1e   : > { %740 = vmatpush.msra.mxu1 %v574_v2  ;;  %s5769_s27 = scalar_select %p330_p12, %s5605_s11, 1  ;;  %v555_v7 = vld [vmem:[%s8239_s3 + $0x60] sm:$0xff]  ;;  %v554_v9 = vld [vmem:[%s8239_s3 + $0x58] sm:$0xff]  ;;  %v553_v11 = vld [vmem:[%s8239_s3 + $0x50] sm:$0xff]  ;;  %vm1997_vm4 = vcmask 16384   ;;  %vm2111_vm5 = vcmask 237784  }
  0x1f   : > { %580 = vmatpush.msra.mxu0 %v557_v3  ;;  %v571_v8 = vld [vmem:[%s8239_s3 + $0xe0] sm:$0xff]  ;;  %v570_v10 = vld [vmem:[%s8239_s3 + $0xd8] sm:$0xff]  ;;  %v569_v12 = vld [vmem:[%s8239_s3 + $0xd0] sm:$0xff]  ;;  %vm2673_vm6 = vcmask 213016   ;;  %s5622_s25 = smov 126   ;;  %s5623_s13 = smov 127  }
  0x20   : > { %741 = vmatpush.msra.mxu1 %v573_v4  ;;  %s5382_s26 = smul.u32 24, %s5769_s27  ;;  %v552_v13 = vld [vmem:[%s8239_s3 + $0x48] sm:$0xff]  ;;  %v551_v15 = vld [vmem:[%s8239_s3 + $0x40] sm:$0xff]  ;;  %v550_v17 = vld [vmem:[%s8239_s3 + $0x38] sm:$0xff]  ;;  %s5624_s16 = smov 125   ;;  %vm5077_vm11 = vcmask 188416  }
  0x21   : > { %581 = vmatpush.msra.mxu0 %v556_v5  ;;  %v568_v14 = vld [vmem:[%s8239_s3 + $0xc8] sm:$0xff]  ;;  %v567_v16 = vld [vmem:[%s8239_s3 + $0xc0] sm:$0xff]  ;;  %v566_v18 = vld [vmem:[%s8239_s3 + $0xb8] sm:$0xff]  ;;  %s5625_s28 = smov 123   ;;  %s5627_s7 = smov 122  }
  0x22   : > { %742 = vmatpush.msra.mxu1 %v572_v6  ;;  %s334_s15 = scalar_lea.vmem %s8236_s0, %s5382_s26  ;;  %v549_v19 = vld [vmem:[%s8239_s3 + $0x30] sm:$0xff]  ;;  %v548_v22 = vld [vmem:[%s8239_s3 + $0x28] sm:$0xff]  ;;  %s5835_s23 = scalar_lea.vmem %s8237_s1, %s5382_s26  ;;  %v547_v24 = vld [vmem:[%s8239_s3 + $0x20] sm:$0xff] }
  0x23   : > { %582 = vmatpush.msra.mxu0 %v555_v7  ;;  %s5815_s27 = scalar_lea.vmem %s334_s15, %s5803_s18  ;;  %v565_v20 = vld [vmem:[%s8239_s3 + $0xb0] sm:$0xff]  ;;  %v564_v23 = vld [vmem:[%s8239_s3 + $0xa8] sm:$0xff]  ;;  %v563_v25 = vld [vmem:[%s8239_s3 + $0xa0] sm:$0xff]  ;;  %s5620_s15 = smov 3  }
  0x24   : > { %743 = vmatpush.msra.mxu1 %v571_v8  ;;  %v5824_v21 = vld [vmem:[%s5815_s27] sm:$0xff]  ;;  %v546_v28 = vld [vmem:[%s8239_s3 + $0x18] sm:$0xff]  ;;  %v545_v30 = vld [vmem:[%s8239_s3 + $0x10] sm:$0xff]  ;;  %s5626_s26 = smov 124  }
  0x25   : > { %583 = vmatpush.msra.mxu0 %v554_v9  ;;  %v367_v26 = vperm.slane %v5824_v21, 0  ;;  %v5845_v27 = vld [vmem:[%s5835_s23] sm:$0xff]  ;;  %v562_v29 = vld [vmem:[%s8239_s3 + $0x98] sm:$0xff]  ;;  %v561_v31 = vld [vmem:[%s8239_s3 + $0x90] sm:$0xff]  ;;  %v353_v45 = vrot.slane %v5824_v21, 1  ;;  %v354_v56 = vrot.slane %v5824_v21, 2 }
  0x26   : > { %744 = vmatpush.msra.mxu1 %v570_v10  ;;  %v544_v33 = vld [vmem:[%s8239_s3 + $0x8] sm:$0xff]  ;;  %v543_v35 = vld [vmem:[%s8239_s3] sm:$0xff]  ;;  %v5879_v43 = vld [vmem:[%s5835_s23 + $0x10] sm:$0xff]  ;;  %v355_v3 = vrot.slane %v5824_v21, 3 }
  0x27   : > { %584 = vmatpush.msra.mxu0 %v553_v11  ;;  %v399_v32 = vsub.f32 %v367_v26, %v5845_v27  ;;  %v560_v34 = vld [vmem:[%s8239_s3 + $0x88] sm:$0xff]  ;;  %v559_v36 = vld [vmem:[%s8239_s3 + $0x80] sm:$0xff]  ;;  %v495_v38 = vmul.f32 %v367_v26, %v5845_v27  ;;  %v401_v44 = vsub.f32 %v367_v26, %v5879_v43  ;;  %v497_v47 = vmul.f32 %v367_v26, %v5879_v43 }
  0x28   : > { %745 = vmatpush.msra.mxu1 %v569_v12  ;;  %v5874_v39 = vld [vmem:[%s5835_s23 + $0x8] sm:$0xff]  ;;  %v368_v48 = vperm.slane %v353_v45, 0  ;;  %v369_v59 = vperm.slane %v354_v56, 0  ;;  %v370_v6 = vperm.slane %v355_v3, 0  ;;  %v5619_v45 = vmov 0  }
  0x29   : > { %585 = vmatpush.msra.mxu0 %v552_v13  ;;  %v447_v37 = vand.u32 2147483647, %v399_v32  ;;  %v400_v40 = vsub.f32 %v367_v26, %v5874_v39  ;;  %v496_v42 = vmul.f32 %v367_v26, %v5874_v39  ;;  %v449_v46 = vand.u32 2147483647, %v401_v44  ;;  %5467 = vset.pattern.permute.xlu0 %v5619_v45 }
  0x2a   : > { %746 = vmatpush.msra.mxu1 %v568_v14  ;;  %v402_v49 = vsub.f32 %v368_v48, %v5845_v27  ;;  %v498_v51 = vmul.f32 %v368_v48, %v5845_v27  ;;  %v403_v52 = vsub.f32 %v368_v48, %v5874_v39  ;;  %v499_v54 = vmul.f32 %v368_v48, %v5874_v39 }
  0x2b   : > { %586 = vmatpush.msra.mxu0 %v551_v15  ;;  %v448_v41 = vand.u32 2147483647, %v400_v40  ;;  %v404_v55 = vsub.f32 %v368_v48, %v5879_v43  ;;  %v500_v58 = vmul.f32 %v368_v48, %v5879_v43  ;;  %v405_v60 = vsub.f32 %v369_v59, %v5845_v27  ;;  %v5923_v40 = vld [vmem:[%s5920_s10] sm:$0xff]  ;;  %5468 = vset.pattern.permute.xlu1 %v5619_v45 }
  0x2c   : > { %747 = vmatpush.msra.mxu1 %v567_v16  ;;  %v450_v50 = vand.u32 2147483647, %v402_v49  ;;  %v451_v53 = vand.u32 2147483647, %v403_v52  ;;  %v501_v62 = vmul.f32 %v369_v59, %v5845_v27  ;;  %v406_v63 = vsub.f32 %v369_v59, %v5874_v39  ;;  %5469 = vset.pattern.permute.xlu2 %v5619_v45 }
  0x2d   : > { %587 = vmatpush.msra.mxu0 %v550_v17  ;;  %v452_v57 = vand.u32 2147483647, %v404_v55  ;;  %v453_v61 = vand.u32 2147483647, %v405_v60  ;;  %v502_v1 = vmul.f32 %v369_v59, %v5874_v39  ;;  %v407_v2 = vsub.f32 %v369_v59, %v5879_v43 }
  0x2e   : > { %748 = vmatpush.msra.mxu1 %v566_v18  ;;  %v454_v0 = vand.u32 2147483647, %v406_v63  ;;  %v503_v5 = vmul.f32 %v369_v59, %v5879_v43  ;;  %v408_v7 = vsub.f32 %v370_v6, %v5845_v27  ;;  %v504_v9 = vmul.f32 %v370_v6, %v5845_v27 }
  0x2f   : > { %588 = vmatpush.msra.mxu0 %v549_v19  ;;  %v455_v4 = vand.u32 2147483647, %v407_v2  ;;  %v409_v10 = vsub.f32 %v370_v6, %v5874_v39  ;;  %v505_v12 = vmul.f32 %v370_v6, %v5874_v39  ;;  %v410_v13 = vsub.f32 %v370_v6, %v5879_v43 }
  0x30   : > { %749 = vmatpush.msra.mxu1 %v565_v20  ;;  %v456_v8 = vand.u32 2147483647, %v408_v7  ;;  %v356_v14 = vrot.slane %v5824_v21, 4  ;;  %v506_v16 = vmul.f32 %v370_v6, %v5879_v43  ;;  %v357_v26 = vrot.slane %v5824_v21, 5 }
  0x31   : > { %589 = vmatpush.msra.mxu0 %v548_v22  ;;  %v457_v11 = vand.u32 2147483647, %v409_v10  ;;  %v458_v15 = vand.u32 2147483647, %v410_v13  ;;  %v1798_v44 = vperm.slane %v5923_v40, 0 }
  0x32   : > { %750 = vmatpush.msra.mxu1 %v564_v23  ;;  %v371_v17 = vperm.slane %v356_v14, 0 }
  0x33   : > { %590 = vmatpush.msra.mxu0 %v547_v24  ;;  %1815 = vperm.xlu0 %5467, %v1798_v44  }
  0x34   : > { %751 = vmatpush.msra.mxu1 %v563_v25  ;;  %v411_v18 = vsub.f32 %v371_v17, %v5845_v27  ;;  %v507_v20 = vmul.f32 %v371_v17, %v5845_v27  ;;  %v412_v22 = vsub.f32 %v371_v17, %v5874_v39  ;;  %v508_v24 = vmul.f32 %v371_v17, %v5874_v39 }
  0x35   : > { %591 = vmatpush.msra.mxu0 %v546_v28  ;;  %v413_v25 = vsub.f32 %v371_v17, %v5879_v43 }
  0x36   : > { %752 = vmatpush.msra.mxu1 %v562_v29  ;;  %v459_v19 = vand.u32 2147483647, %v411_v18  ;;  %v460_v23 = vand.u32 2147483647, %v412_v22  ;;  %v509_v29 = vmul.f32 %v371_v17, %v5879_v43  ;;  %v359_v17 = vrot.slane %v5824_v21, 7 }
  0x37   : > { %592 = vmatpush.msra.mxu0 %v545_v30  ;;  %v461_v28 = vand.u32 2147483647, %v413_v25  ;;  %v372_v30 = vperm.slane %v357_v26, 0  ;;  %v1785_v26 = vrot.slane %v5923_v40, 2 }
  0x38   : > { %753 = vmatpush.msra.mxu1 %v561_v31 }
  0x39   : > { %593 = vmatpush.msra.mxu0 %v544_v33  ;;  %v414_v31 = vsub.f32 %v372_v30, %v5845_v27  ;;  %v510_v33 = vmul.f32 %v372_v30, %v5845_v27 }
  0x3a   : > { %754 = vmatpush.msra.mxu1 %v560_v34  ;;  %v415_v34 = vsub.f32 %v372_v30, %v5874_v39 }
  0x3b   : > { %594 = vmatpush.msra.mxu0 %v543_v35  ;;  %v462_v32 = vand.u32 2147483647, %v414_v31 }
  0x3c   : > { %755 = vmatpush.msra.mxu1 %v559_v36  ;;  %595 = vmatmul.f32.vlgmr.msra.gmra.mxu0 %v447_v37  ;;  %v463_v35 = vand.u32 2147483647, %v415_v34  ;;  %v511_v36 = vmul.f32 %v372_v30, %v5874_v39 }
  0x3d   : > { %756 = vmatmul.f32.vlgmr.msra.gmra.mxu1 %v495_v38 }
  0x44   : > { %598 = vmatmul.f32.gmra.mxu0 %v448_v41  ;;  %v416_v41 = vsub.f32 %v372_v30, %v5879_v43 }
  0x45   : > { %759 = vmatmul.f32.gmra.mxu1 %v496_v42  ;;  %v358_v42 = vrot.slane %v5824_v21, 6  ;;  %v5967_v21 = vld [vmem:[%s8242_s6 + $0x10] sm:$0xff] }
  0x47   : > { %v373_v48 = vperm.slane %v358_v42, 0 }
  0x49   : > { %v417_v52 = vsub.f32 %v373_v48, %v5845_v27  ;;  %v419_v14 = vsub.f32 %v373_v48, %v5879_v43  ;;  %v515_v22 = vmul.f32 %v373_v48, %v5879_v43 }
  0x4b   : > { %v465_v56 = vand.u32 2147483647, %v417_v52 }
  0x4c   : > { %601 = vmatmul.f32.gmra.mxu0 %v449_v46  ;;  %v464_v46 = vand.u32 2147483647, %v416_v41  ;;  %v1786_v41 = vrot.slane %v5923_v40, 3 }
  0x4d   : > { %762 = vmatmul.f32.gmra.mxu1 %v497_v47  ;;  %v512_v47 = vmul.f32 %v372_v30, %v5879_v43  ;;  %v1800_v30 = vperm.slane %v1785_v26, 0 }
  0x4f   : > { %1823 = vperm.xlu1 %5468, %v1800_v30  }
  0x54   : > { %604 = vmatmul.f32.gmra.mxu0 %v450_v50 }
  0x55   : > { %765 = vmatmul.f32.gmra.mxu1 %v498_v51  ;;  %v1784_v51 = vrot.slane %v5923_v40, 1 }
  0x5c   : > { %607 = vmatmul.f32.gmra.mxu0 %v451_v53  ;;  %v1799_v53 = vperm.slane %v1784_v51, 0 }
  0x5d   : > { %768 = vmatmul.f32.gmra.mxu1 %v499_v54  ;;  %v5934_v54 = vld [vmem:[%s8240_s4] ss:$0 sm:$0xff] }
  0x5e   : > { %1819 = vperm.xlu0 %5467, %v1799_v53  }
  0x64   : > { %610 = vmatmul.f32.gmra.mxu0 %v452_v57  ;;  %v513_v57 = vmul.f32 %v373_v48, %v5845_v27 }
  0x65   : > { %771 = vmatmul.f32.gmra.mxu1 %v500_v58 }
  0x6c   : > { %613 = vmatmul.f32.gmra.mxu0 %v453_v61  ;;  %v1789_v61 = vrot.slane %v5923_v40, 6 }
  0x6d   : > { %774 = vmatmul.f32.gmra.mxu1 %v501_v62  ;;  %v418_v62 = vsub.f32 %v373_v48, %v5874_v39 }
  0x6e   : > { %v1804_v2 = vperm.slane %v1789_v61, 0 }
  0x70   : > { %1839 = vperm.xlu0 %5467, %v1804_v2  }
  0x74   : > { %616 = vmatmul.f32.gmra.mxu0 %v454_v0 }
  0x75   : > { %777 = vmatmul.f32.gmra.mxu1 %v502_v1 }
  0x7c   : > { %619 = vmatmul.f32.gmra.mxu0 %v455_v4  ;;  %v5945_v4 = vld [vmem:[%s8241_s5] ss:$0 sm:$0xff] }
  0x7d   : > { %780 = vmatmul.f32.gmra.mxu1 %v503_v5  ;;  %v466_v5 = vand.u32 2147483647, %v418_v62 }
  0x84   : > { %622 = vmatmul.f32.gmra.mxu0 %v456_v8 }
  0x85   : > { %783 = vmatmul.f32.gmra.mxu1 %v504_v9  ;;  %v514_v9 = vmul.f32 %v373_v48, %v5874_v39  ;;  %v1801_v48 = vperm.slane %v1786_v41, 0 }
  0x87   : > { %1827 = vperm.xlu1 %5468, %v1801_v48  }
  0x8c   : > { %625 = vmatmul.f32.gmra.mxu0 %v457_v11 }
  0x8d   : > { %786 = vmatmul.f32.gmra.mxu1 %v505_v12  ;;  %v5950_v12 = vld [vmem:[%s5920_s10 + $0x8] sm:$0xff] }
  0x8e   : > { %v1791_v13 = vrot.slane %v5950_v12, 1  ;;  %v1797_v44 = vrot.slane %v5950_v12, 7 }
  0x90   : > { %v1807_v18 = vperm.slane %v1791_v13, 0 }
  0x92   : > { %1851 = vperm.xlu0 %5467, %v1807_v18  }
  0x94   : > { %628 = vmatmul.f32.gmra.mxu0 %v458_v15 }
  0x95   : > { %789 = vmatmul.f32.gmra.mxu1 %v506_v16 }
  0x9c   : > { %631 = vmatmul.f32.gmra.mxu0 %v459_v19 }
  0x9d   : > { %792 = vmatmul.f32.gmra.mxu1 %v507_v20  ;;  %v467_v20 = vand.u32 2147483647, %v419_v14 }
  0xa4   : > { %634 = vmatmul.f32.gmra.mxu0 %v460_v23  ;;  %v374_v23 = vperm.slane %v359_v17, 0 }
  0xa5   : > { %795 = vmatmul.f32.gmra.mxu1 %v508_v24 }
  0xa6   : > { %v516_v34 = vmul.f32 %v374_v23, %v5845_v27  ;;  %v421_v42 = vsub.f32 %v374_v23, %v5874_v39 }
  0xa8   : > { %v469_v51 = vand.u32 2147483647, %v421_v42 }
  0xac   : > { %637 = vmatmul.f32.gmra.mxu0 %v461_v28  ;;  %v1794_v28 = vrot.slane %v5950_v12, 4 }
  0xad   : > { %798 = vmatmul.f32.gmra.mxu1 %v509_v29  ;;  %v420_v29 = vsub.f32 %v374_v23, %v5845_v27 }
  0xae   : > { %v1810_v31 = vperm.slane %v1794_v28, 0 }
  0xb0   : > { %1863 = vperm.xlu0 %5467, %v1810_v31  }
  0xb4   : > { %640 = vmatmul.f32.gmra.mxu0 %v462_v32 }
  0xb5   : > { %801 = vmatmul.f32.gmra.mxu1 %v510_v33  ;;  %v468_v33 = vand.u32 2147483647, %v420_v29 }
  0xb9   : > { %v596_v37 = vpop.f32.mrf.mxu0 }
  0xba   : > { %v757_v38 = vpop.f32.mrf.mxu1  ;;  %v597_v63 = vadd.f32 %v5934_v54, %v596_v37 }
  0xbc   : > { %643 = vmatmul.f32.gmra.mxu0 %v463_v35  ;;  %v758_v6 = vadd.f32 %v757_v38, %v597_v63  ;;  %v5980_v38 = vld [vmem:[%s8242_s6 + $0x18] sm:$0xff]  ;;  %v422_v63 = vsub.f32 %v374_v23, %v5879_v43 }
  0xbd   : > { %804 = vmatmul.f32.gmra.mxu1 %v511_v36 }
  0xbe   : > { %v901_v15 = vmax.f32 %v758_v6, 0.0 }
  0xc0   : > { %v953_v19 = vadd.f32 %v5945_v4, %v901_v15 }
  0xc1   : > { %v599_v49 = vpop.f32.mrf.mxu0 }
  0xc2   : > { %v760_v50 = vpop.f32.mrf.mxu1  ;;  %v600_v55 = vadd.f32 %v5934_v54, %v599_v49  ;;  %v1813_v49 = vperm.slane %v1797_v44, 0 }
  0xc4   : > { %646 = vmatmul.f32.gmra.mxu0 %v464_v46  ;;  %v761_v0 = vadd.f32 %v760_v50, %v600_v55  ;;  %1875 = vperm.xlu0 %5467, %v1813_v49  }
  0xc5   : > { %807 = vmatmul.f32.gmra.mxu1 %v512_v47 }
  0xc6   : > { %v902_v7 = vmax.f32 %v761_v0, 0.0 }
  0xc8   : > { %v954_v16 = vadd.f32 %v5945_v4, %v902_v7 }
  0xc9   : > { %v602_v58 = vpop.f32.mrf.mxu0 }
  0xca   : > { %v763_v59 = vpop.f32.mrf.mxu1  ;;  %v603_v60 = vadd.f32 %v5934_v54, %v602_v58 }
  0xcc   : > { %v764_v1 = vadd.f32 %v763_v59, %v603_v60  ;;  %649 = vmatmul.f32.gmra.mxu0 %v465_v56  ;;  %v517_v56 = vmul.f32 %v374_v23, %v5874_v39  ;;  %v5995_v59 = vld [vmem:[%s8242_s6 + $0x20] sm:$0xff]  ;;  %v1790_v60 = vrot.slane %v5923_v40, 7 }
  0xcd   : > { %810 = vmatmul.f32.gmra.mxu1 %v513_v57 }
  0xce   : > { %v903_v3 = vmax.f32 %v764_v1, 0.0  ;;  %v1805_v0 = vperm.slane %v1790_v60, 0  ;;  %v6001_v1 = vld [vmem:[%s5815_s27 + $0x8] sm:$0xff] }
  0xcf   : > { %v375_v6 = vperm.slane %v6001_v1, 0  ;;  %v360_v44 = vrot.slane %v6001_v1, 1 }
  0xd0   : > { %v955_v8 = vadd.f32 %v5945_v4, %v903_v3  ;;  %1843 = vperm.xlu1 %5468, %v1805_v0   ;;  %v470_v3 = vand.u32 2147483647, %v422_v63 }
  0xd1   : > { %v605_v10 = vpop.f32.mrf.mxu0  ;;  %v425_v42 = vsub.f32 %v375_v6, %v5879_v43  ;;  %v376_v48 = vperm.slane %v360_v44, 0  ;;  %v1787_v44 = vrot.slane %v5923_v40, 4 }
  0xd2   : > { %v766_v11 = vpop.f32.mrf.mxu1  ;;  %5203 = vmatpush.xpose.msk.msrb.mxu0 %vm1008_vm0, %v955_v8  ;;  %5376 = vmatpush.xpose.msk.msra.mxu2 %vm1008_vm0, %v955_v8  ;;  %v606_v45 = vadd.f32 %v5934_v54, %v605_v10  ;;  %v1792_v10 = vrot.slane %v5950_v12, 2 }
  0xd4   : > { %652 = vmatmul.f32.gmra.mxu0 %v466_v5  ;;  %v767_v52 = vadd.f32 %v766_v11, %v606_v45  ;;  %v518_v5 = vmul.f32 %v374_v23, %v5879_v43  ;;  %v423_v11 = vsub.f32 %v375_v6, %v5845_v27  ;;  %v1808_v13 = vperm.slane %v1792_v10, 0 }
  0xd5   : > { %813 = vmatmul.f32.gmra.mxu1 %v514_v9  ;;  %v6015_v9 = vld [vmem:[%s8242_s6 + $0x28] sm:$0xff]  ;;  %v424_v23 = vsub.f32 %v375_v6, %v5874_v39  ;;  %v523_v10 = vmul.f32 %v376_v48, %v5874_v39 }
  0xd6   : > { %5204 = vmatpush.xpose.msk.msrb.mxu0 %vm1008_vm0, %v954_v16  ;;  %5377 = vmatpush.xpose.msk.msra.mxu2 %vm1008_vm0, %v954_v16  ;;  %v904_v61 = vmax.f32 %v767_v52, 0.0  ;;  %v471_v15 = vand.u32 2147483647, %v423_v11  ;;  %v519_v16 = vmul.f32 %v375_v6, %v5845_v27  ;;  %v426_v52 = vsub.f32 %v376_v48, %v5845_v27 }
  0xd7   : > { %v472_v30 = vand.u32 2147483647, %v424_v23 }
  0xd8   : > { %v956_v2 = vadd.f32 %v5945_v4, %v904_v61  ;;  %1855 = vperm.xlu1 %5468, %v1808_v13   ;;  %v6066_v61 = vld [vmem:[%s8242_s6 + $0x8] sm:$0xff] }
  0xd9   : > { %v608_v24 = vpop.f32.mrf.mxu0 }
  0xda   : > { %v769_v25 = vpop.f32.mrf.mxu1  ;;  %5205 = vmatpush.xpose.msk.msrb.mxu0 %vm1008_vm0, %v953_v19  ;;  %5378 = vmatpush.xpose.msk.msra.mxu2 %vm1008_vm0, %v953_v19  ;;  %v609_v32 = vadd.f32 %v5934_v54, %v608_v24 }
  0xdc   : > { %655 = vmatmul.f32.gmra.mxu0 %v467_v20  ;;  %v770_v46 = vadd.f32 %v769_v25, %v609_v32  ;;  %v6029_v20 = vld [vmem:[%s8242_s6 + $0x30] sm:$0x1] }
  0xdd   : > { %816 = vmatmul.f32.gmra.mxu1 %v515_v22  ;;  %5208 = vmatmul.msk.f32.vlgmr.msra.gmra.mxu2 %vm1008_vm0, %v5967_v21  ;;  %v1795_v22 = vrot.slane %v5950_v12, 5 }
  0xde   : > { %v905_v53 = vmax.f32 %v770_v46, 0.0  ;;  %v473_v46 = vand.u32 2147483647, %v425_v42 }
  0xdf   : > { %v1811_v28 = vperm.slane %v1795_v22, 0  ;;  %v524_v22 = vmul.f32 %v376_v48, %v5879_v43 }
  0xe0   : > { %v957_v62 = vadd.f32 %v5945_v4, %v905_v53 }
  0xe1   : > { %v611_v35 = vpop.f32.mrf.mxu0  ;;  %1867 = vperm.xlu1 %5468, %v1811_v28  }
  0xe2   : > { %v772_v36 = vpop.f32.mrf.mxu1  ;;  %v612_v37 = vadd.f32 %v5934_v54, %v611_v35 }
  0xe4   : > { %v773_v47 = vadd.f32 %v772_v36, %v612_v37  ;;  %658 = vmatmul.f32.gmra.mxu0 %v468_v33 }
  0xe5   : > { %819 = vmatmul.f32.gmra.mxu1 %v516_v34  ;;  %5209 = vmatmul.msk.f32.gmra.mxu2 %vm1008_vm0, %v5980_v38  ;;  %v520_v34 = vmul.f32 %v375_v6, %v5874_v39 }
  0xe6   : > { %v906_v50 = vmax.f32 %v773_v47, 0.0  ;;  %v521_v47 = vmul.f32 %v375_v6, %v5879_v43 }
  0xe8   : > { %v958_v55 = vadd.f32 %v5945_v4, %v906_v50 }
  0xe9   : > { %v614_v57 = vpop.f32.mrf.mxu0 }
  0xea   : > { %v775_v58 = vpop.f32.mrf.mxu1  ;;  %5213 = vmatpush.xpose.msk.msrb.mxu1 %vm1008_vm0, %v958_v55  ;;  %5379 = vmatpush.xpose.msk.msra.mxu3 %vm1008_vm0, %v958_v55  ;;  %v615_v24 = vadd.f32 %v5934_v54, %v614_v57  ;;  %v474_v55 = vand.u32 2147483647, %v426_v52  ;;  %v1802_v52 = vperm.slane %v1787_v44, 0 }
  0xec   : > { %661 = vmatmul.f32.gmra.mxu0 %v469_v51  ;;  %v776_v31 = vadd.f32 %v775_v58, %v615_v24  ;;  %v6053_v51 = vld [vmem:[%s8242_s6] sm:$0xff]  ;;  %1831 = vperm.xlu2 %5469, %v1802_v52  }
  0xed   : > { %822 = vmatmul.f32.gmra.mxu1 %v517_v56  ;;  %5210 = vmatmul.msk.f32.gmra.mxu2 %vm1008_vm0, %v5995_v59  ;;  %v522_v56 = vmul.f32 %v376_v48, %v5845_v27 }
  0xee   : > { %5214 = vmatpush.xpose.msk.msrb.mxu1 %vm1008_vm0, %v957_v62  ;;  %5380 = vmatpush.xpose.msk.msra.mxu3 %vm1008_vm0, %v957_v62  ;;  %v907_v37 = vmax.f32 %v776_v31, 0.0  ;;  %v427_v62 = vsub.f32 %v376_v48, %v5874_v39 }
  0xf0   : > { %v959_v45 = vadd.f32 %v5945_v4, %v907_v37 }
  0xf1   : > { %v617_v7 = vpop.f32.mrf.mxu0 }
  0xf2   : > { %v778_v8 = vpop.f32.mrf.mxu1  ;;  %5215 = vmatpush.xpose.msk.msrb.mxu1 %vm1008_vm0, %v956_v2  ;;  %5381 = vmatpush.xpose.msk.msra.mxu3 %vm1008_vm0, %v956_v2  ;;  %v618_v14 = vadd.f32 %v5934_v54, %v617_v7 }
  0xf4   : > { %664 = vmatmul.f32.gmra.mxu0 %v470_v3  ;;  %v779_v25 = vadd.f32 %v778_v8, %v618_v14 }
  0xf5   : > { %825 = vmatmul.f32.gmra.mxu1 %v518_v5  ;;  %5218 = vmatmul.msk.f32.vlgmr.msra.gmra.mxu3 %vm1008_vm0, %v5967_v21  ;;  %v475_v5 = vand.u32 2147483647, %v427_v62 }
  0xf6   : > { %5211 = vmatmul.msk.f32.gmra.mxu2 %vm1008_vm0, %v6015_v9  ;;  %v908_v32 = vmax.f32 %v779_v25, 0.0 }
  0xf8   : > { %v960_v41 = vadd.f32 %v5945_v4, %v908_v32 }
  0xf9   : > { %v620_v17 = vpop.f32.mrf.mxu0 }
  0xfa   : > { %v781_v18 = vpop.f32.mrf.mxu1  ;;  %v621_v19 = vadd.f32 %v5934_v54, %v620_v17  ;;  %v361_v17 = vrot.slane %v6001_v1, 2 }
  0xfc   : > { %v782_v26 = vadd.f32 %v781_v18, %v621_v19  ;;  %667 = vmatmul.f32.gmra.mxu0 %v471_v15  ;;  %v377_v23 = vperm.slane %v361_v17, 0 }
  0xfd   : > { %828 = vmatmul.f32.gmra.mxu1 %v519_v16  ;;  %5219 = vmatmul.msk.f32.gmra.mxu3 %vm1008_vm0, %v5980_v38  ;;  %v428_v16 = vsub.f32 %v376_v48, %v5879_v43 }
  0xfe   : > { %5212 = vmatmul.msk.f32.gmra.mxu2 %vm1008_vm0, %v6029_v20  ;;  %v909_v29 = vmax.f32 %v782_v26, 0.0  ;;  %v429_v26 = vsub.f32 %v377_v23, %v5845_v27  ;;  %v430_v37 = vsub.f32 %v377_v23, %v5874_v39  ;;  %v526_v48 = vmul.f32 %v377_v23, %v5874_v39 }
  0xff   : > { %v476_v19 = vand.u32 2147483647, %v428_v16 }
 0x100   : > { %v961_v33 = vadd.f32 %v5945_v4, %v909_v29  ;;  %v477_v29 = vand.u32 2147483647, %v429_v26 }
 0x101   : > { %v623_v35 = vpop.f32.mrf.mxu0 }
 0x102   : > { %v784_v36 = vpop.f32.mrf.mxu1  ;;  %5223 = vmatpush.xpose.msk.msrb.mxu2 %vm1008_vm0, %v961_v33  ;;  %v624_v63 = vadd.f32 %v5934_v54, %v623_v35 }
 0x104   : > { %670 = vmatmul.f32.gmra.mxu0 %v472_v30  ;;  %v785_v6 = vadd.f32 %v784_v36, %v624_v63  ;;  %v525_v30 = vmul.f32 %v377_v23, %v5845_v27  ;;  %v527_v63 = vmul.f32 %v377_v23, %v5879_v43 }
 0x105   : > { %831 = vmatmul.f32.gmra.mxu1 %v520_v34  ;;  %5220 = vmatmul.msk.f32.gmra.mxu3 %vm1008_vm0, %v5995_v59 }
 0x106   : > { %5224 = vmatpush.xpose.msk.msrb.mxu2 %vm1008_vm0, %v960_v41  ;;  %v910_v14 = vmax.f32 %v785_v6, 0.0 }
 0x108   : > { %v962_v18 = vadd.f32 %v5945_v4, %v910_v14 }
 0x109   : > { %v626_v49 = vpop.f32.mrf.mxu0 }
 0x10a   : > { %v787_v50 = vpop.f32.mrf.mxu1  ;;  %5225 = vmatpush.xpose.msk.msrb.mxu2 %vm1008_vm0, %v959_v45  ;;  %v627_v53 = vadd.f32 %v5934_v54, %v626_v49 }
 0x10c   : > { %673 = vmatmul.f32.gmra.mxu0 %v473_v46  ;;  %v788_v0 = vadd.f32 %v787_v50, %v627_v53 }
 0x10d   : > { %834 = vmatmul.f32.gmra.mxu1 %v521_v47  ;;  %5226 = vmatmul.msk.f32.vlgmr.msrb.gmra.mxu2 %vm1008_vm0, %v6053_v51  ;;  %v478_v47 = vand.u32 2147483647, %v430_v37 }
 0x10e   : > { %5221 = vmatmul.msk.f32.gmra.mxu3 %vm1008_vm0, %v6015_v9  ;;  %v911_v7 = vmax.f32 %v788_v0, 0.0 }
 0x110   : > { %v963_v15 = vadd.f32 %v5945_v4, %v911_v7 }
 0x111   : > { %v629_v57 = vpop.f32.mrf.mxu0 }
 0x112   : > { %v790_v58 = vpop.f32.mrf.mxu1  ;;  %v630_v60 = vadd.f32 %v5934_v54, %v629_v57  ;;  %v362_v57 = vrot.slane %v6001_v1, 3 }
 0x114   : > { %v791_v2 = vadd.f32 %v790_v58, %v630_v60  ;;  %676 = vmatmul.f32.gmra.mxu0 %v474_v55  ;;  %v1788_v58 = vrot.slane %v5923_v40, 5  ;;  %v378_v0 = vperm.slane %v362_v57, 0 }
 0x115   : > { %837 = vmatmul.f32.gmra.mxu1 %v522_v56  ;;  %5227 = vmatmul.msk.f32.gmra.mxu2 %vm1008_vm0, %v6066_v61  ;;  %v431_v56 = vsub.f32 %v377_v23, %v5879_v43  ;;  %v1793_v23 = vrot.slane %v5950_v12, 3 }
 0x116   : > { %5222 = vmatmul.msk.f32.gmra.mxu3 %vm1008_vm0, %v6029_v20  ;;  %v912_v3 = vmax.f32 %v791_v2, 0.0  ;;  %v432_v6 = vsub.f32 %v378_v0, %v5845_v27 }
 0x117   : > { %v479_v62 = vand.u32 2147483647, %v431_v56 }
 0x118   : > { %v964_v8 = vadd.f32 %v5945_v4, %v912_v3  ;;  %v480_v7 = vand.u32 2147483647, %v432_v6 }
 0x119   : > { %v632_v11 = vpop.f32.mrf.mxu0 }
 0x11a   : > { %v793_v13 = vpop.f32.mrf.mxu1  ;;  %5233 = vmatpush.xpose.msk.msrb.mxu3 %vm1008_vm0, %v964_v8  ;;  %v633_v35 = vadd.f32 %v5934_v54, %v632_v11  ;;  %v528_v8 = vmul.f32 %v378_v0, %v5845_v27 }
 0x11c   : > { %679 = vmatmul.f32.gmra.mxu0 %v475_v5  ;;  %v794_v45 = vadd.f32 %v793_v13, %v633_v35  ;;  %v1803_v5 = vperm.slane %v1788_v58, 0  ;;  %v1806_v13 = vperm.slane %v5950_v12, 0  ;;  %v363_v35 = vrot.slane %v6001_v1, 4 }
 0x11d   : > { %840 = vmatmul.f32.gmra.mxu1 %v523_v10  ;;  %5228 = vmatmul.msk.f32.gmra.mxu2 %vm1008_vm0, %v5967_v21 }
 0x11e   : > { %5234 = vmatpush.xpose.msk.msrb.mxu3 %vm1008_vm0, %v963_v15  ;;  %v913_v55 = vmax.f32 %v794_v45, 0.0  ;;  %1835 = vperm.xlu2 %5469, %v1803_v5   ;;  %v379_v44 = vperm.slane %v363_v35, 0 }
 0x120   : > { %v965_v60 = vadd.f32 %v5945_v4, %v913_v55  ;;  %v532_v5 = vmul.f32 %v379_v44, %v5874_v39 }
 0x121   : > { %v635_v24 = vpop.f32.mrf.mxu0 }
 0x122   : > { %v796_v25 = vpop.f32.mrf.mxu1  ;;  %5235 = vmatpush.xpose.msk.msrb.mxu3 %vm1008_vm0, %v962_v18  ;;  %v636_v28 = vadd.f32 %v5934_v54, %v635_v24  ;;  %v433_v18 = vsub.f32 %v378_v0, %v5874_v39 }
 0x124   : > { %682 = vmatmul.f32.gmra.mxu0 %v476_v19  ;;  %v797_v33 = vadd.f32 %v796_v25, %v636_v28  ;;  %v481_v26 = vand.u32 2147483647, %v433_v18  ;;  %v529_v28 = vmul.f32 %v378_v0, %v5874_v39  ;;  %v533_v18 = vmul.f32 %v379_v44, %v5879_v43 }
 0x125   : > { %843 = vmatmul.f32.gmra.mxu1 %v524_v22  ;;  %5229 = vmatmul.msk.f32.gmra.mxu2 %vm1008_vm0, %v5980_v38 }
 0x126   : > { %5236 = vmatmul.msk.f32.vlgmr.msrb.gmra.mxu3 %vm1008_vm0, %v6053_v51  ;;  %v914_v41 = vmax.f32 %v797_v33, 0.0  ;;  %1847 = vperm.xlu2 %5469, %v1806_v13  }
 0x128   : > { %v966_v53 = vadd.f32 %v5945_v4, %v914_v41 }
 0x129   : > { %v638_v31 = vpop.f32.mrf.mxu0 }
 0x12a   : > { %v799_v32 = vpop.f32.mrf.mxu1  ;;  %v639_v34 = vadd.f32 %v5934_v54, %v638_v31  ;;  %v1809_v31 = vperm.slane %v1793_v23, 0 }
 0x12c   : > { %v800_v36 = vadd.f32 %v799_v32, %v639_v34  ;;  %685 = vmatmul.f32.gmra.mxu0 %v477_v29  ;;  %v434_v34 = vsub.f32 %v378_v0, %v5879_v43 }
 0x12d   : > { %846 = vmatmul.f32.gmra.mxu1 %v525_v30  ;;  %5230 = vmatmul.msk.f32.gmra.mxu2 %vm1008_vm0, %v5995_v59 }
 0x12e   : > { %5237 = vmatmul.msk.f32.gmra.mxu3 %vm1008_vm0, %v6066_v61  ;;  %v915_v42 = vmax.f32 %v800_v36, 0.0  ;;  %1859 = vperm.xlu2 %5469, %v1809_v31   ;;  %v1796_v36 = vrot.slane %v5950_v12, 6  ;;  %v482_v41 = vand.u32 2147483647, %v434_v34 }
 0x130   : > { %v967_v46 = vadd.f32 %v5945_v4, %v915_v42  ;;  %v530_v42 = vmul.f32 %v378_v0, %v5879_v43 }
 0x131   : > { %v641_v49 = vpop.f32.mrf.mxu0 }
 0x132   : > { %v802_v50 = vpop.f32.mrf.mxu1  ;;  %5243 = vmatpush.xpose.msk.msra.mxu2 %vm1008_vm0, %v967_v46  ;;  %v642_v16 = vadd.f32 %v5934_v54, %v641_v49 }
 0x134   : > { %688 = vmatmul.f32.gmra.mxu0 %v478_v47  ;;  %v803_v24 = vadd.f32 %v802_v50, %v642_v16  ;;  %v1812_v47 = vperm.slane %v1796_v36, 0  ;;  %v531_v50 = vmul.f32 %v379_v44, %v5845_v27 }
 0x135   : > { %849 = vmatmul.f32.gmra.mxu1 %v526_v48  ;;  %5231 = vmatmul.msk.f32.gmra.mxu2 %vm1008_vm0, %v6015_v9  ;;  %v435_v48 = vsub.f32 %v379_v44, %v5845_v27 }
 0x136   : > { %5238 = vmatmul.msk.f32.gmra.mxu3 %vm1008_vm0, %v5967_v21  ;;  %5244 = vmatpush.xpose.msk.msra.mxu2 %vm1008_vm0, %v966_v53  ;;  %v916_v33 = vmax.f32 %v803_v24, 0.0 }
 0x137   : > { %1871 = vperm.xlu2 %5469, %v1812_v47   ;;  %v483_v49 = vand.u32 2147483647, %v435_v48 }
 0x138   : > { %v968_v37 = vadd.f32 %v5945_v4, %v916_v33 }
 0x139   : > { %v644_v2 = vpop.f32.mrf.mxu0 }
 0x13a   : > { %v805_v3 = vpop.f32.mrf.mxu1  ;;  %5245 = vmatpush.xpose.msk.msra.mxu2 %vm1008_vm0, %v965_v60  ;;  %v645_v40 = vadd.f32 %v5934_v54, %v644_v2  ;;  %v436_v60 = vsub.f32 %v379_v44, %v5874_v39 }
 0x13c   : > { %691 = vmatmul.f32.gmra.mxu0 %v479_v62  ;;  %v806_v14 = vadd.f32 %v805_v3, %v645_v40  ;;  %v484_v3 = vand.u32 2147483647, %v436_v60  ;;  %v6163_v40 = vpop.permute.xlu0 %1815  ;;  %v365_v60 = vrot.slane %v6001_v1, 6 }
 0x13d   : > { %852 = vmatmul.f32.gmra.mxu1 %v527_v63  ;;  %5232 = vmatmul.msk.f32.gmra.mxu2 %vm1008_vm0, %v6029_v20 }
 0x13e   : > { %5239 = vmatmul.msk.f32.gmra.mxu3 %vm1008_vm0, %v5980_v38  ;;  %v917_v19 = vmax.f32 %v806_v14, 0.0  ;;  %v437_v14 = vsub.f32 %v379_v44, %v5879_v43 }
 0x140   : > { %v969_v32 = vadd.f32 %v5945_v4, %v917_v19 }
 0x141   : > { %v647_v10 = vpop.f32.mrf.mxu0 }
 0x142   : > { %v808_v11 = vpop.f32.mrf.mxu1  ;;  %v648_v15 = vadd.f32 %v5934_v54, %v647_v10 }
 0x144   : > { %v809_v17 = vadd.f32 %v808_v11, %v648_v15  ;;  %694 = vmatmul.f32.gmra.mxu0 %v480_v7  ;;  %v364_v15 = vrot.slane %v6001_v1, 5 }
 0x145   : > { %855 = vmatmul.f32.gmra.mxu1 %v528_v8  ;;  %5246 = vmatmul.msk.f32.vlgmr.msra.gmra.mxu2 %vm1008_vm0, %v6053_v51 }
 0x146   : > { %5240 = vmatmul.msk.f32.gmra.mxu3 %vm1008_vm0, %v5995_v59  ;;  %v918_v22 = vmax.f32 %v809_v17, 0.0  ;;  %v485_v17 = vand.u32 2147483647, %v437_v14 }
 0x148   : > { %v970_v25 = vadd.f32 %v5945_v4, %v918_v22  ;;  %v380_v22 = vperm.slane %v364_v15, 0 }
 0x149   : > { %v650_v29 = vpop.f32.mrf.mxu0 }
 0x14a   : > { %v811_v30 = vpop.f32.mrf.mxu1  ;;  %5253 = vmatpush.xpose.msk.msra.mxu3 %vm1008_vm0, %v970_v25  ;;  %v651_v55 = vadd.f32 %v5934_v54, %v650_v29  ;;  %v534_v29 = vmul.f32 %v380_v22, %v5845_v27 }
 0x14c   : > { %697 = vmatmul.f32.gmra.mxu0 %v481_v26  ;;  %v812_v62 = vadd.f32 %v811_v30, %v651_v55  ;;  %v438_v26 = vsub.f32 %v380_v22, %v5845_v27 }
 0x14d   : > { %858 = vmatmul.f32.gmra.mxu1 %v529_v28  ;;  %5247 = vmatmul.msk.f32.gmra.mxu2 %vm1008_vm0, %v6066_v61 }
 0x14e   : > { %5241 = vmatmul.msk.f32.gmra.mxu3 %vm1008_vm0, %v6015_v9  ;;  %v919_v11 = vmax.f32 %v812_v62, 0.0  ;;  %v486_v28 = vand.u32 2147483647, %v438_v26 }
 0x14f   : > { %5254 = vmatpush.xpose.msk.msra.mxu3 %vm1008_vm0, %v969_v32 }
 0x150   : > { %v971_v16 = vadd.f32 %v5945_v4, %v919_v11  ;;  %v6225_v11 = vld [vmem:[%s5835_s23] sm:$0xff] }
 0x151   : > { %v653_v45 = vpop.f32.mrf.mxu0 }
 0x152   : > { %v814_v46 = vpop.f32.mrf.mxu1  ;;  %v654_v12 = vadd.f32 %v5934_v54, %v653_v45  ;;  %v6197_v45 = vpop.permute.xlu0 %1819 }
 0x153   : > { %5255 = vmatpush.xpose.msk.msra.mxu3 %vm1008_vm0, %v968_v37 }
 0x154   : > { %700 = vmatmul.f32.gmra.mxu0 %v482_v41  ;;  %v815_v56 = vadd.f32 %v814_v46, %v654_v12  ;;  %v439_v41 = vsub.f32 %v380_v22, %v5874_v39  ;;  %v535_v12 = vmul.f32 %v380_v22, %v5874_v39 }
 0x155   : > { %861 = vmatmul.f32.gmra.mxu1 %v530_v42  ;;  %5248 = vmatmul.msk.f32.gmra.mxu2 %vm1008_vm0, %v5967_v21 }
 0x156   : > { %5242 = vmatmul.msk.f32.gmra.mxu3 %vm1008_vm0, %v6029_v20  ;;  %v920_v63 = vmax.f32 %v815_v56, 0.0  ;;  %v487_v48 = vand.u32 2147483647, %v439_v41 }
 0x158   : > { %v972_v13 = vadd.f32 %v5945_v4, %v920_v63 }
 0x159   : > { %v656_v52 = vpop.f32.mrf.mxu0 }
 0x15a   : > { %v817_v53 = vpop.f32.mrf.mxu1  ;;  %v657_v57 = vadd.f32 %v5934_v54, %v656_v52 }
 0x15c   : > { %v818_v58 = vadd.f32 %v817_v53, %v657_v57  ;;  %703 = vmatmul.f32.gmra.mxu0 %v483_v49 }
 0x15d   : > { %864 = vmatmul.f32.gmra.mxu1 %v531_v50  ;;  %5249 = vmatmul.msk.f32.gmra.mxu2 %vm1008_vm0, %v5980_v38 }
 0x15e   : > { %5256 = vmatmul.msk.f32.vlgmr.msra.gmra.mxu3 %vm1008_vm0, %v6053_v51  ;;  %v921_v0 = vmax.f32 %v818_v58, 0.0  ;;  %v6208_v58 = vld [vmem:[%s5835_s23 + $0x10] sm:$0xff] }
 0x15f   : > { %v440_v39 = vsub.f32 %v380_v22, %v6208_v58 }
 0x160   : > { %v973_v2 = vadd.f32 %v5945_v4, %v921_v0  ;;  %v1062_v6 = vpop.f32.mrf.mxu2 }
 0x161   : > { %v659_v7 = vpop.f32.mrf.mxu0  ;;  %v1880_v10 = vmul.f32 %v6163_v40, %v1062_v6  ;;  %v488_v0 = vand.u32 2147483647, %v440_v39 }
 0x162   : > { %v820_v8 = vpop.f32.mrf.mxu1  ;;  %5263 = vmatpush.xpose.msk.msrb.mxu2 %vm1008_vm0, %v973_v2  ;;  %v660_v34 = vadd.f32 %v5934_v54, %v659_v7  ;;  %v536_v2 = vmul.f32 %v6208_v58, %v380_v22 }
 0x163   : > { %2334 = vrot.lane.b32.xlu0 %v1880_v10, %s5620_s15 }
 0x164   : > { %706 = vmatmul.f32.gmra.mxu0 %v484_v3  ;;  %v821_v27 = vadd.f32 %v820_v8, %v660_v34 }
 0x165   : > { %867 = vmatmul.f32.gmra.mxu1 %v532_v5  ;;  %5250 = vmatmul.msk.f32.gmra.mxu2 %vm1008_vm0, %v5995_v59  ;;  %v381_v5 = vperm.slane %v365_v60, 0 }
 0x166   : > { %5257 = vmatmul.msk.f32.gmra.mxu3 %vm1008_vm0, %v6066_v61  ;;  %5264 = vmatpush.xpose.msk.msrb.mxu2 %vm1008_vm0, %v972_v13  ;;  %v922_v56 = vmax.f32 %v821_v27, 0.0 }
 0x167   : > { %v441_v13 = vsub.f32 %v381_v5, %v6225_v11 }
 0x168   : > { %v1065_v19 = vpop.f32.mrf.mxu2  ;;  %v974_v62 = vadd.f32 %v5945_v4, %v922_v56 }
 0x169   : > { %v662_v23 = vpop.f32.mrf.mxu0  ;;  %v1881_v25 = vmul.f32 %v6163_v40, %v1065_v19 }
 0x16a   : > { %v823_v24 = vpop.f32.mrf.mxu1  ;;  %5265 = vmatpush.xpose.msk.msrb.mxu2 %vm1008_vm0, %v971_v16  ;;  %v663_v43 = vadd.f32 %v5934_v54, %v662_v23  ;;  %v489_v16 = vand.u32 2147483647, %v441_v13 }
 0x16b   : > { %2336 = vrot.lane.b32.xlu1 %v1881_v25, %s5620_s15 }
 0x16c   : > { %709 = vmatmul.f32.gmra.mxu0 %v485_v17  ;;  %v824_v35 = vadd.f32 %v823_v24, %v663_v43  ;;  %v537_v17 = vmul.f32 %v6225_v11, %v381_v5  ;;  %v6239_v43 = vld [vmem:[%s5835_s23 + $0x8] sm:$0xff] }
 0x16d   : > { %870 = vmatmul.f32.gmra.mxu1 %v533_v18  ;;  %5251 = vmatmul.msk.f32.gmra.mxu2 %vm1008_vm0, %v6015_v9 }
 0x16e   : > { %5258 = vmatmul.msk.f32.gmra.mxu3 %vm1008_vm0, %v5967_v21  ;;  %v923_v42 = vmax.f32 %v824_v35, 0.0 }
 0x170   : > { %v1068_v30 = vpop.f32.mrf.mxu2  ;;  %v975_v57 = vadd.f32 %v5945_v4, %v923_v42 }
 0x171   : > { %v665_v31 = vpop.f32.mrf.mxu0  ;;  %v1882_v33 = vmul.f32 %v6163_v40, %v1068_v30 }
 0x172   : > { %v826_v32 = vpop.f32.mrf.mxu1  ;;  %v666_v36 = vadd.f32 %v5934_v54, %v665_v31 }
 0x173   : > { %2338 = vrot.lane.b32.xlu2 %v1882_v33, %s5620_s15 }
 0x174   : > { %v827_v37 = vadd.f32 %v826_v32, %v666_v36  ;;  %712 = vmatmul.f32.gmra.mxu0 %v486_v28  ;;  %v442_v28 = vsub.f32 %v381_v5, %v6239_v43  ;;  %v6246_v32 = vpop.permute.xlu1 %1823  ;;  %v538_v36 = vmul.f32 %v6239_v43, %v381_v5 }
 0x175   : > { %873 = vmatmul.f32.gmra.mxu1 %v534_v29  ;;  %5252 = vmatmul.msk.f32.gmra.mxu2 %vm1008_vm0, %v6029_v20 }
 0x176   : > { %5259 = vmatmul.msk.f32.gmra.mxu3 %vm1008_vm0, %v5980_v38  ;;  %v924_v44 = vmax.f32 %v827_v37, 0.0  ;;  %v490_v35 = vand.u32 2147483647, %v442_v28 }
 0x178   : > { %v976_v46 = vadd.f32 %v5945_v4, %v924_v44  ;;  %v1109_v47 = vpop.f32.mrf.mxu3 }
 0x179   : > { %v1071_v49 = vpop.f32.mrf.mxu2  ;;  %v668_v50 = vpop.f32.mrf.mxu0  ;;  %v1887_v55 = vmul.f32 %v6197_v45, %v1109_v47 }
 0x17a   : > { %v829_v52 = vpop.f32.mrf.mxu1  ;;  %v1883_v53 = vmul.f32 %v6163_v40, %v1071_v49  ;;  %5273 = vmatpush.xpose.msk.msrb.mxu3 %vm1008_vm0, %v976_v46  ;;  %v669_v23 = vadd.f32 %v5934_v54, %v668_v50 }
 0x17b   : > { %2348 = vrot.lane.b32.xlu1 %v1887_v55, %s5620_s15 }
 0x17c   : > { %2340 = vrot.lane.b32.xlu0 %v1883_v53, %s5620_s15  ;;  %715 = vmatmul.f32.gmra.mxu0 %v487_v48  ;;  %v830_v29 = vadd.f32 %v829_v52, %v669_v23  ;;  %v443_v48 = vsub.f32 %v381_v5, %v6208_v58  ;;  %v539_v53 = vmul.f32 %v6208_v58, %v381_v5 }
 0x17d   : > { %876 = vmatmul.f32.gmra.mxu1 %v535_v12  ;;  %5266 = vmatmul.msk.f32.vlgmr.msrb.gmra.mxu2 %vm1008_vm0, %v6053_v51  ;;  %v366_v12 = vrot.slane %v6001_v1, 7 }
 0x17e   : > { %5260 = vmatmul.msk.f32.gmra.mxu3 %vm1008_vm0, %v5995_v59  ;;  %v925_v46 = vmax.f32 %v830_v29, 0.0  ;;  %v491_v52 = vand.u32 2147483647, %v443_v48 }
 0x17f   : > { %5274 = vmatpush.xpose.msk.msrb.mxu3 %vm1008_vm0, %v975_v57  ;;  %v382_v56 = vperm.slane %v366_v12, 0 }
 0x180   : > { %v1112_v63 = vpop.f32.mrf.mxu3  ;;  %v977_v49 = vadd.f32 %v5945_v4, %v925_v46 }
 0x181   : > { %v1074_v3 = vpop.f32.mrf.mxu2  ;;  %v671_v6 = vpop.f32.mrf.mxu0  ;;  %v1888_v10 = vmul.f32 %v6197_v45, %v1112_v63 }
 0x182   : > { %v832_v7 = vpop.f32.mrf.mxu1  ;;  %v1884_v8 = vmul.f32 %v6163_v40, %v1074_v3  ;;  %v672_v14 = vadd.f32 %v5934_v54, %v671_v6  ;;  %v540_v3 = vmul.f32 %v6225_v11, %v382_v56 }
 0x183   : > { %5275 = vmatpush.xpose.msk.msrb.mxu3 %vm1008_vm0, %v974_v62  ;;  %2350 = vrot.lane.b32.xlu2 %v1888_v10, %s5620_s15  ;;  %v444_v62 = vsub.f32 %v382_v56, %v6225_v11 }
 0x184   : > { %2342 = vrot.lane.b32.xlu1 %v1884_v8, %s5620_s15  ;;  %718 = vmatmul.f32.gmra.mxu0 %v488_v0  ;;  %v833_v24 = vadd.f32 %v832_v7, %v672_v14 }
 0x185   : > { %879 = vmatmul.f32.gmra.mxu1 %v536_v2  ;;  %5267 = vmatmul.msk.f32.gmra.mxu2 %vm1008_vm0, %v6066_v61  ;;  %v492_v2 = vand.u32 2147483647, %v444_v62 }
 0x186   : > { %5261 = vmatmul.msk.f32.gmra.mxu3 %vm1008_vm0, %v6015_v9  ;;  %v926_v30 = vmax.f32 %v833_v24, 0.0  ;;  %v541_v24 = vmul.f32 %v6239_v43, %v382_v56 }
 0x188   : > { %v1115_v15 = vpop.f32.mrf.mxu3  ;;  %v978_v47 = vadd.f32 %v5945_v4, %v926_v30 }
 0x189   : > { %v1889_v18 = vmul.f32 %v6197_v45, %v1115_v15  ;;  %v674_v19 = vpop.f32.mrf.mxu0  ;;  %v445_v15 = vsub.f32 %v382_v56, %v6239_v43  ;;  %v6301_v43 = vpop.permute.xlu0 %1839 }
 0x18a   : > { %v835_v22 = vpop.f32.mrf.mxu1  ;;  %v675_v25 = vadd.f32 %v5934_v54, %v674_v19 }
 0x18b   : > { %2352 = vrot.lane.b32.xlu0 %v1889_v18, %s5620_s15  ;;  %v6286_v18 = vpop.permute.xlu1 %1827  ;;  %v493_v23 = vand.u32 2147483647, %v445_v15 }
 0x18c   : > { %v836_v26 = vadd.f32 %v835_v22, %v675_v25  ;;  %721 = vmatmul.f32.gmra.mxu0 %v489_v16 }
 0x18d   : > { %882 = vmatmul.f32.gmra.mxu1 %v537_v17  ;;  %5268 = vmatmul.msk.f32.gmra.mxu2 %vm1008_vm0, %v5967_v21 }
 0x18e   : > { %5262 = vmatmul.msk.f32.gmra.mxu3 %vm1008_vm0, %v6029_v20  ;;  %v927_v31 = vmax.f32 %v836_v26, 0.0 }
 0x190   : > { %v979_v33 = vadd.f32 %v5945_v4, %v927_v31  ;;  %v1150_v34 = vpop.f32.mrf.mxu2  ;;  %v446_v31 = vsub.f32 %v382_v56, %v6208_v58 }
 0x191   : > { %v1118_v37 = vpop.f32.mrf.mxu3  ;;  %v1892_v41 = vmul.f32 %v6246_v32, %v1150_v34  ;;  %v677_v27 = vpop.f32.mrf.mxu0 }
 0x192   : > { %v838_v42 = vpop.f32.mrf.mxu1  ;;  %v1890_v44 = vmul.f32 %v6197_v45, %v1118_v37  ;;  %5283 = vmatpush.xpose.msk.msra.mxu2 %vm1008_vm0, %v979_v33  ;;  %v678_v8 = vadd.f32 %v5934_v54, %v677_v27  ;;  %v542_v37 = vmul.f32 %v6208_v58, %v382_v56  ;;  %v5621_v58 = vmov 0.0   ;;  %v6323_v46 = vpop.permute.xlu0 %1851 }
 0x193   : > { %2358 = vrot.lane.b32.xlu0 %v1892_v41, %s5620_s15  ;;  %1991 = vst.msk [vmem:[#allocation2] sm:$0xff] %vm1990_vm1, %v5621_v58 }
 0x194   : > { %2354 = vrot.lane.b32.xlu1 %v1890_v44, %s5620_s15  ;;  %724 = vmatmul.f32.gmra.mxu0 %v490_v35  ;;  %v839_v11 = vadd.f32 %v838_v42, %v678_v8  ;;  %1999 = vst.msk [vmem:[#allocation2 + $0x38] sm:$0xff] %vm1990_vm1, %v5621_v58 }
 0x195   : > { %885 = vmatmul.f32.gmra.mxu1 %v538_v36  ;;  %5269 = vmatmul.msk.f32.gmra.mxu2 %vm1008_vm0, %v5980_v38  ;;  %v494_v36 = vand.u32 2147483647, %v446_v31  ;;  %2000 = vst.msk [vmem:[#allocation2 + $0x40] sm:$0xff] %vm1990_vm1, %v5621_v58  ;;  %v6428_v31 = vld [vmem:[%s8242_s6 + $0x20] sm:$0xff] }
 0x196   : > { %5276 = vmatmul.msk.f32.vlgmr.msrb.gmra.mxu3 %vm1008_vm0, %v6053_v51  ;;  %5284 = vmatpush.xpose.msk.msra.mxu2 %vm1008_vm0, %v978_v47  ;;  %v928_v30 = vmax.f32 %v839_v11, 0.0  ;;  %2006 = vst.msk [vmem:[#allocation2 + $0x70] sm:$0xff] %vm1990_vm1, %v5621_v58 }
 0x197   : > { %2007 = vst.msk [vmem:[#allocation2 + $0x78] sm:$0xff] %vm1990_vm1, %v5621_v58 }
 0x198   : > { %v1153_v50 = vpop.f32.mrf.mxu2  ;;  %v980_v33 = vadd.f32 %v5945_v4, %v928_v30  ;;  %2008 = vst.msk [vmem:[#allocation2 + $0x80] sm:$0xff] %vm1990_vm1, %v5621_v58 }
 0x199   : > { %v1121_v55 = vpop.f32.mrf.mxu3  ;;  %v1893_v57 = vmul.f32 %v6246_v32, %v1153_v50  ;;  %v680_v39 = vpop.f32.mrf.mxu0  ;;  %2013 = vst.msk [vmem:[#allocation2 + $0xa8] sm:$0xff] %vm1990_vm1, %v5621_v58 }
 0x19a   : > { %v841_v1 = vpop.f32.mrf.mxu1  ;;  %v1891_v60 = vmul.f32 %v6197_v45, %v1121_v55  ;;  %5285 = vmatpush.xpose.msk.msra.mxu2 %vm1008_vm0, %v977_v49  ;;  %v681_v63 = vadd.f32 %v5934_v54, %v680_v39  ;;  %v6357_v8 = vpop.permute.xlu0 %1863  ;;  %2014 = vst.msk [vmem:[#allocation2 + $0xb0] sm:$0xff] %vm1990_vm1, %v5621_v58 }
 0x19b   : > { %2015 = vst.msk [vmem:[#allocation2 + $0xb8] sm:$0xff] %vm1990_vm1, %v5621_v58 }
 0x19c   : > { %2360 = vrot.lane.b32.xlu1 %v1893_v57, %s5620_s15  ;;  %2356 = vrot.lane.b32.xlu2 %v1891_v60, %s5620_s15  ;;  %v842_v10 = vadd.f32 %v841_v1, %v681_v63  ;;  %v6346_v60 = vld [vmem:[%s8241_s5] ss:$0 sm:$0xff]  ;;  %2016 = vst.msk [vmem:[#allocation2 + $0xc0] sm:$0xff] %vm1990_vm1, %v5621_v58 }
 0x19d   : > { %727 = vmatmul.f32.gmra.mxu0 %v491_v52  ;;  %888 = vmatmul.f32.gmra.mxu1 %v539_v53  ;;  %2020 = vst.msk [vmem:[#allocation2 + $0xe0] sm:$0xff] %vm1990_vm1, %v5621_v58 }
 0x19e   : > { %5270 = vmatmul.msk.f32.gmra.mxu2 %vm1008_vm0, %v5995_v59  ;;  %5277 = vmatmul.msk.f32.gmra.mxu3 %vm1008_vm0, %v6066_v61  ;;  %v929_v16 = vmax.f32 %v842_v10, 0.0  ;;  %2021 = vst.msk [vmem:[#allocation2 + $0xe8] sm:$0xff] %vm1990_vm1, %v5621_v58 }
 0x19f   : > { %2022 = vst.msk [vmem:[#allocation2 + $0xf0] sm:$0xff] %vm1990_vm1, %v5621_v58 }
 0x1a0   : > { %v1156_v0 = vpop.f32.mrf.mxu2  ;;  %2023 = vst.msk [vmem:[#allocation2 + $0xf8] sm:$0xff] %vm1990_vm1, %v5621_v58 }
 0x1a1   : > { %v1894_v5 = vmul.f32 %v6246_v32, %v1156_v0  ;;  %v683_v6 = vpop.f32.mrf.mxu0  ;;  %2024 = vst.msk [vmem:[#allocation2 + $0x100] sm:$0xff] %vm1990_vm1, %v5621_v58 }
 0x1a2   : > { %v844_v7 = vpop.f32.mrf.mxu1  ;;  %v684_v13 = vadd.f32 %v5934_v54, %v683_v6  ;;  %2027 = vst.msk [vmem:[#allocation2 + $0x118] sm:$0xff] %vm1990_vm1, %v5621_v58 }
 0x1a3   : > { %2028 = vst.msk [vmem:[#allocation2 + $0x120] sm:$0xff] %vm1990_vm1, %v5621_v58 }
 0x1a4   : > { %2362 = vrot.lane.b32.xlu2 %v1894_v5, %s5620_s15  ;;  %v845_v14 = vadd.f32 %v844_v7, %v684_v13  ;;  %2029 = vst.msk [vmem:[#allocation2 + $0x128] sm:$0xff] %vm1990_vm1, %v5621_v58 }
 0x1a5   : > { %730 = vmatmul.f32.gmra.mxu0 %v492_v2  ;;  %891 = vmatmul.f32.gmra.mxu1 %v540_v3  ;;  %2030 = vst.msk [vmem:[#allocation2 + $0x130] sm:$0xff] %vm1990_vm1, %v5621_v58 }
 0x1a6   : > { %5271 = vmatmul.msk.f32.gmra.mxu2 %vm1008_vm0, %v6015_v9  ;;  %5278 = vmatmul.msk.f32.gmra.mxu3 %vm1008_vm0, %v5967_v21  ;;  %v930_v17 = vmax.f32 %v845_v14, 0.0  ;;  %v981_v21 = vadd.f32 %v5945_v4, %v929_v16  ;;  %v6389_v16 = vpop.permute.xlu0 %1875  ;;  %2031 = vst.msk [vmem:[#allocation2 + $0x138] sm:$0xff] %vm1990_vm1, %v5621_v58 }
 0x1a7   : > { %2032 = vst.msk [vmem:[#allocation2 + $0x140] sm:$0xff] %vm1990_vm1, %v5621_v58 }
 0x1a8   : > { %v982_v54 = vadd.f32 %v5945_v4, %v930_v17  ;;  %v1159_v19 = vpop.f32.mrf.mxu2  ;;  %v6318_v4 = vld [vmem:[%s8240_s4] ss:$0 sm:$0xff]  ;;  %v6394_v17 = vld [vmem:[%s8242_s6 + $0x18] sm:$0xff]  ;;  %2034 = vst.msk [vmem:[#allocation2 + $0x150] sm:$0xff] %vm1990_vm1, %v5621_v58 }
 0x1a9   : > { %v1197_v22 = vpop.f32.mrf.mxu3  ;;  %v1895_v25 = vmul.f32 %v6246_v32, %v1159_v19  ;;  %v686_v26 = vpop.f32.mrf.mxu0  ;;  %2035 = vst.msk [vmem:[#allocation2 + $0x158] sm:$0xff] %vm1990_vm1, %v5621_v58 }
 0x1aa   : > { %v847_v28 = vpop.f32.mrf.mxu1  ;;  %v1899_v29 = vmul.f32 %v6286_v18, %v1197_v22  ;;  %5293 = vmatpush.xpose.msk.msra.mxu3 %vm1008_vm0, %v982_v54  ;;  %v687_v52 = vadd.f32 %v6318_v4, %v686_v26  ;;  %v6403_v19 = vpop.permute.xlu2 %1831  ;;  %2036 = vst.msk [vmem:[#allocation2 + $0x160] sm:$0xff] %vm1990_vm1, %v5621_v58 }
 0x1ab   : > { %2364 = vrot.lane.b32.xlu0 %v1895_v25, %s5620_s15  ;;  %2037 = vst.msk [vmem:[#allocation2 + $0x168] sm:$0xff] %vm1990_vm1, %v5621_v58 }
 0x1ac   : > { %2372 = vrot.lane.b32.xlu1 %v1899_v29, %s5620_s15  ;;  %v848_v57 = vadd.f32 %v847_v28, %v687_v52  ;;  %2038 = vst.msk [vmem:[#allocation2 + $0x170] sm:$0xff] %vm1990_vm1, %v5621_v58 }
 0x1ad   : > { %733 = vmatmul.f32.gmra.mxu0 %v493_v23  ;;  %894 = vmatmul.f32.gmra.mxu1 %v541_v24  ;;  %2039 = vst.msk [vmem:[#allocation2 + $0x178] sm:$0xff] %vm1990_vm1, %v5621_v58 }
 0x1ae   : > { %5272 = vmatmul.msk.f32.gmra.mxu2 %vm1008_vm0, %v6029_v20  ;;  %5279 = vmatmul.msk.f32.gmra.mxu3 %vm1008_vm0, %v5980_v38  ;;  %v931_v6 = vmax.f32 %v848_v57, 0.0  ;;  %2041 = vst.msk [vmem:[#allocation2 + $0x188] sm:$0xff] %vm1990_vm1, %v5621_v58 }
 0x1af   : > { %5294 = vmatpush.xpose.msk.msra.mxu3 %vm1008_vm0, %v981_v21  ;;  %2042 = vst.msk [vmem:[#allocation2 + $0x190] sm:$0xff] %vm1990_vm1, %v5621_v58 }
 0x1b0   : > { %v1162_v34 = vpop.f32.mrf.mxu2  ;;  %v983_v10 = vadd.f32 %v6346_v60, %v931_v6  ;;  %2043 = vst.msk [vmem:[#allocation2 + $0x198] sm:$0xff] %vm1990_vm1, %v5621_v58  ;;  %v6540_v6 = vld [vmem:[%s8242_s6 + $0x8] sm:$0xff] }
 0x1b1   : > { %v1200_v35 = vpop.f32.mrf.mxu3  ;;  %v1896_v41 = vmul.f32 %v6246_v32, %v1162_v34  ;;  %v689_v27 = vpop.f32.mrf.mxu0  ;;  %2044 = vst.msk [vmem:[#allocation2 + $0x1a0] sm:$0xff] %vm1990_vm1, %v5621_v58 }
 0x1b2   : > { %v850_v42 = vpop.f32.mrf.mxu1  ;;  %v1900_v44 = vmul.f32 %v6286_v18, %v1200_v35  ;;  %v690_v38 = vadd.f32 %v6318_v4, %v689_v27  ;;  %2045 = vst.msk [vmem:[#allocation2 + $0x1a8] sm:$0xff] %vm1990_vm1, %v5621_v58 }
 0x1b3   : > { %5295 = vmatpush.xpose.msk.msra.mxu3 %vm1008_vm0, %v980_v33  ;;  %2046 = vst.msk [vmem:[#allocation2 + $0x1b0] sm:$0xff] %vm1990_vm1, %v5621_v58 }
 0x1b4   : > { %2366 = vrot.lane.b32.xlu1 %v1896_v41, %s5620_s15  ;;  %2374 = vrot.lane.b32.xlu2 %v1900_v44, %s5620_s15  ;;  %v851_v53 = vadd.f32 %v850_v42, %v690_v38  ;;  %2048 = vst.msk [vmem:[#allocation2 + $0x1c0] sm:$0xff] %vm1990_vm1, %v5621_v58 }
 0x1b5   : > { %736 = vmatmul.f32.gmra.mxu0 %v494_v36  ;;  %897 = vmatmul.f32.gmra.mxu1 %v542_v37  ;;  %2049 = vst.msk [vmem:[#allocation2 + $0x1c8] sm:$0xff] %vm1990_vm1, %v5621_v58 }
 0x1b6   : > { %5280 = vmatmul.msk.f32.gmra.mxu3 %vm1008_vm0, %v5995_v59  ;;  %5286 = vmatmul.msk.f32.vlgmr.msra.gmra.mxu2 %vm1008_vm0, %v6053_v51  ;;  %v932_v39 = vmax.f32 %v851_v53, 0.0  ;;  %2050 = vst.msk [vmem:[#allocation2 + $0x1d0] sm:$0xff] %vm1990_vm1, %v5621_v58 }
 0x1b7   : > { %2051 = vst.msk [vmem:[#allocation2 + $0x1d8] sm:$0xff] %vm1990_vm1, %v5621_v58 }
 0x1b8   : > { %v1165_v47 = vpop.f32.mrf.mxu2  ;;  %v984_v7 = vadd.f32 %v6346_v60, %v932_v39  ;;  %2052 = vst.msk [vmem:[#allocation2 + $0x1e0] sm:$0xff] %vm1990_vm1, %v5621_v58 }
 0x1b9   : > { %v1203_v48 = vpop.f32.mrf.mxu3  ;;  %v1897_v59 = vmul.f32 %v6246_v32, %v1165_v47  ;;  %v692_v12 = vpop.f32.mrf.mxu0  ;;  %2053 = vst.msk [vmem:[#allocation2 + $0x1e8] sm:$0xff] %vm1990_vm1, %v5621_v58 }
 0x1ba   : > { %v853_v49 = vpop.f32.mrf.mxu1  ;;  %v1901_v50 = vmul.f32 %v6286_v18, %v1203_v48  ;;  %v693_v55 = vadd.f32 %v6318_v4, %v692_v12  ;;  %2056 = vst.msk [vmem:[#allocation2 + $0x200] sm:$0xff] %vm1990_vm1, %v5621_v58 }
 0x1bb   : > { %2057 = vst.msk [vmem:[#allocation2 + $0x208] sm:$0xff] %vm1990_vm1, %v5621_v58 }
 0x1bc   : > { %2376 = vrot.lane.b32.xlu0 %v1901_v50, %s5620_s15  ;;  %2368 = vrot.lane.b32.xlu2 %v1897_v59, %s5620_s15  ;;  %v854_v56 = vadd.f32 %v853_v49, %v693_v55  ;;  %v6486_v50 = vld [vmem:[%s8242_s6 + $0x30] sm:$0x1]  ;;  %2058 = vst.msk [vmem:[#allocation2 + $0x210] sm:$0xff] %vm1990_vm1, %v5621_v58 }
 0x1bd   : > { %5206 = vmatmul.msk.f32.vlgmr.msrb.gmra.mxu0 %vm1008_vm0, %v6053_v51  ;;  %5216 = vmatmul.msk.f32.vlgmr.msrb.gmra.mxu1 %vm1008_vm0, %v6053_v51  ;;  %2059 = vst.msk [vmem:[#allocation2 + $0x218] sm:$0xff] %vm1990_vm1, %v5621_v58 }
 0x1be   : > { %5281 = vmatmul.msk.f32.gmra.mxu3 %vm1008_vm0, %v6015_v9  ;;  %5287 = vmatmul.msk.f32.gmra.mxu2 %vm1008_vm0, %v6066_v61  ;;  %v933_v1 = vmax.f32 %v854_v56, 0.0  ;;  %2060 = vst.msk [vmem:[#allocation2 + $0x220] sm:$0xff] %vm1990_vm1, %v5621_v58 }
 0x1bf   : > { %2064 = vst.msk [vmem:[#allocation2 + $0x240] sm:$0xff] %vm1990_vm1, %v5621_v58 }
 0x1c0   : > { %v985_v62 = vadd.f32 %v6346_v60, %v933_v1  ;;  %v1168_v63 = vpop.f32.mrf.mxu2  ;;  %2065 = vst.msk [vmem:[#allocation2 + $0x248] sm:$0xff] %vm1990_vm1, %v5621_v58 }
 0x1c1   : > { %v1206_v0 = vpop.f32.mrf.mxu3  ;;  %v1898_v2 = vmul.f32 %v6246_v32, %v1168_v63  ;;  %v695_v3 = vpop.f32.mrf.mxu0  ;;  %v6372_v32 = vld [vmem:[%s8242_s6 + $0x10] sm:$0xff]  ;;  %2066 = vst.msk [vmem:[#allocation2 + $0x250] sm:$0xff] %vm1990_vm1, %v5621_v58 }
 0x1c2   : > { %v856_v5 = vpop.f32.mrf.mxu1  ;;  %v1902_v9 = vmul.f32 %v6286_v18, %v1206_v0  ;;  %5303 = vmatpush.xpose.msk.msrb.mxu2 %vm1008_vm0, %v985_v62  ;;  %v696_v26 = vadd.f32 %v6318_v4, %v695_v3  ;;  %v6516_v62 = vld [vmem:[%s8242_s6] sm:$0xff]  ;;  %2067 = vst.msk [vmem:[#allocation2 + $0x258] sm:$0xff] %vm1990_vm1, %v5621_v58 }
 0x1c3   : > { %2072 = vst.msk [vmem:[#allocation2 + $0x280] sm:$0xff] %vm1990_vm1, %v5621_v58 }
 0x1c4   : > { %2378 = vrot.lane.b32.xlu1 %v1902_v9, %s5620_s15  ;;  %2370 = vrot.lane.b32.xlu0 %v1898_v2, %s5620_s15  ;;  %v857_v34 = vadd.f32 %v856_v5, %v696_v26  ;;  %2073 = vst.msk [vmem:[#allocation2 + $0x288] sm:$0xff] %vm1990_vm1, %v5621_v58  ;;  %v6680_v26 = vpop.permute.xlu1 %1843 }
 0x1c5   : > { %5207 = vmatmul.msk.f32.gmra.mxu0 %vm1008_vm0, %v6066_v61  ;;  %5217 = vmatmul.msk.f32.gmra.mxu1 %vm1008_vm0, %v6066_v61  ;;  %2074 = vst.msk [vmem:[#allocation2 + $0x290] sm:$0xff] %vm1990_vm1, %v5621_v58 }
 0x1c6   : > { %5282 = vmatmul.msk.f32.gmra.mxu3 %vm1008_vm0, %v6029_v20  ;;  %5288 = vmatmul.msk.f32.gmra.mxu2 %vm1008_vm0, %v6372_v32  ;;  %v934_v44 = vmax.f32 %v857_v34, 0.0  ;;  %2080 = vst.msk [vmem:[#allocation2 + $0x2c0] sm:$0xff] %vm1990_vm1, %v5621_v58 }
 0x1c7   : > { %5304 = vmatpush.xpose.msk.msrb.mxu2 %vm1008_vm0, %v984_v7  ;;  %2081 = vst.msk [vmem:[#allocation2 + $0x2c8] sm:$0xff] %vm1990_vm1, %v5621_v58 }
 0x1c8   : > { %v1244_v11 = vpop.f32.mrf.mxu2  ;;  %v986_v47 = vadd.f32 %v6346_v60, %v934_v44  ;;  %2088 = vst.msk [vmem:[#allocation2 + $0x300] sm:$0xff] %vm1990_vm1, %v5621_v58 }
 0x1c9   : > { %v1209_v13 = vpop.f32.mrf.mxu3  ;;  %v698_v14 = vpop.f32.mrf.mxu0  ;;  %v1906_v22 = vmul.f32 %v6403_v19, %v1244_v11  ;;  %2105 = vst.msk [vmem:[#allocation2] sm:$0xff] %vm2104_vm2, %v5621_v58 }
 0x1ca   : > { %v1903_v20 = vmul.f32 %v6286_v18, %v1209_v13  ;;  %v859_v15 = vpop.f32.mrf.mxu1  ;;  %v699_v54 = vadd.f32 %v6318_v4, %v698_v14  ;;  %v6578_v11 = vpop.permute.xlu2 %1835  ;;  %2113 = vst.msk [vmem:[#allocation2 + $0x38] sm:$0xff] %vm2104_vm2, %v5621_v58 }
 0x1cb   : > { %5305 = vmatpush.xpose.msk.msrb.mxu2 %vm1008_vm0, %v983_v10  ;;  %2114 = vst.msk [vmem:[#allocation2 + $0x40] sm:$0xff] %vm2104_vm2, %v5621_v58 }
 0x1cc   : > { %2380 = vrot.lane.b32.xlu2 %v1903_v20, %s5620_s15  ;;  %v860_v28 = vadd.f32 %v859_v15, %v699_v54  ;;  %2120 = vst.msk [vmem:[#allocation2 + $0x70] sm:$0xff] %vm2104_vm2, %v5621_v58 }
 0x1cd   : > { %2121 = vst.msk [vmem:[#allocation2 + $0x78] sm:$0xff] %vm2104_vm2, %v5621_v58 }
 0x1ce   : > { %5289 = vmatmul.msk.f32.gmra.mxu2 %vm1008_vm0, %v6394_v17  ;;  %5296 = vmatmul.msk.f32.vlgmr.msra.gmra.mxu3 %vm1008_vm0, %v6053_v51  ;;  %v935_v35 = vmax.f32 %v860_v28, 0.0  ;;  %2122 = vst.msk [vmem:[#allocation2 + $0x80] sm:$0xff] %vm2104_vm2, %v5621_v58 }
 0x1cf   : > { %2127 = vst.msk [vmem:[#allocation2 + $0xa8] sm:$0xff] %vm2104_vm2, %v5621_v58 }
 0x1d0   : > { %v6421_v30 = vpop.f32.mrf.mxu2  ;;  %v987_v38 = vadd.f32 %v6346_v60, %v935_v35  ;;  %2128 = vst.msk [vmem:[#allocation2 + $0xb0] sm:$0xff] %vm2104_vm2, %v5621_v58 }
 0x1d1   : > { %v1212_v23 = vpop.f32.mrf.mxu3  ;;  %v701_v24 = vpop.f32.mrf.mxu0  ;;  %v1907_v20 = vmul.f32 %v6403_v19, %v6421_v30  ;;  %2129 = vst.msk [vmem:[#allocation2 + $0xb8] sm:$0xff] %vm2104_vm2, %v5621_v58 }
 0x1d2   : > { %v1904_v51 = vmul.f32 %v6286_v18, %v1212_v23  ;;  %v862_v25 = vpop.f32.mrf.mxu1  ;;  %v702_v29 = vadd.f32 %v6318_v4, %v701_v24  ;;  %2130 = vst.msk [vmem:[#allocation2 + $0xc0] sm:$0xff] %vm2104_vm2, %v5621_v58  ;;  %v6709_v34 = vpop.permute.xlu2 %1847 }
 0x1d3   : > { %2134 = vst.msk [vmem:[#allocation2 + $0xe0] sm:$0xff] %vm2104_vm2, %v5621_v58 }
 0x1d4   : > { %2382 = vrot.lane.b32.xlu0 %v1904_v51, %s5620_s15  ;;  %2386 = vrot.lane.b32.xlu2 %v1906_v22, %s5620_s15  ;;  %v863_v21 = vadd.f32 %v862_v25, %v702_v29  ;;  %2135 = vst.msk [vmem:[#allocation2 + $0xe8] sm:$0xff] %vm2104_vm2, %v5621_v58 }
 0x1d5   : > { %v2335_v33 = vpop.permute.xlu0 %2334  ;;  %2136 = vst.msk [vmem:[#allocation2 + $0xf0] sm:$0xff] %vm2104_vm2, %v5621_v58 }
 0x1d6   : > { %5290 = vmatmul.msk.f32.gmra.mxu2 %vm1008_vm0, %v6428_v31  ;;  %5297 = vmatmul.msk.f32.gmra.mxu3 %vm1008_vm0, %v6066_v61  ;;  %v936_v36 = vmax.f32 %v863_v21, 0.0  ;;  %2137 = vst.msk [vmem:[#allocation2 + $0xf8] sm:$0xff] %vm2104_vm2, %v5621_v58  ;;  %v6703_v33 = vpop.permute.xlu1 %1855 }
 0x1d7   : > { %2138 = vst.msk [vmem:[#allocation2 + $0x100] sm:$0xff] %vm2104_vm2, %v5621_v58 }
 0x1d8   : > { %v988_v37 = vadd.f32 %v6346_v60, %v936_v36  ;;  %v1250_v48 = vpop.f32.mrf.mxu2  ;;  %2141 = vst.msk [vmem:[#allocation2 + $0x118] sm:$0xff] %vm2104_vm2, %v5621_v58 }
 0x1d9   : > { %v1215_v41 = vpop.f32.mrf.mxu3  ;;  %v704_v61 = vpop.f32.mrf.mxu0  ;;  %v1908_v59 = vmul.f32 %v6403_v19, %v1250_v48  ;;  %2142 = vst.msk [vmem:[#allocation2 + $0x120] sm:$0xff] %vm2104_vm2, %v5621_v58 }
 0x1da   : > { %v1905_v27 = vmul.f32 %v6286_v18, %v1215_v41  ;;  %v865_v42 = vpop.f32.mrf.mxu1  ;;  %5313 = vmatpush.xpose.msk.msrb.mxu3 %vm1008_vm0, %v988_v37  ;;  %v6456_v18 = vld [vmem:[%s8242_s6 + $0x28] sm:$0xff]  ;;  %v705_v55 = vadd.f32 %v6318_v4, %v704_v61  ;;  %2143 = vst.msk [vmem:[#allocation2 + $0x128] sm:$0xff] %vm2104_vm2, %v5621_v58 }
 0x1db   : > { %2144 = vst.msk [vmem:[#allocation2 + $0x130] sm:$0xff] %vm2104_vm2, %v5621_v58 }
 0x1dc   : > { %2384 = vrot.lane.b32.xlu1 %v1905_v27, %s5620_s15  ;;  %v866_v63 = vadd.f32 %v865_v42, %v705_v55  ;;  %2388 = vrot.lane.b32.xlu0 %v1907_v20, %s5620_s15  ;;  %2145 = vst.msk [vmem:[#allocation2 + $0x138] sm:$0xff] %vm2104_vm2, %v5621_v58 }
 0x1dd   : > { %2146 = vst.msk [vmem:[#allocation2 + $0x140] sm:$0xff] %vm2104_vm2, %v5621_v58 }
 0x1de   : > { %5291 = vmatmul.msk.f32.gmra.mxu2 %vm1008_vm0, %v6456_v18  ;;  %5298 = vmatmul.msk.f32.gmra.mxu3 %vm1008_vm0, %v6372_v32  ;;  %v937_v5 = vmax.f32 %v866_v63, 0.0  ;;  %2148 = vst.msk [vmem:[#allocation2 + $0x150] sm:$0xff] %vm2104_vm2, %v5621_v58  ;;  %v6728_v44 = vpop.permute.xlu1 %1867 }
 0x1df   : > { %5314 = vmatpush.xpose.msk.msrb.mxu3 %vm1008_vm0, %v987_v38  ;;  %2149 = vst.msk [vmem:[#allocation2 + $0x158] sm:$0xff] %vm2104_vm2, %v5621_v58 }
 0x1e0   : > { %v989_v7 = vadd.f32 %v6346_v60, %v937_v5  ;;  %v1253_v10 = vpop.f32.mrf.mxu2  ;;  %2150 = vst.msk [vmem:[#allocation2 + $0x160] sm:$0xff] %vm2104_vm2, %v5621_v58 }
 0x1e1   : > { %v707_v12 = vpop.f32.mrf.mxu0  ;;  %v6561_v13 = vpop.f32.mrf.mxu3  ;;  %v1909_v54 = vmul.f32 %v6403_v19, %v1253_v10  ;;  %2151 = vst.msk [vmem:[#allocation2 + $0x168] sm:$0xff] %vm2104_vm2, %v5621_v58 }
 0x1e2   : > { %v868_v49 = vpop.f32.mrf.mxu1  ;;  %v708_v52 = vadd.f32 %v6318_v4, %v707_v12  ;;  %2152 = vst.msk [vmem:[#allocation2 + $0x170] sm:$0xff] %vm2104_vm2, %v5621_v58  ;;  %v1913_v28 = vmul.f32 %v6578_v11, %v6561_v13 }
 0x1e3   : > { %5315 = vmatpush.xpose.msk.msrb.mxu3 %vm1008_vm0, %v986_v47  ;;  %2392 = vrot.lane.b32.xlu2 %v1909_v54, %s5620_s15  ;;  %2153 = vst.msk [vmem:[#allocation2 + $0x178] sm:$0xff] %vm2104_vm2, %v5621_v58 }
 0x1e4   : > { %2390 = vrot.lane.b32.xlu1 %v1908_v59, %s5620_s15  ;;  %v869_v56 = vadd.f32 %v868_v49, %v708_v52  ;;  %2155 = vst.msk [vmem:[#allocation2 + $0x188] sm:$0xff] %vm2104_vm2, %v5621_v58  ;;  %2400 = vrot.lane.b32.xlu0 %v1913_v28, %s5620_s15  ;;  %v6737_v49 = vpop.permute.xlu2 %1859 }
 0x1e5   : > { %2156 = vst.msk [vmem:[#allocation2 + $0x190] sm:$0xff] %vm2104_vm2, %v5621_v58 }
 0x1e6   : > { %5292 = vmatmul.msk.f32.gmra.mxu2 %vm1008_vm0, %v6486_v50  ;;  %5299 = vmatmul.msk.f32.gmra.mxu3 %vm1008_vm0, %v6394_v17  ;;  %v938_v0 = vmax.f32 %v869_v56, 0.0  ;;  %2157 = vst.msk [vmem:[#allocation2 + $0x198] sm:$0xff] %vm2104_vm2, %v5621_v58  ;;  %v2337_v63 = vpop.permute.xlu1 %2336 }
 0x1e7   : > { %2158 = vst.msk [vmem:[#allocation2 + $0x1a0] sm:$0xff] %vm2104_vm2, %v5621_v58 }
 0x1e8   : > { %v990_v9 = vadd.f32 %v6346_v60, %v938_v0  ;;  %v6576_v14 = vpop.f32.mrf.mxu2  ;;  %2159 = vst.msk [vmem:[#allocation2 + $0x1a8] sm:$0xff] %vm2104_vm2, %v5621_v58 }
 0x1e9   : > { %v710_v53 = vpop.f32.mrf.mxu0  ;;  %v1294_v15 = vpop.f32.mrf.mxu3  ;;  %2160 = vst.msk [vmem:[#allocation2 + $0x1b0] sm:$0xff] %vm2104_vm2, %v5621_v58  ;;  %v1910_v21 = vmul.f32 %v6403_v19, %v6576_v14 }
 0x1ea   : > { %v711_v57 = vadd.f32 %v6318_v4, %v710_v53  ;;  %v871_v39 = vpop.f32.mrf.mxu1  ;;  %v1914_v22 = vmul.f32 %v6578_v11, %v1294_v15  ;;  %2162 = vst.msk [vmem:[#allocation2 + $0x1c0] sm:$0xff] %vm2104_vm2, %v5621_v58 }
 0x1eb   : > { %2163 = vst.msk [vmem:[#allocation2 + $0x1c8] sm:$0xff] %vm2104_vm2, %v5621_v58 }
 0x1ec   : > { %v872_v1 = vadd.f32 %v871_v39, %v711_v57  ;;  %2402 = vrot.lane.b32.xlu1 %v1914_v22, %s5620_s15  ;;  %2164 = vst.msk [vmem:[#allocation2 + $0x1d0] sm:$0xff] %vm2104_vm2, %v5621_v58  ;;  %2394 = vrot.lane.b32.xlu0 %v1910_v21, %s5620_s15  ;;  %v6756_v13 = vpop.permute.xlu2 %1871 }
 0x1ed   : > { %2165 = vst.msk [vmem:[#allocation2 + $0x1d8] sm:$0xff] %vm2104_vm2, %v5621_v58 }
 0x1ee   : > { %5300 = vmatmul.msk.f32.gmra.mxu3 %vm1008_vm0, %v6428_v31  ;;  %5306 = vmatmul.msk.f32.vlgmr.msrb.gmra.mxu2 %vm1008_vm0, %v6516_v62  ;;  %v939_v2 = vmax.f32 %v872_v1, 0.0  ;;  %2166 = vst.msk [vmem:[#allocation2 + $0x1e0] sm:$0xff] %vm2104_vm2, %v5621_v58  ;;  %v2341_v1 = vpop.permute.xlu0 %2340  ;;  %v2349_v54 = vpop.permute.xlu1 %2348 }
 0x1ef   : > { %2167 = vst.msk [vmem:[#allocation2 + $0x1e8] sm:$0xff] %vm2104_vm2, %v5621_v58 }
 0x1f0   : > { %v991_v3 = vadd.f32 %v6346_v60, %v939_v2  ;;  %v1259_v23 = vpop.f32.mrf.mxu2  ;;  %2170 = vst.msk [vmem:[#allocation2 + $0x200] sm:$0xff] %vm2104_vm2, %v5621_v58 }
 0x1f1   : > { %v1297_v51 = vpop.f32.mrf.mxu3  ;;  %v1911_v24 = vmul.f32 %v6403_v19, %v1259_v23  ;;  %v713_v29 = vpop.f32.mrf.mxu0  ;;  %2171 = vst.msk [vmem:[#allocation2 + $0x208] sm:$0xff] %vm2104_vm2, %v5621_v58 }
 0x1f2   : > { %5323 = vmatpush.xpose.msk.msra.mxu2 %vm1008_vm0, %v991_v3  ;;  %v1915_v25 = vmul.f32 %v6578_v11, %v1297_v51  ;;  %v874_v30 = vpop.f32.mrf.mxu1  ;;  %2172 = vst.msk [vmem:[#allocation2 + $0x210] sm:$0xff] %vm2104_vm2, %v5621_v58  ;;  %v714_v59 = vadd.f32 %v6318_v4, %v713_v29 }
 0x1f3   : > { %2173 = vst.msk [vmem:[#allocation2 + $0x218] sm:$0xff] %vm2104_vm2, %v5621_v58 }
 0x1f4   : > { %2396 = vrot.lane.b32.xlu1 %v1911_v24, %s5620_s15  ;;  %2404 = vrot.lane.b32.xlu2 %v1915_v25, %s5620_s15  ;;  %2174 = vst.msk [vmem:[#allocation2 + $0x220] sm:$0xff] %vm2104_vm2, %v5621_v58  ;;  %v875_v56 = vadd.f32 %v874_v30, %v714_v59  ;;  %v2339_v51 = vpop.permute.xlu2 %2338 }
 0x1f5   : > { %2178 = vst.msk [vmem:[#allocation2 + $0x240] sm:$0xff] %vm2104_vm2, %v5621_v58 }
 0x1f6   : > { %5301 = vmatmul.msk.f32.gmra.mxu3 %vm1008_vm0, %v6456_v18  ;;  %5307 = vmatmul.msk.f32.gmra.mxu2 %vm1008_vm0, %v6540_v6  ;;  %2179 = vst.msk [vmem:[#allocation2 + $0x248] sm:$0xff] %vm2104_vm2, %v5621_v58  ;;  %v2343_v25 = vpop.permute.xlu1 %2342 }
 0x1f7   : > { %5324 = vmatpush.xpose.msk.msra.mxu2 %vm1008_vm0, %v990_v9  ;;  %2180 = vst.msk [vmem:[#allocation2 + $0x250] sm:$0xff] %vm2104_vm2, %v5621_v58 }
 0x1f8   : > { %v1262_v35 = vpop.f32.mrf.mxu2  ;;  %2181 = vst.msk [vmem:[#allocation2 + $0x258] sm:$0xff] %vm2104_vm2, %v5621_v58 }
 0x1f9   : > { %v1300_v36 = vpop.f32.mrf.mxu3  ;;  %v1912_v37 = vmul.f32 %v6403_v19, %v1262_v35  ;;  %v716_v41 = vpop.f32.mrf.mxu0  ;;  %2186 = vst.msk [vmem:[#allocation2 + $0x280] sm:$0xff] %vm2104_vm2, %v5621_v58 }
 0x1fa   : > { %v877_v27 = vpop.f32.mrf.mxu1  ;;  %v1916_v61 = vmul.f32 %v6578_v11, %v1300_v36  ;;  %2187 = vst.msk [vmem:[#allocation2 + $0x288] sm:$0xff] %vm2104_vm2, %v5621_v58  ;;  %v717_v42 = vadd.f32 %v6318_v4, %v716_v41 }
 0x1fb   : > { %5325 = vmatpush.xpose.msk.msra.mxu2 %vm1008_vm0, %v989_v7  ;;  %2188 = vst.msk [vmem:[#allocation2 + $0x290] sm:$0xff] %vm2104_vm2, %v5621_v58  ;;  %v940_v7 = vmax.f32 %v875_v56, 0.0 }
 0x1fc   : > { %2398 = vrot.lane.b32.xlu2 %v1912_v37, %s5620_s15  ;;  %2406 = vrot.lane.b32.xlu0 %v1916_v61, %s5620_s15  ;;  %v878_v12 = vadd.f32 %v877_v27, %v717_v42  ;;  %2194 = vst.msk [vmem:[#allocation2 + $0x2c0] sm:$0xff] %vm2104_vm2, %v5621_v58  ;;  %v2351_v35 = vpop.permute.xlu2 %2350 }
 0x1fd   : > { %2195 = vst.msk [vmem:[#allocation2 + $0x2c8] sm:$0xff] %vm2104_vm2, %v5621_v58  ;;  %v992_v20 = vadd.f32 %v6346_v60, %v940_v7  ;;  %v2353_v14 = vpop.permute.xlu0 %2352 }
 0x1fe   : > { %5308 = vmatmul.msk.f32.gmra.mxu2 %vm1008_vm0, %v6372_v32  ;;  %5302 = vmatmul.msk.f32.gmra.mxu3 %vm1008_vm0, %v6486_v50  ;;  %v941_v57 = vmax.f32 %v878_v12, 0.0  ;;  %2202 = vst.msk [vmem:[#allocation2 + $0x300] sm:$0xff] %vm2104_vm2, %v5621_v58 }
 0x1ff   : > { %2040 = vst.msk [vmem:[#allocation2 + $0x180] sm:$0x1] %vm1997_vm4, %v5621_v58 }
 0x200   : > { %v1338_v38 = vpop.f32.mrf.mxu2  ;;  %v993_v10 = vadd.f32 %v6346_v60, %v941_v57  ;;  %2047 = vst.msk [vmem:[#allocation2 + $0x1b8] sm:$0x1] %vm1997_vm4, %v5621_v58 }
 0x201   : > { %v1303_v19 = vpop.f32.mrf.mxu3  ;;  %v719_v48 = vpop.f32.mrf.mxu0  ;;  %v1920_v5 = vmul.f32 %v6301_v43, %v1338_v38  ;;  %2054 = vst.msk [vmem:[#allocation2 + $0x1f0] sm:$0x1] %vm1997_vm4, %v5621_v58 }
 0x202   : > { %v1917_v47 = vmul.f32 %v6578_v11, %v1303_v19  ;;  %v720_v52 = vadd.f32 %v6318_v4, %v719_v48  ;;  %v880_v53 = vpop.f32.mrf.mxu1  ;;  %2061 = vst.msk [vmem:[#allocation2 + $0x228] sm:$0x1] %vm1997_vm4, %v5621_v58 }
 0x203   : > { %2068 = vst.msk [vmem:[#allocation2 + $0x260] sm:$0x1] %vm1997_vm4, %v5621_v58 }
 0x204   : > { %2408 = vrot.lane.b32.xlu1 %v1917_v47, %s5620_s15  ;;  %v881_v55 = vadd.f32 %v880_v53, %v720_v52  ;;  %v2357_v12 = vpop.permute.xlu2 %2356  ;;  %2075 = vst.msk [vmem:[#allocation2 + $0x298] sm:$0x1] %vm1997_vm4, %v5621_v58 }
 0x205   : > { %v2359_v24 = vpop.permute.xlu0 %2358  ;;  %2082 = vst.msk [vmem:[#allocation2 + $0x2d0] sm:$0x1] %vm1997_vm4, %v5621_v58 }
 0x206   : > { %5309 = vmatmul.msk.f32.gmra.mxu2 %vm1008_vm0, %v6394_v17  ;;  %5316 = vmatmul.msk.f32.vlgmr.msrb.gmra.mxu3 %vm1008_vm0, %v6516_v62  ;;  %v942_v39 = vmax.f32 %v881_v55, 0.0  ;;  %2682 = vst.msk [vmem:[#allocation2 + $0x70] sm:$0xff] %vm2666_vm3, %v2359_v24  ;;  %v2355_v1 = vpop.permute.xlu1 %2354 }
 0x207   : > { %2089 = vst.msk [vmem:[#allocation2 + $0x308] sm:$0x1] %vm1997_vm4, %v5621_v58 }
 0x208   : > { %v994_v0 = vadd.f32 %v6346_v60, %v942_v39  ;;  %v1341_v3 = vpop.f32.mrf.mxu2  ;;  %2154 = vst.msk [vmem:[#allocation2 + $0x180] sm:$0x1] %vm2111_vm5, %v5621_v58 }
 0x209   : > { %v1306_v2 = vpop.f32.mrf.mxu3  ;;  %v1921_v15 = vmul.f32 %v6301_v43, %v1341_v3  ;;  %v722_v22 = vpop.f32.mrf.mxu0  ;;  %2161 = vst.msk [vmem:[#allocation2 + $0x1b8] sm:$0x1] %vm2111_vm5, %v5621_v58 }
 0x20a   : > { %v1918_v9 = vmul.f32 %v6578_v11, %v1306_v2  ;;  %5333 = vmatpush.xpose.msk.msra.mxu3 %vm1008_vm0, %v994_v0  ;;  %v883_v23 = vpop.f32.mrf.mxu1  ;;  %v723_v47 = vadd.f32 %v6318_v4, %v722_v22  ;;  %2168 = vst.msk [vmem:[#allocation2 + $0x1f0] sm:$0x1] %vm2111_vm5, %v5621_v58 }
 0x20b   : > { %2175 = vst.msk [vmem:[#allocation2 + $0x228] sm:$0x1] %vm2111_vm5, %v5621_v58 }
 0x20c   : > { %2414 = vrot.lane.b32.xlu1 %v1920_v5, %s5620_s15  ;;  %2410 = vrot.lane.b32.xlu2 %v1918_v9, %s5620_s15  ;;  %v884_v56 = vadd.f32 %v883_v23, %v723_v47  ;;  %2182 = vst.msk [vmem:[#allocation2 + $0x260] sm:$0x1] %vm2111_vm5, %v5621_v58 }
 0x20d   : > { %v2846_v36 = vld [vmem:[#allocation2 + $0x72] sm:$0x1]  ;;  %v2798_v37 = vld [vmem:[#allocation2 + $0x71] sm:$0x1]  ;;  %v2894_v27 = vld [vmem:[#allocation2 + $0x73] sm:$0x1] }
 0x20e   : > { %5310 = vmatmul.msk.f32.gmra.mxu2 %vm1008_vm0, %v6428_v31  ;;  %5317 = vmatmul.msk.f32.gmra.mxu3 %vm1008_vm0, %v6540_v6  ;;  %v2990_v53 = vld [vmem:[#allocation2 + $0x75] sm:$0x1]  ;;  %v2942_v55 = vld [vmem:[#allocation2 + $0x74] sm:$0x1]  ;;  %v3038_v63 = vld [vmem:[#allocation2 + $0x76] sm:$0x1]  ;;  %v2361_v24 = vpop.permute.xlu1 %2360 }
 0x20f   : > { %5334 = vmatpush.xpose.msk.msra.mxu3 %vm1008_vm0, %v993_v10  ;;  %2864 = vrot.lane.b32.xlu0 %v2846_v36, %s5622_s25  ;;  %v943_v7 = vmax.f32 %v884_v56, 0.0  ;;  %2189 = vst.msk [vmem:[#allocation2 + $0x298] sm:$0x1] %vm2111_vm5, %v5621_v58 }
 0x210   : > { %v6768_v29 = vpop.f32.mrf.mxu2  ;;  %2196 = vst.msk [vmem:[#allocation2 + $0x2d0] sm:$0x1] %vm2111_vm5, %v5621_v58 }
 0x211   : > { %v1309_v28 = vpop.f32.mrf.mxu3  ;;  %v725_v30 = vpop.f32.mrf.mxu0  ;;  %v1922_v25 = vmul.f32 %v6301_v43, %v6768_v29  ;;  %2203 = vst.msk [vmem:[#allocation2 + $0x308] sm:$0x1] %vm2111_vm5, %v5621_v58  ;;  %v5516_v29 = vld [vmem:[%s8240_s4] ss:$0 sm:$0xff] }
 0x212   : > { %v886_v21 = vpop.f32.mrf.mxu1  ;;  %v726_v41 = vadd.f32 %v6318_v4, %v725_v30  ;;  %v1919_v14 = vmul.f32 %v6578_v11, %v1309_v28  ;;  %2683 = vst.msk [vmem:[#allocation2 + $0x78] sm:$0xff] %vm2666_vm3, %v2361_v24 }
 0x213   : > { %5335 = vmatpush.xpose.msk.msra.mxu3 %vm1008_vm0, %v992_v20  ;;  %v2363_v20 = vpop.permute.xlu2 %2362 }
 0x214   : > { %2416 = vrot.lane.b32.xlu2 %v1921_v15, %s5620_s15  ;;  %2816 = vrot.lane.b32.xlu1 %v2798_v37, %s5623_s13  ;;  %v887_v48 = vadd.f32 %v886_v21, %v726_v41  ;;  %v995_v15 = vadd.f32 %v6346_v60, %v943_v7  ;;  %2684 = vst.msk [vmem:[#allocation2 + $0x80] sm:$0xff] %vm2666_vm3, %v2363_v20 }
 0x216   : > { %5311 = vmatmul.msk.f32.gmra.mxu2 %vm1008_vm0, %v6456_v18  ;;  %5318 = vmatmul.msk.f32.gmra.mxu3 %vm1008_vm0, %v6372_v32  ;;  %v944_v57 = vmax.f32 %v887_v48, 0.0 }
 0x217   : > { %3008 = vrot.lane.b32.xlu0 %v2990_v53, %s5625_s28 }
 0x218   : > { %v6781_v61 = vpop.f32.mrf.mxu2  ;;  %v996_v10 = vadd.f32 %v6346_v60, %v944_v57 }
 0x219   : > { %v6783_v42 = vpop.f32.mrf.mxu3  ;;  %v3150_v57 = vld [vmem:[#allocation2 + $0x79] sm:$0x1]  ;;  %v3102_v1 = vld [vmem:[#allocation2 + $0x78] sm:$0x1]  ;;  %v3342_v7 = vld [vmem:[#allocation2 + $0x7d] sm:$0x1] }
 0x21a   : > { %v728_v19 = vpop.f32.mrf.mxu0  ;;  %v889_v38 = vpop.f32.mrf.mxu1  ;;  %v3406_v24 = vld [vmem:[#allocation2 + $0x7f] sm:$0x1] }
 0x21b   : > { %v729_v59 = vadd.f32 %v6318_v4, %v728_v19  ;;  %v2375_v51 = vpop.permute.xlu2 %2374 }
 0x21c   : > { %2912 = vrot.lane.b32.xlu2 %v2894_v27, %s5624_s16  ;;  %2960 = vrot.lane.b32.xlu1 %v2942_v55, %s5626_s26  ;;  %2690 = vst.msk [vmem:[#allocation2 + $0xb0] sm:$0xff] %vm2666_vm3, %v2375_v51  ;;  %v3198_v55 = vld [vmem:[#allocation2 + $0x7a] sm:$0x1]  ;;  %v1923_v51 = vmul.f32 %v6301_v43, %v6781_v61  ;;  %v3454_v61 = vld [vmem:[#allocation2 + $0x80] sm:$0x1] }
 0x21d   : > { %v890_v52 = vadd.f32 %v889_v38, %v729_v59  ;;  %v2365_v19 = vpop.permute.xlu0 %2364 }
 0x21e   : > { %5312 = vmatmul.msk.f32.gmra.mxu2 %vm1008_vm0, %v6486_v50  ;;  %5319 = vmatmul.msk.f32.gmra.mxu3 %vm1008_vm0, %v6394_v17  ;;  %v2373_v27 = vpop.permute.xlu1 %2372  ;;  %v3550_v19 = vld [vmem:[#allocation2 + $0x82] sm:$0x1] }
 0x21f   : > { %v945_v39 = vmax.f32 %v890_v52, 0.0  ;;  %2412 = vrot.lane.b32.xlu0 %v1919_v14, %s5620_s15  ;;  %2689 = vst.msk [vmem:[#allocation2 + $0xa8] sm:$0xff] %vm2666_vm3, %v2373_v27  ;;  %v3598_v27 = vld [vmem:[#allocation2 + $0x83] sm:$0x1] }
 0x221   : > { %v997_v0 = vadd.f32 %v6346_v60, %v945_v39  ;;  %v6807_v2 = vpop.f32.mrf.mxu2  ;;  %v6809_v3 = vpop.f32.mrf.mxu3 }
 0x222   : > { %v731_v5 = vpop.f32.mrf.mxu0  ;;  %v892_v9 = vpop.f32.mrf.mxu1 }
 0x223   : > { %5343 = vmatpush.xpose.msk.msrb.mxu2 %vm1008_vm0, %v997_v0  ;;  %v732_v35 = vadd.f32 %v5516_v29, %v731_v5  ;;  %v2369_v41 = vpop.permute.xlu2 %2368 }
 0x224   : > { %3056 = vrot.lane.b32.xlu2 %v3038_v63, %s5627_s7  ;;  %3215 = vrot.lane.b32.xlu1 %v3198_v55, %s5624_s16 }
 0x225   : > { %v893_v47 = vadd.f32 %v892_v9, %v732_v35 }
 0x226   : > { %5326 = vmatmul.msk.f32.vlgmr.msra.gmra.mxu2 %vm1008_vm0, %v6516_v62  ;;  %5320 = vmatmul.msk.f32.gmra.mxu3 %vm1008_vm0, %v6428_v31  ;;  %v2367_v63 = vpop.permute.xlu1 %2366 }
 0x227   : > { %5344 = vmatpush.xpose.msk.msrb.mxu2 %vm1008_vm0, %v996_v10  ;;  %2418 = vrot.lane.b32.xlu0 %v1922_v25, %s5620_s15  ;;  %v946_v53 = vmax.f32 %v893_v47, 0.0  ;;  %v3294_v10 = vld [vmem:[#allocation2 + $0x7c] sm:$0x1] }
 0x229   : > { %v6826_v54 = vpop.f32.mrf.mxu3  ;;  %v6832_v23 = vpop.f32.mrf.mxu2 }
 0x22a   : > { %v734_v11 = vpop.f32.mrf.mxu0  ;;  %v895_v22 = vpop.f32.mrf.mxu1 }
 0x22b   : > { %5345 = vmatpush.xpose.msk.msrb.mxu2 %vm1008_vm0, %v995_v15  ;;  %v735_v28 = vadd.f32 %v6318_v4, %v734_v11  ;;  %v2381_v39 = vpop.permute.xlu2 %2380 }
 0x22c   : > { %3167 = vrot.lane.b32.xlu2 %v3150_v57, %s5622_s25  ;;  %3359 = vrot.lane.b32.xlu1 %v3342_v7, %s5627_s7  ;;  %v5520_v39 = vld [vmem:[%s8242_s6 + $0x20] sm:$0xff] }
 0x22d   : > { %v896_v36 = vadd.f32 %v895_v22, %v735_v28  ;;  %v3502_v28 = vld [vmem:[#allocation2 + $0x81] sm:$0x1] }
 0x22e   : > { %5327 = vmatmul.msk.f32.gmra.mxu2 %vm1008_vm0, %v6540_v6  ;;  %5321 = vmatmul.msk.f32.gmra.mxu3 %vm1008_vm0, %v6456_v18  ;;  %v2377_v0 = vpop.permute.xlu0 %2376 }
 0x22f   : > { %v947_v48 = vmax.f32 %v896_v36, 0.0  ;;  %3119 = vrot.lane.b32.xlu0 %v3102_v1, %s5623_s13  ;;  %2691 = vst.msk [vmem:[#allocation2 + $0xb8] sm:$0xff] %vm2666_vm3, %v2377_v0  ;;  %v2799_v1 = vld [vmem:[#allocation2 + $0xa9] sm:$0x1] }
 0x231   : > { %v6849_v30 = vpop.f32.mrf.mxu3  ;;  %v6855_v4 = vpop.f32.mrf.mxu2  ;;  %v999_v56 = vadd.f32 %v6346_v60, %v947_v48 }
 0x232   : > { %v737_v21 = vpop.f32.mrf.mxu0  ;;  %v898_v37 = vpop.f32.mrf.mxu1 }
 0x233   : > { %v738_v58 = vadd.f32 %v5516_v29, %v737_v21  ;;  %v2387_v14 = vpop.permute.xlu2 %2386 }
 0x234   : > { %3311 = vrot.lane.b32.xlu2 %v3294_v10, %s5625_s28  ;;  %2696 = vst.msk [vmem:[#allocation2 + $0xe0] sm:$0xff] %vm2666_vm3, %v2387_v14  ;;  %2420 = vrot.lane.b32.xlu1 %v1923_v51, %s5620_s15  ;;  %v5521_v10 = vld [vmem:[%s8242_s6 + $0x28] sm:$0xff]  ;;  %v1929_v14 = vmul.f32 %v6680_v26, %v6826_v54  ;;  %v3103_v54 = vld [vmem:[#allocation2 + $0xb0] sm:$0x1] }
 0x235   : > { %v899_v38 = vadd.f32 %v898_v37, %v738_v58  ;;  %v3646_v58 = vld [vmem:[#allocation2 + $0x84] sm:$0x1] }
 0x236   : > { %5328 = vmatmul.msk.f32.gmra.mxu2 %vm1008_vm0, %v6372_v32  ;;  %5322 = vmatmul.msk.f32.gmra.mxu3 %vm1008_vm0, %v6486_v50  ;;  %v2379_v15 = vpop.permute.xlu1 %2378  ;;  %v2371_v11 = vpop.permute.xlu0 %2370 }
 0x237   : > { %v948_v59 = vmax.f32 %v899_v38, 0.0  ;;  %2692 = vst.msk [vmem:[#allocation2 + $0xc0] sm:$0xff] %vm2666_vm3, %v2379_v15  ;;  %v2943_v15 = vld [vmem:[#allocation2 + $0xac] sm:$0x1] }
 0x239   : > { %v1000_v12 = vadd.f32 %v6346_v60, %v948_v59  ;;  %v6864_v52 = vpop.f32.mrf.mxu3  ;;  %v5517_v60 = vld [vmem:[%s8241_s5] ss:$0 sm:$0xff]  ;;  %v6877_v9 = vpop.f32.mrf.mxu2 }
 0x23a   : > { %v998_v5 = vadd.f32 %v5517_v60, %v946_v53  ;;  %v2847_v53 = vld [vmem:[#allocation2 + $0xaa] sm:$0x1]  ;;  %v3039_v60 = vld [vmem:[#allocation2 + $0xae] sm:$0x1] }
 0x23b   : > { %5353 = vmatpush.xpose.msk.msrb.mxu3 %vm1008_vm0, %v1000_v12  ;;  %v1924_v12 = vmul.f32 %v6301_v43, %v6807_v2  ;;  %v2991_v2 = vld [vmem:[#allocation2 + $0xad] sm:$0x1] }
 0x23c   : > { %3422 = vrot.lane.b32.xlu2 %v3406_v24, %s5623_s13  ;;  %3470 = vrot.lane.b32.xlu1 %v3454_v61, %s5622_s25  ;;  %v5522_v24 = vld [vmem:[%s8242_s6 + $0x30] sm:$0x1] }
 0x23d   : > { %v2393_v25 = vpop.permute.xlu2 %2392 }
 0x23e   : > { %5329 = vmatmul.msk.f32.gmra.mxu2 %vm1008_vm0, %v6394_v17  ;;  %5336 = vmatmul.msk.f32.vlgmr.msra.gmra.mxu3 %vm1008_vm0, %v6516_v62  ;;  %2699 = vst.msk [vmem:[#allocation2 + $0xf8] sm:$0xff] %vm2666_vm3, %v2393_v25  ;;  %v3151_v25 = vld [vmem:[#allocation2 + $0xb1] sm:$0x1] }
 0x23f   : > { %5354 = vmatpush.xpose.msk.msrb.mxu3 %vm1008_vm0, %v999_v56  ;;  %v2895_v56 = vld [vmem:[#allocation2 + $0xab] sm:$0x1] }
 0x241   : > { %v6881_v20 = vpop.f32.mrf.mxu3  ;;  %v6893_v22 = vpop.f32.mrf.mxu2 }
 0x243   : > { %5355 = vmatpush.xpose.msk.msrb.mxu3 %vm1008_vm0, %v998_v5 }
 0x244   : > { %3614 = vrot.lane.b32.xlu1 %v3598_v27, %s5625_s28  ;;  %v3455_v27 = vld [vmem:[#allocation2 + $0xb8] sm:$0x1] }
 0x246   : > { %5330 = vmatmul.msk.f32.gmra.mxu2 %vm1008_vm0, %v6428_v31  ;;  %5337 = vmatmul.msk.f32.gmra.mxu3 %vm1008_vm0, %v6540_v6  ;;  %v2383_v29 = vpop.permute.xlu0 %2382 }
 0x247   : > { %v3343_v29 = vld [vmem:[#allocation2 + $0xb5] sm:$0x1] }
 0x249   : > { %v6909_v35 = vpop.f32.mrf.mxu2 }
 0x24c   : > { %2866 = vrot.lane.b32.xlu1 %v2847_v53, %s5622_s25 }
 0x24e   : > { %5331 = vmatmul.msk.f32.gmra.mxu2 %vm1008_vm0, %v6456_v18  ;;  %5338 = vmatmul.msk.f32.gmra.mxu3 %vm1008_vm0, %v6372_v32  ;;  %v2385_v21 = vpop.permute.xlu1 %2384  ;;  %v2405_v36 = vpop.permute.xlu2 %2404 }
 0x24f   : > { %2705 = vst.msk [vmem:[#allocation2 + $0x128] sm:$0xff] %vm2666_vm3, %v2405_v36  ;;  %v2389_v41 = vpop.permute.xlu0 %2388  ;;  %v3247_v21 = vld [vmem:[#allocation2 + $0xb3] sm:$0x1]  ;;  %v1926_v36 = vmul.f32 %v6301_v43, %v6855_v4 }
 0x250   : > { %2697 = vst.msk [vmem:[#allocation2 + $0xe8] sm:$0xff] %vm2666_vm3, %v2389_v41  ;;  %v3407_v41 = vld [vmem:[#allocation2 + $0xb7] sm:$0x1] }
 0x251   : > { %v6931_v48 = vpop.f32.mrf.mxu2 }
 0x254   : > { %3010 = vrot.lane.b32.xlu1 %v2991_v2, %s5625_s28 }
 0x256   : > { %5332 = vmatmul.msk.f32.gmra.mxu2 %vm1008_vm0, %v6486_v50  ;;  %5339 = vmatmul.msk.f32.gmra.mxu3 %vm1008_vm0, %v6394_v17  ;;  %v2391_v37 = vpop.permute.xlu1 %2390  ;;  %v2399_v38 = vpop.permute.xlu2 %2398 }
 0x257   : > { %2698 = vst.msk [vmem:[#allocation2 + $0xf0] sm:$0xff] %vm2666_vm3, %v2391_v37  ;;  %v1931_v38 = vmul.f32 %v6680_v26, %v6864_v52 }
 0x25c   : > { %2432 = vrot.lane.b32.xlu1 %v1929_v14, %s5620_s15  ;;  %v1932_v14 = vmul.f32 %v6680_v26, %v6881_v20 }
 0x25e   : > { %5340 = vmatmul.msk.f32.gmra.mxu3 %vm1008_vm0, %v6428_v31  ;;  %5346 = vmatmul.msk.f32.vlgmr.msrb.gmra.mxu2 %vm1008_vm0, %v6516_v62  ;;  %v2403_v47 = vpop.permute.xlu1 %2402 }
 0x25f   : > { %2704 = vst.msk [vmem:[#allocation2 + $0x120] sm:$0xff] %vm2666_vm3, %v2403_v47  ;;  %v3647_v47 = vld [vmem:[#allocation2 + $0xbc] sm:$0x1] }
 0x264   : > { %3121 = vrot.lane.b32.xlu1 %v3103_v54, %s5623_s13  ;;  %v1935_v54 = vmul.f32 %v6709_v34, %v6893_v22  ;;  %v3200_v22 = vld [vmem:[#allocation2 + $0xea] sm:$0x1] }
 0x266   : > { %5341 = vmatmul.msk.f32.gmra.mxu3 %vm1008_vm0, %v6456_v18  ;;  %5347 = vmatmul.msk.f32.gmra.mxu2 %vm1008_vm0, %v6540_v6  ;;  %v2411_v55 = vpop.permute.xlu2 %2410 }
 0x267   : > { %2708 = vst.msk [vmem:[#allocation2 + $0x140] sm:$0xff] %vm2666_vm3, %v2411_v55  ;;  %v1934_v55 = vmul.f32 %v6709_v34, %v6877_v9 }
 0x26c   : > { %3265 = vrot.lane.b32.xlu1 %v3247_v21, %s5626_s26 }
 0x26e   : > { %5342 = vmatmul.msk.f32.gmra.mxu3 %vm1008_vm0, %v6486_v50  ;;  %5348 = vmatmul.msk.f32.gmra.mxu2 %vm1008_vm0, %v6372_v32  ;;  %v3246_v32 = vld [vmem:[#allocation2 + $0x7b] sm:$0x1]  ;;  %v2417_v0 = vpop.permute.xlu2 %2416 }
 0x26f   : > { %3263 = vrot.lane.b32.xlu0 %v3246_v32, %s5626_s26  ;;  %2711 = vst.msk [vmem:[#allocation2 + $0x158] sm:$0xff] %vm2666_vm3, %v2417_v0  ;;  %v1925_v32 = vmul.f32 %v6301_v43, %v6832_v23  ;;  %v3199_v23 = vld [vmem:[#allocation2 + $0xb2] sm:$0x1]  ;;  %v3551_v43 = vld [vmem:[#allocation2 + $0xba] sm:$0x1] }
 0x274   : > { %2426 = vrot.lane.b32.xlu1 %v1926_v36, %s5620_s15 }
 0x276   : > { %5349 = vmatmul.msk.f32.gmra.mxu2 %vm1008_vm0, %v6394_v17  ;;  %5356 = vmatmul.msk.f32.vlgmr.msrb.gmra.mxu3 %vm1008_vm0, %v6516_v62  ;;  %v6901_v17 = vpop.f32.mrf.mxu3  ;;  %v1927_v62 = vmul.f32 %v6680_v26, %v6783_v42  ;;  %v1928_v42 = vmul.f32 %v6680_v26, %v6809_v3  ;;  %v5519_v3 = vld [vmem:[%s8242_s6 + $0x18] sm:$0xff] }
 0x277   : > { %3518 = vrot.lane.b32.xlu0 %v3502_v28, %s5624_s16  ;;  %v6982_v28 = vpop.permute.xlu2 %2912 }
 0x278   : > { %2428 = vrot.lane.b32.xlu2 %v1927_v62, %s5620_s15  ;;  %v3295_v62 = vld [vmem:[#allocation2 + $0xb4] sm:$0x1] }
 0x27e   : > { %5350 = vmatmul.msk.f32.gmra.mxu2 %vm1008_vm0, %v6428_v31  ;;  %5357 = vmatmul.msk.f32.gmra.mxu3 %vm1008_vm0, %v6540_v6  ;;  %v5518_v31 = vld [vmem:[%s8242_s6 + $0x10] sm:$0xff]  ;;  %v6923_v6 = vpop.f32.mrf.mxu3 }
 0x27f   : > { %3662 = vrot.lane.b32.xlu0 %v3646_v58, %s5627_s7  ;;  %v1930_v58 = vmul.f32 %v6680_v26, %v6849_v30  ;;  %v6995_v37 = vpop.permute.xlu2 %3056 }
 0x280   : > { %3566 = vrot.lane.b32.xlu2 %v3550_v19, %s5626_s26  ;;  %8253 = vst [vmem:[#allocation10_spill] sm:$0xff] %v6995_v37 }
 0x286   : > { %5351 = vmatmul.msk.f32.gmra.mxu2 %vm1008_vm0, %v6456_v18  ;;  %5358 = vmatmul.msk.f32.gmra.mxu3 %vm1008_vm0, %v5518_v31  ;;  %v2401_v18 = vpop.permute.xlu0 %2400  ;;  %v6940_v59 = vpop.f32.mrf.mxu3 }
 0x287   : > { %2430 = vrot.lane.b32.xlu0 %v1928_v42, %s5620_s15  ;;  %2703 = vst.msk [vmem:[#allocation2 + $0x118] sm:$0xff] %vm2666_vm3, %v2401_v18  ;;  %v3503_v42 = vld [vmem:[#allocation2 + $0xb9] sm:$0x1]  ;;  %v7003_v30 = vpop.permute.xlu2 %3167  ;;  %v3599_v18 = vld [vmem:[#allocation2 + $0xbb] sm:$0x1] }
 0x288   : > { %2422 = vrot.lane.b32.xlu2 %v1924_v12, %s5620_s15  ;;  %3520 = vrot.lane.b32.xlu1 %v3503_v42, %s5624_s16  ;;  %v1933_v42 = vmul.f32 %v6680_v26, %v6901_v17  ;;  %v1937_v26 = vmul.f32 %v6709_v34, %v6931_v48  ;;  %v3152_v17 = vld [vmem:[#allocation2 + $0xe9] sm:$0x1] }
 0x28e   : > { %5352 = vmatmul.msk.f32.gmra.mxu2 %vm1008_vm0, %v6486_v50  ;;  %5359 = vmatmul.msk.f32.gmra.mxu3 %vm1008_vm0, %v5519_v3  ;;  %v2397_v50 = vpop.permute.xlu1 %2396  ;;  %v2395_v57 = vpop.permute.xlu0 %2394 }
 0x28f   : > { %2914 = vrot.lane.b32.xlu0 %v2895_v56, %s5624_s16  ;;  %2700 = vst.msk [vmem:[#allocation2 + $0x100] sm:$0xff] %vm2666_vm3, %v2395_v57  ;;  %v6953_v63 = vpop.f32.mrf.mxu3  ;;  %v1103_v3 = vpop.f32.mrf.mxu1  ;;  %v3759_v56 = vld [vmem:[#allocation2 + $0xbf] sm:$0x1]  ;;  %v3711_v50 = vld [vmem:[#allocation2 + $0xbe] sm:$0x1] }
 0x290   : > { %2818 = vrot.lane.b32.xlu2 %v2799_v1, %s5623_s13  ;;  %3664 = vrot.lane.b32.xlu1 %v3647_v47, %s5627_s7  ;;  %v7012_v12 = vpop.permute.xlu2 %3311  ;;  %v1056_v57 = vpop.f32.mrf.mxu0  ;;  %v1885_v0 = vmul.f32 %v6197_v45, %v1103_v3 }
 0x291   : > { %8255 = vst [vmem:[#allocation12_spill] sm:$0xff] %v7012_v12  ;;  %v1878_v1 = vmul.f32 %v6163_v40, %v1056_v57 }
 0x296   : > { %5360 = vmatmul.msk.f32.gmra.mxu3 %vm1008_vm0, %v5520_v39  ;;  %v2409_v5 = vpop.permute.xlu1 %2408  ;;  %v2407_v7 = vpop.permute.xlu0 %2406 }
 0x297   : > { %3058 = vrot.lane.b32.xlu0 %v3039_v60, %s5627_s7  ;;  %2707 = vst.msk [vmem:[#allocation2 + $0x138] sm:$0xff] %vm2666_vm3, %v2409_v5  ;;  %v6973_v51 = vpop.f32.mrf.mxu3  ;;  %v1106_v2 = vpop.f32.mrf.mxu1 }
 0x298   : > { %2706 = vst.msk [vmem:[#allocation2 + $0x130] sm:$0xff] %vm2666_vm3, %v2407_v7  ;;  %2962 = vrot.lane.b32.xlu2 %v2943_v15, %s5626_s26  ;;  %3775 = vrot.lane.b32.xlu1 %v3759_v56, %s5622_s25  ;;  %v7022_v39 = vpop.permute.xlu2 %3422  ;;  %v1886_v9 = vmul.f32 %v6197_v45, %v1106_v2  ;;  %v1059_v7 = vpop.f32.mrf.mxu0  ;;  %v2800_v45 = vld [vmem:[#allocation2 + $0xe1] sm:$0x1]  ;;  %v3296_v56 = vld [vmem:[#allocation2 + $0xec] sm:$0x1] }
 0x299   : > { %8257 = vst [vmem:[#allocation14_spill] sm:$0xff] %v7022_v39 }
 0x29e   : > { %5361 = vmatmul.msk.f32.gmra.mxu3 %vm1008_vm0, %v5521_v10  ;;  %v2415_v11 = vpop.permute.xlu1 %2414  ;;  %v6987_v61 = vpop.permute.xlu0 %2864 }
 0x29f   : > { %2424 = vrot.lane.b32.xlu0 %v1925_v32, %s5620_s15  ;;  %2710 = vst.msk [vmem:[#allocation2 + $0x150] sm:$0xff] %vm2666_vm3, %v2415_v11  ;;  %v1879_v32 = vmul.f32 %v6163_v40, %v1059_v7  ;;  %v2944_v40 = vld [vmem:[#allocation2 + $0xe4] sm:$0x1] }
 0x2a0   : > { %3217 = vrot.lane.b32.xlu2 %v3199_v23, %s5624_s16  ;;  %2330 = vrot.lane.b32.xlu1 %v1878_v1, %s5620_s15  ;;  %v2848_v23 = vld [vmem:[#allocation2 + $0xe2] sm:$0x1]  ;;  %v3408_v1 = vld [vmem:[#allocation2 + $0xef] sm:$0x1] }
 0x2a6   : > { %5362 = vmatmul.msk.f32.gmra.mxu3 %vm1008_vm0, %v5522_v24  ;;  %v6998_v31 = vpop.permute.xlu0 %3008  ;;  %v7005_v19 = vpop.permute.xlu1 %2816 }
 0x2a7   : > { %3169 = vrot.lane.b32.xlu0 %v3151_v25, %s5622_s25  ;;  %8254 = vst [vmem:[#allocation11_spill] sm:$0xff] %v6998_v31 }
 0x2a8   : > { %3361 = vrot.lane.b32.xlu2 %v3343_v29, %s5627_s7  ;;  %2438 = vrot.lane.b32.xlu1 %v1932_v14, %s5620_s15  ;;  %v2896_v29 = vld [vmem:[#allocation2 + $0xe3] sm:$0x1] }
 0x2ae   : > { %v2413_v4 = vpop.permute.xlu0 %2412  ;;  %v7018_v52 = vpop.permute.xlu1 %2960 }
 0x2af   : > { %3313 = vrot.lane.b32.xlu0 %v3295_v62, %s5625_s28  ;;  %8256 = vst [vmem:[#allocation13_spill] sm:$0xff] %v7018_v52  ;;  %v2992_v62 = vld [vmem:[#allocation2 + $0xe5] sm:$0x1] }
 0x2b0   : > { %2434 = vrot.lane.b32.xlu2 %v1930_v58, %s5620_s15  ;;  %2444 = vrot.lane.b32.xlu1 %v1935_v54, %s5620_s15  ;;  %v3712_v54 = vld [vmem:[#allocation2 + $0xf6] sm:$0x1] }
 0x2b6   : > { %v2419_v53 = vpop.permute.xlu0 %2418  ;;  %v7030_v60 = vpop.permute.xlu1 %3215 }
 0x2b7   : > { %3424 = vrot.lane.b32.xlu0 %v3407_v41, %s5623_s13  ;;  %2712 = vst.msk [vmem:[#allocation2 + $0x160] sm:$0xff] %vm2666_vm3, %v2419_v53 }
 0x2b8   : > { %3472 = vrot.lane.b32.xlu2 %v3455_v27, %s5622_s25  ;;  %2916 = vrot.lane.b32.xlu1 %v2896_v29, %s5624_s16  ;;  %v3040_v27 = vld [vmem:[#allocation2 + $0xe6] sm:$0x1]  ;;  %v3648_v29 = vld [vmem:[#allocation2 + $0xf4] sm:$0x1] }
 0x2be   : > { %v7033_v10 = vpop.permute.xlu0 %3119  ;;  %v7041_v15 = vpop.permute.xlu1 %3359 }
 0x2bf   : > { %3568 = vrot.lane.b32.xlu0 %v3551_v43, %s5626_s26  ;;  %8258 = vst [vmem:[#allocation15_spill] sm:$0xff] %v7041_v15  ;;  %v3344_v43 = vld [vmem:[#allocation2 + $0xed] sm:$0x1] }
 0x2c0   : > { %3616 = vrot.lane.b32.xlu2 %v3599_v18, %s5625_s28  ;;  %3060 = vrot.lane.b32.xlu1 %v3040_v27, %s5627_s7  ;;  %v1936_v18 = vmul.f32 %v6709_v34, %v6909_v35  ;;  %v3456_v35 = vld [vmem:[#allocation2 + $0xf0] sm:$0x1] }
 0x2c6   : > { %v2421_v20 = vpop.permute.xlu1 %2420 }
 0x2c7   : > { %2436 = vrot.lane.b32.xlu0 %v1931_v38, %s5620_s15  ;;  %2713 = vst.msk [vmem:[#allocation2 + $0x168] sm:$0xff] %vm2666_vm3, %v2421_v20 }
 0x2c8   : > { %3727 = vrot.lane.b32.xlu2 %v3711_v50, %s5623_s13  ;;  %3171 = vrot.lane.b32.xlu1 %v3152_v17, %s5622_s25  ;;  %v3104_v50 = vld [vmem:[#allocation2 + $0xe8] sm:$0x1] }
 0x2ce   : > { %v7059_v36 = vpop.permute.xlu1 %3470 }
 0x2cf   : > { %2442 = vrot.lane.b32.xlu0 %v1934_v55, %s5620_s15  ;;  %8261 = vst [vmem:[#allocation18_spill] sm:$0xff] %v7059_v36  ;;  %v3714_v36 = vld [vmem:[#allocation2 + $0x166] sm:$0x1] }
 0x2d0   : > { %2344 = vrot.lane.b32.xlu2 %v1885_v0, %s5620_s15  ;;  %3315 = vrot.lane.b32.xlu1 %v3296_v56, %s5625_s28  ;;  %v3248_v0 = vld [vmem:[#allocation2 + $0xeb] sm:$0x1] }
 0x2d2   : > { %v2429_v5 = vpop.permute.xlu2 %2428 }
 0x2d3   : > { %2717 = vst.msk [vmem:[#allocation2 + $0x188] sm:$0xff] %vm2666_vm3, %v2429_v5 }
 0x2d6   : > { %v7070_v4 = vpop.permute.xlu1 %3614 }
 0x2d7   : > { %2346 = vrot.lane.b32.xlu0 %v1886_v9, %s5620_s15  ;;  %8263 = vst [vmem:[#allocation20_spill] sm:$0xff] %v7070_v4  ;;  %v3600_v9 = vld [vmem:[#allocation2 + $0xf3] sm:$0x1]  ;;  %v2946_v4 = vld [vmem:[#allocation2 + $0x154] sm:$0x1] }
 0x2d8   : > { %2332 = vrot.lane.b32.xlu2 %v1879_v32, %s5620_s15  ;;  %3426 = vrot.lane.b32.xlu1 %v3408_v1, %s5623_s13  ;;  %v1941_v32 = vmul.f32 %v6323_v46, %v6923_v6  ;;  %v2849_v6 = vld [vmem:[#allocation2 + $0x11a] sm:$0x1]  ;;  %v2801_v1 = vld [vmem:[#allocation2 + $0x119] sm:$0x1] }
 0x2da   : > { %v7043_v11 = vpop.permute.xlu2 %3566  ;;  %v2995_v39 = vld [vmem:[#allocation2 + $0x18d] sm:$0x1] }
 0x2db   : > { %8259 = vst [vmem:[#allocation16_spill] sm:$0xff] %v7043_v11  ;;  %v3506_v11 = vld [vmem:[#allocation2 + $0x161] sm:$0x1] }
 0x2de   : > { %v7082_v3 = vpop.permute.xlu1 %2866 }
 0x2df   : > { %2820 = vrot.lane.b32.xlu0 %v2800_v45, %s5623_s13  ;;  %8265 = vst [vmem:[#allocation22_spill] sm:$0xff] %v7082_v3  ;;  %v3504_v45 = vld [vmem:[#allocation2 + $0xf1] sm:$0x1] }
 0x2e0   : > { %2868 = vrot.lane.b32.xlu2 %v2848_v23, %s5622_s25  ;;  %2456 = vrot.lane.b32.xlu1 %v1941_v32, %s5620_s15 }
 0x2e1   : > { %v7045_v24 = vpop.permute.xlu0 %3263 }
 0x2e2   : > { %v2423_v25 = vpop.permute.xlu2 %2422 }
 0x2e3   : > { %2714 = vst.msk [vmem:[#allocation2 + $0x170] sm:$0xff] %vm2666_vm3, %v2423_v25  ;;  %v3552_v25 = vld [vmem:[#allocation2 + $0xf2] sm:$0x1] }
 0x2e6   : > { %v7091_v48 = vpop.permute.xlu1 %3010 }
 0x2e7   : > { %2964 = vrot.lane.b32.xlu0 %v2944_v40, %s5626_s26  ;;  %8268 = vst [vmem:[#allocation25_spill] sm:$0xff] %v7091_v48 }
 0x2e8   : > { %3012 = vrot.lane.b32.xlu2 %v2992_v62, %s5625_s28  ;;  %3570 = vrot.lane.b32.xlu1 %v3552_v25, %s5626_s26  ;;  %v3201_v25 = vld [vmem:[#allocation2 + $0x122] sm:$0x1] }
 0x2e9   : > { %v7053_v21 = vpop.permute.xlu0 %3518 }
 0x2ea   : > { %8260 = vst [vmem:[#allocation17_spill] sm:$0xff] %v7053_v21  ;;  %v7061_v58 = vpop.permute.xlu2 %2818  ;;  %v3458_v21 = vld [vmem:[#allocation2 + $0x160] sm:$0x1] }
 0x2ee   : > { %v2433_v5 = vpop.permute.xlu1 %2432 }
 0x2ef   : > { %3219 = vrot.lane.b32.xlu0 %v3200_v22, %s5624_s16  ;;  %2719 = vst.msk [vmem:[#allocation2 + $0x198] sm:$0xff] %vm2666_vm3, %v2433_v5 }
 0x2f0   : > { %2440 = vrot.lane.b32.xlu2 %v1933_v42, %s5620_s15  ;;  %v1444_v42 = vpop.f32.mrf.mxu2 }
 0x2f1   : > { %v7063_v41 = vpop.permute.xlu0 %3662 }
 0x2f2   : > { %8262 = vst [vmem:[#allocation19_spill] sm:$0xff] %v7063_v41  ;;  %v7072_v38 = vpop.permute.xlu2 %2962 }
 0x2f3   : > { %8264 = vst [vmem:[#allocation21_spill] sm:$0xff] %v7072_v38 }
 0x2f6   : > { %v7108_v23 = vpop.permute.xlu1 %3121 }
 0x2f7   : > { %3363 = vrot.lane.b32.xlu0 %v3344_v43, %s5627_s7  ;;  %8271 = vst [vmem:[#allocation28_spill] sm:$0xff] %v7108_v23  ;;  %v1938_v43 = vmul.f32 %v6709_v34, %v1444_v42 }
 0x2f8   : > { %2446 = vrot.lane.b32.xlu2 %v1936_v18, %s5620_s15  ;;  %v2993_v18 = vld [vmem:[#allocation2 + $0x11d] sm:$0x1] }
 0x2f9   : > { %v2431_v47 = vpop.permute.xlu0 %2430  ;;  %2450 = vrot.lane.b32.xlu1 %v1938_v43, %s5620_s15 }
 0x2fa   : > { %2718 = vst.msk [vmem:[#allocation2 + $0x190] sm:$0xff] %vm2666_vm3, %v2431_v47  ;;  %v7084_v53 = vpop.permute.xlu2 %3217  ;;  %v3760_v47 = vld [vmem:[#allocation2 + $0xf7] sm:$0x1] }
 0x2fb   : > { %8266 = vst [vmem:[#allocation23_spill] sm:$0xff] %v7084_v53 }
 0x2fe   : > { %v7117_v62 = vpop.permute.xlu1 %3265 }
 0x2ff   : > { %2448 = vrot.lane.b32.xlu0 %v1937_v26, %s5620_s15  ;;  %8274 = vst [vmem:[#allocation31_spill] sm:$0xff] %v7117_v62  ;;  %v3507_v62 = vld [vmem:[#allocation2 + $0x199] sm:$0x1] }
 0x300   : > { %3123 = vrot.lane.b32.xlu2 %v3104_v50, %s5623_s13  ;;  %v1942_v50 = vmul.f32 %v6323_v46, %v6940_v59  ;;  %v3105_v59 = vld [vmem:[#allocation2 + $0x120] sm:$0x1] }
 0x301   : > { %v7086_v55 = vpop.permute.xlu0 %2914  ;;  %2822 = vrot.lane.b32.xlu1 %v2801_v1, %s5623_s13 }
 0x302   : > { %8267 = vst [vmem:[#allocation24_spill] sm:$0xff] %v7086_v55  ;;  %v7093_v57 = vpop.permute.xlu2 %3361 }
 0x303   : > { %8269 = vst [vmem:[#allocation26_spill] sm:$0xff] %v7093_v57  ;;  %v2851_v57 = vld [vmem:[#allocation2 + $0x18a] sm:$0x1] }
 0x306   : > { %v2427_v26 = vpop.permute.xlu1 %2426 }
 0x307   : > { %3474 = vrot.lane.b32.xlu0 %v3456_v35, %s5622_s25  ;;  %2716 = vst.msk [vmem:[#allocation2 + $0x180] sm:$0x1] %vm2673_vm6, %v2427_v26  ;;  %v1943_v35 = vmul.f32 %v6323_v46, %v6953_v63  ;;  %v1447_v63 = vpop.f32.mrf.mxu2 }
 0x308   : > { %3267 = vrot.lane.b32.xlu2 %v3248_v0, %s5626_s26  ;;  %v1939_v26 = vmul.f32 %v6709_v34, %v1447_v63  ;;  %v1491_v63 = vpop.f32.mrf.mxu3 }
 0x309   : > { %v7095_v2 = vpop.permute.xlu0 %3058 }
 0x30a   : > { %8270 = vst [vmem:[#allocation27_spill] sm:$0xff] %v7095_v2  ;;  %v2435_v7 = vpop.permute.xlu2 %2434 }
 0x30b   : > { %2720 = vst.msk [vmem:[#allocation2 + $0x1a0] sm:$0xff] %vm2666_vm3, %v2435_v7  ;;  %v2945_v7 = vld [vmem:[#allocation2 + $0x11c] sm:$0x1] }
 0x30c   : > { %2966 = vrot.lane.b32.xlu1 %v2945_v7, %s5626_s26 }
 0x30e   : > { %v7139_v0 = vpop.permute.xlu1 %3520 }
 0x30f   : > { %3618 = vrot.lane.b32.xlu0 %v3600_v9, %s5625_s28  ;;  %8279 = vst [vmem:[#allocation36_spill] sm:$0xff] %v7139_v0 }
 0x310   : > { %3522 = vrot.lane.b32.xlu2 %v3504_v45, %s5624_s16 }
 0x311   : > { %v2425_v14 = vpop.permute.xlu0 %2424 }
 0x312   : > { %2715 = vst.msk [vmem:[#allocation2 + $0x178] sm:$0xff] %vm2666_vm3, %v2425_v14  ;;  %v7110_v40 = vpop.permute.xlu2 %3472  ;;  %v2897_v14 = vld [vmem:[#allocation2 + $0x11b] sm:$0x1] }
 0x313   : > { %8272 = vst [vmem:[#allocation29_spill] sm:$0xff] %v7110_v40 }
 0x314   : > { %3221 = vrot.lane.b32.xlu1 %v3201_v25, %s5624_s16 }
 0x316   : > { %v7147_v32 = vpop.permute.xlu1 %3664 }
 0x317   : > { %3729 = vrot.lane.b32.xlu0 %v3712_v54, %s5623_s13  ;;  %8281 = vst [vmem:[#allocation38_spill] sm:$0xff] %v7147_v32  ;;  %v2899_v32 = vld [vmem:[#allocation2 + $0x18b] sm:$0x1] }
 0x318   : > { %3666 = vrot.lane.b32.xlu2 %v3648_v29, %s5627_s7  ;;  %v3041_v29 = vld [vmem:[#allocation2 + $0x11e] sm:$0x1] }
 0x319   : > { %v7112_v20 = vpop.permute.xlu0 %3169 }
 0x31a   : > { %8273 = vst [vmem:[#allocation30_spill] sm:$0xff] %v7112_v20  ;;  %v7119_v22 = vpop.permute.xlu2 %3616 }
 0x31b   : > { %8275 = vst [vmem:[#allocation32_spill] sm:$0xff] %v7119_v22  ;;  %v3203_v22 = vld [vmem:[#allocation2 + $0x192] sm:$0x1] }
 0x31e   : > { %v7153_v42 = vpop.permute.xlu1 %3775 }
 0x31f   : > { %2870 = vrot.lane.b32.xlu0 %v2849_v6, %s5622_s25  ;;  %v3249_v6 = vld [vmem:[#allocation2 + $0x123] sm:$0x1]  ;;  %8282 = vst [vmem:[#allocation39_spill] sm:$0xff] %v7153_v42  ;;  %v2994_v42 = vld [vmem:[#allocation2 + $0x155] sm:$0x1] }
 0x320   : > { %3777 = vrot.lane.b32.xlu2 %v3760_v47, %s5622_s25 }
 0x321   : > { %v7121_v27 = vpop.permute.xlu0 %3313 }
 0x322   : > { %8276 = vst [vmem:[#allocation33_spill] sm:$0xff] %v7121_v27  ;;  %v7127_v17 = vpop.permute.xlu2 %3727  ;;  %v3155_v27 = vld [vmem:[#allocation2 + $0x191] sm:$0x1] }
 0x323   : > { %8277 = vst [vmem:[#allocation34_spill] sm:$0xff] %v7127_v17 }
 0x326   : > { %v2331_v1 = vpop.permute.xlu1 %2330 }
 0x327   : > { %3014 = vrot.lane.b32.xlu0 %v2993_v18, %s5625_s28  ;;  %v1450_v18 = vpop.f32.mrf.mxu2  ;;  %2667 = vst.msk [vmem:[#allocation2] sm:$0xff] %vm2666_vm3, %v2331_v1 }
 0x328   : > { %2458 = vrot.lane.b32.xlu2 %v1942_v50, %s5620_s15  ;;  %v1940_v50 = vmul.f32 %v6709_v34, %v1450_v18  ;;  %v3505_v34 = vld [vmem:[#allocation2 + $0x129] sm:$0x1] }
 0x329   : > { %v7130_v56 = vpop.permute.xlu0 %3424 }
 0x32a   : > { %8278 = vst [vmem:[#allocation35_spill] sm:$0xff] %v7130_v56  ;;  %v2345_v9 = vpop.permute.xlu2 %2344 }
 0x32b   : > { %2675 = vst.msk [vmem:[#allocation2 + $0x38] sm:$0xff] %vm2666_vm3, %v2345_v9 }
 0x32e   : > { %v2988_v40 = vld [vmem:[#allocation2 + $0x5] sm:$0x1] }
 0x32f   : > { %2460 = vrot.lane.b32.xlu0 %v1943_v35, %s5620_s15  ;;  %v3345_v35 = vld [vmem:[#allocation2 + $0x125] sm:$0x1] }
 0x330   : > { %2918 = vrot.lane.b32.xlu2 %v2897_v14, %s5624_s16  ;;  %3365 = vrot.lane.b32.xlu1 %v3345_v35, %s5627_s7  ;;  %v1944_v14 = vmul.f32 %v6323_v46, %v6973_v51  ;;  %v3649_v51 = vld [vmem:[#allocation2 + $0x12c] sm:$0x1]  ;;  %v1494_v35 = vpop.f32.mrf.mxu3 }
 0x331   : > { %v7142_v5 = vpop.permute.xlu0 %3568  ;;  %v1946_v1 = vmul.f32 %v6323_v46, %v1494_v35 }
 0x332   : > { %8280 = vst [vmem:[#allocation37_spill] sm:$0xff] %v7142_v5  ;;  %v2333_v45 = vpop.permute.xlu2 %2332 }
 0x333   : > { %v2439_v45 = vpop.permute.xlu1 %2438 }
 0x334   : > { %2722 = vst.msk [vmem:[#allocation2 + $0x1b0] sm:$0xff] %vm2666_vm3, %v2439_v45 }
 0x337   : > { %3125 = vrot.lane.b32.xlu0 %v3105_v59, %s5623_s13  ;;  %v3153_v59 = vld [vmem:[#allocation2 + $0x121] sm:$0x1] }
 0x338   : > { %3062 = vrot.lane.b32.xlu2 %v3041_v29, %s5627_s7  ;;  %2462 = vrot.lane.b32.xlu1 %v1944_v14, %s5620_s15  ;;  %v3457_v29 = vld [vmem:[#allocation2 + $0x128] sm:$0x1]  ;;  %v3409_v14 = vld [vmem:[#allocation2 + $0x127] sm:$0x1] }
 0x339   : > { %v2437_v54 = vpop.permute.xlu0 %2436 }
 0x33a   : > { %2721 = vst.msk [vmem:[#allocation2 + $0x1a8] sm:$0xff] %vm2666_vm3, %v2437_v54  ;;  %v7155_v43 = vpop.permute.xlu2 %2868 }
 0x33b   : > { %v2445_v18 = vpop.permute.xlu1 %2444 }
 0x33c   : > { %2725 = vst.msk [vmem:[#allocation2 + $0x1c8] sm:$0xff] %vm2666_vm3, %v2445_v18 }
 0x33f   : > { %3269 = vrot.lane.b32.xlu0 %v3249_v6, %s5626_s26  ;;  %v3297_v6 = vld [vmem:[#allocation2 + $0x124] sm:$0x1] }
 0x340   : > { %2452 = vrot.lane.b32.xlu2 %v1939_v26, %s5620_s15  ;;  %3476 = vrot.lane.b32.xlu1 %v3457_v29, %s5622_s25 }
 0x341   : > { %v2443_v47 = vpop.permute.xlu0 %2442 }
 0x342   : > { %2724 = vst.msk [vmem:[#allocation2 + $0x1c0] sm:$0xff] %vm2666_vm3, %v2443_v47  ;;  %v7163_v9 = vpop.permute.xlu2 %3012  ;;  %v1526_v47 = vpop.f32.mrf.mxu2 }
 0x343   : > { %v3300_v20 = vld [vmem:[#allocation2 + $0x1cc] sm:$0x1] }
 0x347   : > { %2454 = vrot.lane.b32.xlu0 %v1940_v50, %s5620_s15 }
 0x348   : > { %3173 = vrot.lane.b32.xlu2 %v3153_v59, %s5622_s25  ;;  %v7187_v59 = vpop.permute.xlu1 %2916 }
 0x349   : > { %v2347_v7 = vpop.permute.xlu0 %2346 }
 0x34a   : > { %2676 = vst.msk [vmem:[#allocation2 + $0x40] sm:$0xff] %vm2666_vm3, %v2347_v7  ;;  %v2441_v54 = vpop.permute.xlu2 %2440  ;;  %v3601_v7 = vld [vmem:[#allocation2 + $0x12b] sm:$0x1] }
 0x34b   : > { %2723 = vst.msk [vmem:[#allocation2 + $0x1b8] sm:$0x1] %vm2673_vm6, %v2441_v54  ;;  %3620 = vrot.lane.b32.xlu1 %v3601_v7, %s5625_s28  ;;  %v1529_v54 = vpop.f32.mrf.mxu2  ;;  %v2850_v7 = vld [vmem:[#allocation2 + $0x152] sm:$0x1] }
 0x34c   : > { %v1949_v29 = vmul.f32 %v6703_v33, %v1529_v54 }
 0x34f   : > { %3524 = vrot.lane.b32.xlu0 %v3505_v34, %s5624_s16 }
 0x350   : > { %3317 = vrot.lane.b32.xlu2 %v3297_v6, %s5625_s28  ;;  %v3713_v6 = vld [vmem:[#allocation2 + $0x12e] sm:$0x1]  ;;  %v7197_v18 = vpop.permute.xlu1 %3060 }
 0x351   : > { %v7173_v25 = vpop.permute.xlu0 %2820  ;;  %v3245_v37 = vld [vmem:[#allocation2 + $0x43] sm:$0x1] }
 0x352   : > { %v2447_v26 = vpop.permute.xlu2 %2446 }
 0x353   : > { %2726 = vst.msk [vmem:[#allocation2 + $0x1d0] sm:$0xff] %vm2666_vm3, %v2447_v26  ;;  %3731 = vrot.lane.b32.xlu1 %v3713_v6, %s5623_s13 }
 0x357   : > { %3668 = vrot.lane.b32.xlu0 %v3649_v51, %s5627_s7  ;;  %v3553_v51 = vld [vmem:[#allocation2 + $0x12a] sm:$0x1] }
 0x358   : > { %3428 = vrot.lane.b32.xlu2 %v3409_v14, %s5623_s13  ;;  %v2898_v14 = vld [vmem:[#allocation2 + $0x153] sm:$0x1]  ;;  %v7207_v54 = vpop.permute.xlu1 %3171 }
 0x359   : > { %v7180_v50 = vpop.permute.xlu0 %2964  ;;  %8287 = vst [vmem:[#allocation44_spill] sm:$0xff] %v7207_v54 }
 0x35a   : > { %v7189_v34 = vpop.permute.xlu2 %3123 }
 0x35b   : > { %8283 = vst [vmem:[#allocation40_spill] sm:$0xff] %v7189_v34  ;;  %2872 = vrot.lane.b32.xlu1 %v2850_v7, %s5622_s25 }
 0x35f   : > { %2466 = vrot.lane.b32.xlu0 %v1946_v1, %s5620_s15  ;;  %v1945_v1 = vmul.f32 %v6323_v46, %v1491_v63  ;;  %v3042_v63 = vld [vmem:[#allocation2 + $0x156] sm:$0x1] }
 0x360   : > { %3572 = vrot.lane.b32.xlu2 %v3553_v51, %s5626_s26  ;;  %v1948_v51 = vmul.f32 %v6703_v33, %v1526_v47 }
 0x361   : > { %v7191_v45 = vpop.permute.xlu0 %3219 }
 0x362   : > { %8284 = vst [vmem:[#allocation41_spill] sm:$0xff] %v7191_v45  ;;  %v7199_v26 = vpop.permute.xlu2 %3267 }
 0x363   : > { %8285 = vst [vmem:[#allocation42_spill] sm:$0xff] %v7199_v26  ;;  %3016 = vrot.lane.b32.xlu1 %v2994_v42, %s5625_s28  ;;  %v3154_v42 = vld [vmem:[#allocation2 + $0x159] sm:$0x1] }
 0x367   : > { %2472 = vrot.lane.b32.xlu0 %v1949_v29, %s5620_s15 }
 0x368   : > { %2464 = vrot.lane.b32.xlu2 %v1945_v1, %s5620_s15  ;;  %v7216_v1 = vpop.permute.xlu1 %3315 }
 0x369   : > { %v7201_v35 = vpop.permute.xlu0 %3363  ;;  %8289 = vst [vmem:[#allocation46_spill] sm:$0xff] %v7216_v1  ;;  %v3043_v1 = vld [vmem:[#allocation2 + $0x18e] sm:$0x1] }
 0x36a   : > { %8286 = vst [vmem:[#allocation43_spill] sm:$0xff] %v7201_v35  ;;  %v7209_v6 = vpop.permute.xlu2 %3522 }
 0x36b   : > { %8288 = vst [vmem:[#allocation45_spill] sm:$0xff] %v7209_v6 }
 0x36f   : > { %2920 = vrot.lane.b32.xlu0 %v2898_v14, %s5624_s16  ;;  %v1497_v14 = vpop.f32.mrf.mxu3 }
 0x370   : > { %2470 = vrot.lane.b32.xlu2 %v1948_v51, %s5620_s15  ;;  %v1947_v41 = vmul.f32 %v6323_v46, %v1497_v14  ;;  %v7226_v47 = vpop.permute.xlu1 %3426  ;;  %v3298_v46 = vld [vmem:[#allocation2 + $0x15c] sm:$0x1] }
 0x371   : > { %v2449_v29 = vpop.permute.xlu0 %2448  ;;  %8292 = vst [vmem:[#allocation49_spill] sm:$0xff] %v7226_v47 }
 0x372   : > { %2727 = vst.msk [vmem:[#allocation2 + $0x1d8] sm:$0xff] %vm2666_vm3, %v2449_v29  ;;  %v7218_v7 = vpop.permute.xlu2 %3666  ;;  %v2802_v29 = vld [vmem:[#allocation2 + $0x151] sm:$0x1]  ;;  %2468 = vrot.lane.b32.xlu1 %v1947_v41, %s5620_s15 }
 0x373   : > { %8290 = vst [vmem:[#allocation47_spill] sm:$0xff] %v7218_v7 }
 0x377   : > { %3064 = vrot.lane.b32.xlu0 %v3042_v63, %s5627_s7  ;;  %v1532_v63 = vpop.f32.mrf.mxu2 }
 0x378   : > { %2824 = vrot.lane.b32.xlu2 %v2802_v29, %s5623_s13  ;;  %v1950_v7 = vmul.f32 %v6703_v33, %v1532_v63  ;;  %v2457_v41 = vpop.permute.xlu1 %2456  ;;  %v3410_v63 = vld [vmem:[#allocation2 + $0x15f] sm:$0x1] }
 0x379   : > { %v7220_v17 = vpop.permute.xlu0 %3474  ;;  %v1573_v41 = vpop.f32.mrf.mxu3 }
 0x37a   : > { %8291 = vst [vmem:[#allocation48_spill] sm:$0xff] %v7220_v17  ;;  %v7228_v51 = vpop.permute.xlu2 %3777  ;;  %2474 = vrot.lane.b32.xlu1 %v1950_v7, %s5620_s15 }
 0x37b   : > { %8293 = vst [vmem:[#allocation50_spill] sm:$0xff] %v7228_v51  ;;  %v3202_v51 = vld [vmem:[#allocation2 + $0x15a] sm:$0x1] }
 0x37f   : > { %3175 = vrot.lane.b32.xlu0 %v3154_v42, %s5622_s25  ;;  %v3106_v42 = vld [vmem:[#allocation2 + $0x158] sm:$0x1] }
 0x380   : > { %2968 = vrot.lane.b32.xlu2 %v2946_v4, %s5626_s26  ;;  %v7242_v7 = vpop.permute.xlu1 %3570 }
 0x381   : > { %v7230_v6 = vpop.permute.xlu0 %3618  ;;  %8296 = vst [vmem:[#allocation53_spill] sm:$0xff] %v7242_v7 }
 0x382   : > { %8294 = vst [vmem:[#allocation51_spill] sm:$0xff] %v7230_v6  ;;  %v2459_v14 = vpop.permute.xlu2 %2458  ;;  %3127 = vrot.lane.b32.xlu1 %v3106_v42, %s5623_s13  ;;  %v1955_v6 = vmul.f32 %v6737_v49, %v1573_v41  ;;  %v1535_v42 = vpop.f32.mrf.mxu2 }
 0x383   : > { %2732 = vst.msk [vmem:[#allocation2 + $0x200] sm:$0xff] %vm2666_vm3, %v2459_v14  ;;  %v3346_v14 = vld [vmem:[#allocation2 + $0x15d] sm:$0x1]  ;;  %v1951_v17 = vmul.f32 %v6703_v33, %v1535_v42  ;;  %v3650_v42 = vld [vmem:[#allocation2 + $0x164] sm:$0x1] }
 0x387   : > { %3319 = vrot.lane.b32.xlu0 %v3298_v46, %s5625_s28 }
 0x388   : > { %3223 = vrot.lane.b32.xlu2 %v3202_v51, %s5624_s16  ;;  %v2451_v51 = vpop.permute.xlu1 %2450 }
 0x389   : > { %v7236_v29 = vpop.permute.xlu0 %3729  ;;  %2728 = vst.msk [vmem:[#allocation2 + $0x1e0] sm:$0xff] %vm2666_vm3, %v2451_v51 }
 0x38a   : > { %8295 = vst [vmem:[#allocation52_spill] sm:$0xff] %v7236_v29  ;;  %v7244_v4 = vpop.permute.xlu2 %2918  ;;  %v3250_v29 = vld [vmem:[#allocation2 + $0x15b] sm:$0x1]  ;;  %v1538_v47 = vpop.f32.mrf.mxu2 }
 0x38b   : > { %3271 = vrot.lane.b32.xlu1 %v3250_v29, %s5626_s26  ;;  %v3554_v29 = vld [vmem:[#allocation2 + $0x162] sm:$0x1]  ;;  %v1952_v51 = vmul.f32 %v6703_v33, %v1538_v47  ;;  %v2803_v47 = vld [vmem:[#allocation2 + $0x189] sm:$0x1] }
 0x38f   : > { %3430 = vrot.lane.b32.xlu0 %v3410_v63, %s5623_s13 }
 0x390   : > { %3367 = vrot.lane.b32.xlu2 %v3346_v14, %s5627_s7  ;;  %v7261_v41 = vpop.permute.xlu1 %2822 }
 0x391   : > { %v7246_v46 = vpop.permute.xlu0 %2870 }
 0x392   : > { %v7252_v63 = vpop.permute.xlu2 %3062 }
 0x393   : > { %3526 = vrot.lane.b32.xlu1 %v3506_v11, %s5624_s16 }
 0x397   : > { %2484 = vrot.lane.b32.xlu0 %v1955_v6, %s5620_s15 }
 0x398   : > { %2476 = vrot.lane.b32.xlu2 %v1951_v17, %s5620_s15  ;;  %v7269_v11 = vpop.permute.xlu1 %2966 }
 0x399   : > { %v7255_v7 = vpop.permute.xlu0 %3014 }
 0x39a   : > { %v2453_v6 = vpop.permute.xlu2 %2452 }
 0x39b   : > { %2729 = vst.msk [vmem:[#allocation2 + $0x1e8] sm:$0xff] %vm2666_vm3, %v2453_v6  ;;  %3670 = vrot.lane.b32.xlu1 %v3650_v42, %s5627_s7 }
 0x39f   : > { %3574 = vrot.lane.b32.xlu0 %v3554_v29, %s5626_s26  ;;  %v1576_v29 = vpop.f32.mrf.mxu3 }
 0x3a0   : > { %3478 = vrot.lane.b32.xlu2 %v3458_v21, %s5622_s25  ;;  %v1956_v35 = vmul.f32 %v6737_v49, %v1576_v29  ;;  %v7279_v21 = vpop.permute.xlu1 %3221  ;;  %v2947_v29 = vld [vmem:[#allocation2 + $0x18c] sm:$0x1] }
 0x3a1   : > { %v2461_v14 = vpop.permute.xlu0 %2460  ;;  %8299 = vst [vmem:[#allocation56_spill] sm:$0xff] %v7279_v21  ;;  %v3101_v21 = vld [vmem:[#allocation2 + $0x40] sm:$0x1] }
 0x3a2   : > { %2733 = vst.msk [vmem:[#allocation2 + $0x208] sm:$0xff] %vm2666_vm3, %v2461_v14  ;;  %v7271_v17 = vpop.permute.xlu2 %3173  ;;  %v3602_v14 = vld [vmem:[#allocation2 + $0x163] sm:$0x1] }
 0x3a3   : > { %8297 = vst [vmem:[#allocation54_spill] sm:$0xff] %v7271_v17  ;;  %2486 = vrot.lane.b32.xlu1 %v1956_v35, %s5620_s15 }
 0x3a7   : > { %2478 = vrot.lane.b32.xlu0 %v1952_v51, %s5620_s15 }
 0x3a8   : > { %3622 = vrot.lane.b32.xlu2 %v3602_v14, %s5625_s28  ;;  %v7288_v35 = vpop.permute.xlu1 %3365 }
 0x3a9   : > { %v7273_v6 = vpop.permute.xlu0 %3125  ;;  %8302 = vst [vmem:[#allocation59_spill] sm:$0xff] %v7288_v35  ;;  %v3651_v35 = vld [vmem:[#allocation2 + $0x19c] sm:$0x1]  ;;  %v3509_v38 = vld [vmem:[#allocation2 + $0x209] sm:$0x1] }
 0x3aa   : > { %8298 = vst [vmem:[#allocation55_spill] sm:$0xff] %v7273_v6  ;;  %v7281_v51 = vpop.permute.xlu2 %3317  ;;  %v3461_v15 = vld [vmem:[#allocation2 + $0x208] sm:$0x1]  ;;  %v3605_v31 = vld [vmem:[#allocation2 + $0x20b] sm:$0x1] }
 0x3ab   : > { %8300 = vst [vmem:[#allocation57_spill] sm:$0xff] %v7281_v51  ;;  %2922 = vrot.lane.b32.xlu1 %v2899_v32, %s5624_s16  ;;  %v1579_v32 = vpop.f32.mrf.mxu3 }
 0x3af   : > { %2826 = vrot.lane.b32.xlu0 %v2803_v47, %s5623_s13 }
 0x3b0   : > { %3733 = vrot.lane.b32.xlu2 %v3714_v36, %s5623_s13  ;;  %v2463_v36 = vpop.permute.xlu1 %2462 }
 0x3b1   : > { %v7283_v42 = vpop.permute.xlu0 %3269  ;;  %2734 = vst.msk [vmem:[#allocation2 + $0x210] sm:$0xff] %vm2666_vm3, %v2463_v36 }
 0x3b2   : > { %8301 = vst [vmem:[#allocation58_spill] sm:$0xff] %v7283_v42  ;;  %v7290_v14 = vpop.permute.xlu2 %3428  ;;  %v3412_v42 = vld [vmem:[#allocation2 + $0x1cf] sm:$0x1] }
 0x3b3   : > { %8303 = vst [vmem:[#allocation60_spill] sm:$0xff] %v7290_v14  ;;  %3066 = vrot.lane.b32.xlu1 %v3043_v1, %s5627_s7  ;;  %v1582_v36 = vpop.f32.mrf.mxu3 }
 0x3b7   : > { %2970 = vrot.lane.b32.xlu0 %v2947_v29, %s5626_s26  ;;  %v1541_v29 = vpop.f32.mrf.mxu2 }
 0x3b8   : > { %2874 = vrot.lane.b32.xlu2 %v2851_v57, %s5622_s25  ;;  %v3347_v57 = vld [vmem:[#allocation2 + $0x195] sm:$0x1]  ;;  %v7305_v1 = vpop.permute.xlu1 %3476 }
 0x3b9   : > { %v2455_v47 = vpop.permute.xlu0 %2454  ;;  %8306 = vst [vmem:[#allocation63_spill] sm:$0xff] %v7305_v1  ;;  %v3555_v1 = vld [vmem:[#allocation2 + $0x19a] sm:$0x1] }
 0x3ba   : > { %2730 = vst.msk [vmem:[#allocation2 + $0x1f0] sm:$0x1] %vm2673_vm6, %v2455_v47  ;;  %v7296_v26 = vpop.permute.xlu2 %3572  ;;  %v1953_v47 = vmul.f32 %v6703_v33, %v1541_v29  ;;  %v1958_v29 = vmul.f32 %v6737_v49, %v1582_v36 }
 0x3bb   : > { %8304 = vst [vmem:[#allocation61_spill] sm:$0xff] %v7296_v26 }
 0x3bc   : > { %2480 = vrot.lane.b32.xlu1 %v1953_v47, %s5620_s15 }
 0x3bf   : > { %3225 = vrot.lane.b32.xlu0 %v3203_v22, %s5624_s16 }
 0x3c0   : > { %3018 = vrot.lane.b32.xlu2 %v2995_v39, %s5625_s28  ;;  %v7315_v39 = vpop.permute.xlu1 %3620 }
 0x3c1   : > { %v7299_v14 = vpop.permute.xlu0 %3524  ;;  %8308 = vst [vmem:[#allocation65_spill] sm:$0xff] %v7315_v39  ;;  %v3251_v39 = vld [vmem:[#allocation2 + $0x193] sm:$0x1] }
 0x3c2   : > { %8305 = vst [vmem:[#allocation62_spill] sm:$0xff] %v7299_v14  ;;  %v2465_v22 = vpop.permute.xlu2 %2464  ;;  %v1957_v14 = vmul.f32 %v6737_v49, %v1579_v32  ;;  %v3459_v32 = vld [vmem:[#allocation2 + $0x198] sm:$0x1] }
 0x3c3   : > { %2735 = vst.msk [vmem:[#allocation2 + $0x218] sm:$0xff] %vm2666_vm3, %v2465_v22  ;;  %v3299_v22 = vld [vmem:[#allocation2 + $0x194] sm:$0x1] }
 0x3c4   : > { %3177 = vrot.lane.b32.xlu1 %v3155_v27, %s5622_s25 }
 0x3c7   : > { %3369 = vrot.lane.b32.xlu0 %v3347_v57, %s5627_s7 }
 0x3c8   : > { %2488 = vrot.lane.b32.xlu2 %v1957_v14, %s5620_s15  ;;  %v7321_v27 = vpop.permute.xlu1 %3731 }
 0x3c9   : > { %v7308_v26 = vpop.permute.xlu0 %3668  ;;  %8309 = vst [vmem:[#allocation66_spill] sm:$0xff] %v7321_v27 }
 0x3ca   : > { %8307 = vst [vmem:[#allocation64_spill] sm:$0xff] %v7308_v26  ;;  %v2471_v47 = vpop.permute.xlu2 %2470  ;;  %v3107_v26 = vld [vmem:[#allocation2 + $0x190] sm:$0x1] }
 0x3cb   : > { %v3603_v47 = vld [vmem:[#allocation2 + $0x19b] sm:$0x1] }
 0x3cc   : > { %3321 = vrot.lane.b32.xlu1 %v3299_v22, %s5625_s28  ;;  %v1544_v22 = vpop.f32.mrf.mxu2 }
 0x3cd   : > { %v1954_v27 = vmul.f32 %v6703_v33, %v1544_v22  ;;  %v2797_v33 = vld [vmem:[#allocation2 + $0x39] sm:$0x1] }
 0x3cf   : > { %2490 = vrot.lane.b32.xlu0 %v1958_v29, %s5620_s15  ;;  %v3411_v29 = vld [vmem:[#allocation2 + $0x197] sm:$0x1] }
 0x3d0   : > { %3129 = vrot.lane.b32.xlu2 %v3107_v26, %s5623_s13 }
 0x3d1   : > { %v2467_v57 = vpop.permute.xlu0 %2466 }
 0x3d2   : > { %2736 = vst.msk [vmem:[#allocation2 + $0x220] sm:$0xff] %vm2666_vm3, %v2467_v57  ;;  %v7323_v14 = vpop.permute.xlu2 %2824  ;;  %v7328_v57 = vpop.permute.xlu1 %2872 }
 0x3d4   : > { %3432 = vrot.lane.b32.xlu1 %v3411_v29, %s5623_s13  ;;  %v1620_v22 = vpop.f32.mrf.mxu2 }
 0x3d5   : > { %v1962_v0 = vmul.f32 %v6357_v8, %v1620_v22  ;;  %v2844_v22 = vld [vmem:[#allocation2 + $0x2] sm:$0x1] }
 0x3d7   : > { %3480 = vrot.lane.b32.xlu0 %v3459_v32, %s5622_s25 }
 0x3d8   : > { %3273 = vrot.lane.b32.xlu2 %v3251_v39, %s5626_s26 }
 0x3d9   : > { %v2473_v36 = vpop.permute.xlu0 %2472 }
 0x3da   : > { %v7330_v26 = vpop.permute.xlu2 %2968  ;;  %v3715_v36 = vld [vmem:[#allocation2 + $0x19e] sm:$0x1]  ;;  %v7338_v39 = vpop.permute.xlu1 %3016 }
 0x3dc   : > { %3576 = vrot.lane.b32.xlu1 %v3555_v1, %s5626_s26  ;;  %v1623_v54 = vpop.f32.mrf.mxu2 }
 0x3dd   : > { %v1963_v53 = vmul.f32 %v6357_v8, %v1623_v54 }
 0x3df   : > { %3624 = vrot.lane.b32.xlu0 %v3603_v47, %s5625_s28  ;;  %v1585_v47 = vpop.f32.mrf.mxu3 }
 0x3e0   : > { %2482 = vrot.lane.b32.xlu2 %v1954_v27, %s5620_s15  ;;  %v1959_v45 = vmul.f32 %v6737_v49, %v1585_v47 }
 0x3e1   : > { %v7332_v32 = vpop.permute.xlu0 %2920 }
 0x3e2   : > { %v7340_v29 = vpop.permute.xlu2 %3223 }
 0x3e3   : > { %8310 = vst [vmem:[#allocation67_spill] sm:$0xff] %v7340_v29  ;;  %v3460_v29 = vld [vmem:[#allocation2 + $0x1d0] sm:$0x1] }
 0x3e4   : > { %2492 = vrot.lane.b32.xlu1 %v1959_v45, %s5620_s15  ;;  %v2469_v1 = vpop.permute.xlu1 %2468  ;;  %v2892_v45 = vld [vmem:[#allocation2 + $0x3] sm:$0x1] }
 0x3e5   : > { %2737 = vst.msk [vmem:[#allocation2 + $0x228] sm:$0x1] %vm2673_vm6, %v2469_v1 }
 0x3e7   : > { %3735 = vrot.lane.b32.xlu0 %v3715_v36, %s5623_s13 }
 0x3e8   : > { %3528 = vrot.lane.b32.xlu2 %v3507_v62, %s5624_s16 }
 0x3e9   : > { %v7342_v5 = vpop.permute.xlu0 %3064 }
 0x3ea   : > { %v7348_v27 = vpop.permute.xlu2 %3367 }
 0x3eb   : > { %8311 = vst [vmem:[#allocation68_spill] sm:$0xff] %v7348_v27 }
 0x3ec   : > { %2498 = vrot.lane.b32.xlu1 %v1962_v0, %s5620_s15  ;;  %v2475_v62 = vpop.permute.xlu1 %2474  ;;  %v2941_v0 = vld [vmem:[#allocation2 + $0x3c] sm:$0x1] }
 0x3ed   : > { %2740 = vst.msk [vmem:[#allocation2 + $0x240] sm:$0xff] %vm2666_vm3, %v2475_v62 }
 0x3ef   : > { %2814 = vrot.lane.b32.xlu0 %v2797_v33, %s5623_s13  ;;  %v1588_v33 = vpop.f32.mrf.mxu3 }
 0x3f0   : > { %3672 = vrot.lane.b32.xlu2 %v3651_v35, %s5627_s7  ;;  %v1960_v1 = vmul.f32 %v6737_v49, %v1588_v33  ;;  %v3036_v33 = vld [vmem:[#allocation2 + $0x6] sm:$0x1] }
 0x3f1   : > { %v7351_v36 = vpop.permute.xlu0 %3175 }
 0x3f2   : > { %8312 = vst [vmem:[#allocation69_spill] sm:$0xff] %v7351_v36  ;;  %v2477_v47 = vpop.permute.xlu2 %2476 }
 0x3f3   : > { %2741 = vst.msk [vmem:[#allocation2 + $0x248] sm:$0xff] %vm2666_vm3, %v2477_v47  ;;  %v2893_v47 = vld [vmem:[#allocation2 + $0x3b] sm:$0x1] }
 0x3f4   : > { %2860 = vrot.lane.b32.xlu1 %v2844_v22, %s5622_s25  ;;  %v7365_v35 = vpop.permute.xlu1 %3127 }
 0x3f5   : > { %8314 = vst [vmem:[#allocation71_spill] sm:$0xff] %v7365_v35 }
 0x3f7   : > { %2908 = vrot.lane.b32.xlu0 %v2892_v45, %s5624_s16  ;;  %v1591_v34 = vpop.f32.mrf.mxu3 }
 0x3f8   : > { %2494 = vrot.lane.b32.xlu2 %v1960_v1, %s5620_s15 }
 0x3f9   : > { %v7358_v27 = vpop.permute.xlu0 %3319 }
 0x3fa   : > { %8313 = vst [vmem:[#allocation70_spill] sm:$0xff] %v7358_v27  ;;  %v7367_v45 = vpop.permute.xlu2 %3478  ;;  %v2845_v27 = vld [vmem:[#allocation2 + $0x3a] sm:$0x1] }
 0x3fb   : > { %8315 = vst [vmem:[#allocation72_spill] sm:$0xff] %v7367_v45  ;;  %v1961_v45 = vmul.f32 %v6737_v49, %v1591_v34 }
 0x3fc   : > { %2910 = vrot.lane.b32.xlu1 %v2893_v47, %s5624_s16 }
 0x3fd   : > { %v7375_v1 = vpop.permute.xlu1 %3271 }
 0x3fe   : > { %8317 = vst [vmem:[#allocation74_spill] sm:$0xff] %v7375_v1 }
 0x3ff   : > { %2958 = vrot.lane.b32.xlu0 %v2941_v0, %s5626_s26 }
 0x400   : > { %2500 = vrot.lane.b32.xlu2 %v1963_v53, %s5620_s15 }
 0x401   : > { %v7369_v62 = vpop.permute.xlu0 %3430 }
 0x402   : > { %8316 = vst [vmem:[#allocation73_spill] sm:$0xff] %v7369_v62  ;;  %v7377_v22 = vpop.permute.xlu2 %3622  ;;  %v2796_v62 = vld [vmem:[#allocation2 + $0x1] sm:$0x1] }
 0x403   : > { %8318 = vst [vmem:[#allocation75_spill] sm:$0xff] %v7377_v22  ;;  %v3037_v22 = vld [vmem:[#allocation2 + $0x3e] sm:$0x1] }
 0x404   : > { %3004 = vrot.lane.b32.xlu1 %v2988_v40, %s5625_s28 }
 0x405   : > { %v7383_v53 = vpop.permute.xlu1 %3526 }
 0x406   : > { %8319 = vst [vmem:[#allocation76_spill] sm:$0xff] %v7383_v53  ;;  %v3197_v53 = vld [vmem:[#allocation2 + $0x42] sm:$0x1] }
 0x407   : > { %3052 = vrot.lane.b32.xlu0 %v3036_v33, %s5627_s7  ;;  %v1626_v33 = vpop.f32.mrf.mxu2 }
 0x408   : > { %2812 = vrot.lane.b32.xlu2 %v2796_v62, %s5623_s13  ;;  %v2940_v62 = vld [vmem:[#allocation2 + $0x4] sm:$0x1] }
 0x409   : > { %v2485_v0 = vpop.permute.xlu0 %2484 }
 0x40a   : > { %v7385_v54 = vpop.permute.xlu2 %3733  ;;  %v1964_v0 = vmul.f32 %v6357_v8, %v1626_v33  ;;  %v3108_v33 = vld [vmem:[#allocation2 + $0x1c8] sm:$0x1] }
 0x40b   : > { %8320 = vst [vmem:[#allocation77_spill] sm:$0xff] %v7385_v54  ;;  %v3348_v54 = vld [vmem:[#allocation2 + $0x1cd] sm:$0x1] }
 0x40c   : > { %3054 = vrot.lane.b32.xlu1 %v3037_v22, %s5627_s7 }
 0x40d   : > { %v7393_v49 = vpop.permute.xlu1 %3670 }
 0x40e   : > { %8322 = vst [vmem:[#allocation79_spill] sm:$0xff] %v7393_v49  ;;  %v2989_v49 = vld [vmem:[#allocation2 + $0x3d] sm:$0x1] }
 0x40f   : > { %2496 = vrot.lane.b32.xlu0 %v1961_v45, %s5620_s15  ;;  %v3204_v45 = vld [vmem:[#allocation2 + $0x1ca] sm:$0x1]  ;;  %v1629_v23 = vpop.f32.mrf.mxu2 }
 0x410   : > { %2862 = vrot.lane.b32.xlu2 %v2845_v27, %s5622_s25  ;;  %v1965_v1 = vmul.f32 %v6357_v8, %v1629_v23  ;;  %v3652_v23 = vld [vmem:[#allocation2 + $0x1d4] sm:$0x1] }
 0x411   : > { %v7387_v47 = vpop.permute.xlu0 %3574 }
 0x412   : > { %8321 = vst [vmem:[#allocation78_spill] sm:$0xff] %v7387_v47  ;;  %v7395_v40 = vpop.permute.xlu2 %2874 }
 0x414   : > { %3227 = vrot.lane.b32.xlu1 %v3204_v45, %s5624_s16 }
 0x415   : > { %v2487_v22 = vpop.permute.xlu1 %2486 }
 0x416   : > { %v3156_v22 = vld [vmem:[#allocation2 + $0x1c9] sm:$0x1] }
 0x417   : > { %2502 = vrot.lane.b32.xlu0 %v1964_v0, %s5620_s15 }
 0x418   : > { %2956 = vrot.lane.b32.xlu2 %v2940_v62, %s5626_s26 }
 0x419   : > { %v2479_v34 = vpop.permute.xlu0 %2478 }
 0x41a   : > { %2742 = vst.msk [vmem:[#allocation2 + $0x250] sm:$0xff] %vm2666_vm3, %v2479_v34  ;;  %v7401_v27 = vpop.permute.xlu2 %3018  ;;  %v3252_v34 = vld [vmem:[#allocation2 + $0x1cb] sm:$0x1] }
 0x41c   : > { %3371 = vrot.lane.b32.xlu1 %v3348_v54, %s5627_s7 }
 0x41d   : > { %v7408_v45 = vpop.permute.xlu1 %2922 }
 0x41f   : > { %3131 = vrot.lane.b32.xlu0 %v3108_v33, %s5623_s13  ;;  %v3149_v33 = vld [vmem:[#allocation2 + $0x41] sm:$0x1] }
 0x420   : > { %3006 = vrot.lane.b32.xlu2 %v2989_v49, %s5625_s28 }
 0x421   : > { %v7403_v0 = vpop.permute.xlu0 %2826 }
 0x422   : > { %v2489_v62 = vpop.permute.xlu2 %2488 }
 0x423   : > { %v3341_v62 = vld [vmem:[#allocation2 + $0x45] sm:$0x1] }
 0x424   : > { %3165 = vrot.lane.b32.xlu1 %v3149_v33, %s5622_s25 }
 0x425   : > { %v7415_v54 = vpop.permute.xlu1 %3066 }
 0x427   : > { %3275 = vrot.lane.b32.xlu0 %v3252_v34, %s5626_s26  ;;  %v3293_v34 = vld [vmem:[#allocation2 + $0x44] sm:$0x1] }
 0x428   : > { %3179 = vrot.lane.b32.xlu2 %v3156_v22, %s5622_s25 }
 0x429   : > { %v7410_v47 = vpop.permute.xlu0 %2970 }
 0x42a   : > { %v7417_v49 = vpop.permute.xlu2 %3129 }
 0x42c   : > { %3309 = vrot.lane.b32.xlu1 %v3293_v34, %s5625_s28 }
 0x42e   : > { %v2481_v33 = vpop.permute.xlu1 %2480 }
 0x42f   : > { %3213 = vrot.lane.b32.xlu0 %v3197_v53, %s5624_s16  ;;  %v1667_v53 = vpop.f32.mrf.mxu3  ;;  %2743 = vst.msk [vmem:[#allocation2 + $0x258] sm:$0xff] %vm2666_vm3, %v2481_v33 }
 0x430   : > { %3323 = vrot.lane.b32.xlu2 %v3300_v20, %s5625_s28  ;;  %v3508_v20 = vld [vmem:[#allocation2 + $0x1d1] sm:$0x1] }
 0x431   : > { %v7419_v51 = vpop.permute.xlu0 %3225 }
 0x432   : > { %v7424_v22 = vpop.permute.xlu2 %3273 }
 0x433   : > { %8323 = vst [vmem:[#allocation80_spill] sm:$0xff] %v7424_v22 }
 0x434   : > { %2504 = vrot.lane.b32.xlu1 %v1965_v1, %s5620_s15 }
 0x436   : > { %v7433_v34 = vpop.permute.xlu1 %3177 }
 0x437   : > { %3357 = vrot.lane.b32.xlu0 %v3341_v62, %s5627_s7  ;;  %v1670_v33 = vpop.f32.mrf.mxu3 }
 0x438   : > { %3434 = vrot.lane.b32.xlu2 %v3412_v42, %s5623_s13  ;;  %v1632_v42 = vpop.f32.mrf.mxu2 }
 0x439   : > { %v7427_v56 = vpop.permute.xlu0 %3369 }
 0x43a   : > { %8324 = vst [vmem:[#allocation81_spill] sm:$0xff] %v7427_v56  ;;  %v2483_v62 = vpop.permute.xlu2 %2482  ;;  %v3604_v56 = vld [vmem:[#allocation2 + $0x1d3] sm:$0x1] }
 0x43b   : > { %2744 = vst.msk [vmem:[#allocation2 + $0x260] sm:$0x1] %vm2673_vm6, %v2483_v62  ;;  %v1970_v62 = vmul.f32 %v6728_v44, %v1670_v33 }
 0x43c   : > { %3482 = vrot.lane.b32.xlu1 %v3460_v29, %s5622_s25 }
 0x43e   : > { %v7440_v1 = vpop.permute.xlu1 %3321 }
 0x43f   : > { %3530 = vrot.lane.b32.xlu0 %v3508_v20, %s5624_s16  ;;  %8325 = vst [vmem:[#allocation82_spill] sm:$0xff] %v7440_v1 }
 0x440   : > { %3117 = vrot.lane.b32.xlu2 %v3101_v21, %s5623_s13 }
 0x441   : > { %v2491_v2 = vpop.permute.xlu0 %2490 }
 0x442   : > { %2748 = vst.msk [vmem:[#allocation2 + $0x280] sm:$0xff] %vm2666_vm3, %v2491_v2  ;;  %v7442_v20 = vpop.permute.xlu2 %3528  ;;  %v1673_v2 = vpop.f32.mrf.mxu3 }
 0x443   : > { %8326 = vst [vmem:[#allocation83_spill] sm:$0xff] %v7442_v20  ;;  %v1969_v20 = vmul.f32 %v6728_v44, %v1667_v53  ;;  %v1971_v53 = vmul.f32 %v6728_v44, %v1673_v2 }
 0x444   : > { %3626 = vrot.lane.b32.xlu1 %v3604_v56, %s5625_s28 }
 0x446   : > { %v7450_v21 = vpop.permute.xlu1 %3432 }
 0x447   : > { %3674 = vrot.lane.b32.xlu0 %v3652_v23, %s5627_s7  ;;  %8328 = vst [vmem:[#allocation85_spill] sm:$0xff] %v7450_v21  ;;  %v1635_v23 = vpop.f32.mrf.mxu2  ;;  %v3556_v21 = vld [vmem:[#allocation2 + $0x1d2] sm:$0x1] }
 0x448   : > { %3261 = vrot.lane.b32.xlu2 %v3245_v37, %s5626_s26  ;;  %v1967_v33 = vmul.f32 %v6357_v8, %v1635_v23 }
 0x449   : > { %v7444_v48 = vpop.permute.xlu0 %3480 }
 0x44a   : > { %8327 = vst [vmem:[#allocation84_spill] sm:$0xff] %v7444_v48  ;;  %v7452_v29 = vpop.permute.xlu2 %3672  ;;  %v3716_v48 = vld [vmem:[#allocation2 + $0x1d6] sm:$0x1]  ;;  %v1676_v56 = vpop.f32.mrf.mxu3 }
 0x44b   : > { %8329 = vst [vmem:[#allocation86_spill] sm:$0xff] %v7452_v29  ;;  %v1972_v17 = vmul.f32 %v6728_v44, %v1676_v56  ;;  %v3653_v56 = vld [vmem:[#allocation2 + $0x20c] sm:$0x1] }
 0x44c   : > { %3737 = vrot.lane.b32.xlu1 %v3716_v48, %s5623_s13  ;;  %v3413_v48 = vld [vmem:[#allocation2 + $0x207] sm:$0x1] }
 0x44e   : > { %v7461_v37 = vpop.permute.xlu1 %3576 }
 0x44f   : > { %2514 = vrot.lane.b32.xlu0 %v1970_v62, %s5620_s15  ;;  %8331 = vst [vmem:[#allocation88_spill] sm:$0xff] %v7461_v37 }
 0x450   : > { %2512 = vrot.lane.b32.xlu2 %v1969_v20, %s5620_s15 }
 0x451   : > { %v7454_v36 = vpop.permute.xlu0 %3624 }
 0x452   : > { %8330 = vst [vmem:[#allocation87_spill] sm:$0xff] %v7454_v36  ;;  %v2495_v62 = vpop.permute.xlu2 %2494  ;;  %v1638_v36 = vpop.f32.mrf.mxu2 }
 0x453   : > { %2750 = vst.msk [vmem:[#allocation2 + $0x290] sm:$0xff] %vm2666_vm3, %v2495_v62  ;;  %v1966_v62 = vmul.f32 %v6357_v8, %v1632_v42 }
 0x454   : > { %2516 = vrot.lane.b32.xlu1 %v1971_v53, %s5620_s15 }
 0x456   : > { %v2493_v20 = vpop.permute.xlu1 %2492 }
 0x457   : > { %2508 = vrot.lane.b32.xlu0 %v1967_v33, %s5620_s15  ;;  %v1679_v33 = vpop.f32.mrf.mxu3  ;;  %2749 = vst.msk [vmem:[#allocation2 + $0x288] sm:$0xff] %vm2666_vm3, %v2493_v20 }
 0x458   : > { %3578 = vrot.lane.b32.xlu2 %v3556_v21, %s5626_s26  ;;  %v3557_v21 = vld [vmem:[#allocation2 + $0x20a] sm:$0x1]  ;;  %v1973_v42 = vmul.f32 %v6728_v44, %v1679_v33 }
 0x459   : > { %v7464_v29 = vpop.permute.xlu0 %3735 }
 0x45a   : > { %8332 = vst [vmem:[#allocation89_spill] sm:$0xff] %v7464_v29  ;;  %v2501_v23 = vpop.permute.xlu2 %2500  ;;  %v1968_v29 = vmul.f32 %v6357_v8, %v1638_v36  ;;  %v1714_v2 = vpop.f32.mrf.mxu2 }
 0x45c   : > { %2510 = vrot.lane.b32.xlu1 %v1968_v29, %s5620_s15 }
 0x45e   : > { %v2499_v53 = vpop.permute.xlu1 %2498 }
 0x45f   : > { %3436 = vrot.lane.b32.xlu0 %v3413_v48, %s5623_s13  ;;  %v1682_v20 = vpop.f32.mrf.mxu3 }
 0x460   : > { %2506 = vrot.lane.b32.xlu2 %v1966_v62, %s5620_s15  ;;  %v1974_v1 = vmul.f32 %v6728_v44, %v1682_v20  ;;  %v3717_v20 = vld [vmem:[#allocation2 + $0x20e] sm:$0x1] }
 0x461   : > { %v7471_v37 = vpop.permute.xlu0 %2814 }
 0x462   : > { %v7478_v48 = vpop.permute.xlu2 %2812  ;;  %v1717_v8 = vpop.f32.mrf.mxu2 }
 0x463   : > { %v1977_v22 = vmul.f32 %v6756_v13, %v1717_v8  ;;  %v3762_v8 = vld [vmem:[#allocation2 + $0x167] sm:$0x1] }
 0x464   : > { %3532 = vrot.lane.b32.xlu1 %v3509_v38, %s5624_s16 }
 0x466   : > { %v7487_v36 = vpop.permute.xlu1 %2860 }
 0x467   : > { %3580 = vrot.lane.b32.xlu0 %v3557_v21, %s5626_s26  ;;  %v1976_v21 = vmul.f32 %v6756_v13, %v1714_v2  ;;  %v1685_v53 = vpop.f32.mrf.mxu3  ;;  %v3761_v2 = vld [vmem:[#allocation2 + $0x12f] sm:$0x1] }
 0x468   : > { %2518 = vrot.lane.b32.xlu2 %v1972_v17, %s5620_s15  ;;  %v1975_v3 = vmul.f32 %v6728_v44, %v1685_v53 }
 0x469   : > { %v7480_v23 = vpop.permute.xlu0 %2908 }
 0x46a   : > { %v7489_v29 = vpop.permute.xlu2 %2862  ;;  %v1720_v33 = vpop.f32.mrf.mxu2 }
 0x46c   : > { %3676 = vrot.lane.b32.xlu1 %v3653_v56, %s5627_s7 }
 0x46e   : > { %v7497_v38 = vpop.permute.xlu1 %2910 }
 0x46f   : > { %2520 = vrot.lane.b32.xlu0 %v1973_v42, %s5620_s15  ;;  %v1761_v56 = vpop.f32.mrf.mxu3 }
 0x470   : > { %3484 = vrot.lane.b32.xlu2 %v3461_v15, %s5622_s25  ;;  %v1983_v44 = vmul.f32 %v6389_v16, %v1761_v56  ;;  %v3763_v56 = vld [vmem:[#allocation2 + $0x19f] sm:$0x1] }
 0x471   : > { %v7491_v62 = vpop.permute.xlu0 %2958 }
 0x472   : > { %v7499_v17 = vpop.permute.xlu2 %2956  ;;  %v1723_v6 = vpop.f32.mrf.mxu2 }
 0x474   : > { %2522 = vrot.lane.b32.xlu1 %v1974_v1, %s5620_s15 }
 0x476   : > { %v7507_v15 = vpop.permute.xlu1 %3004 }
 0x477   : > { %2526 = vrot.lane.b32.xlu0 %v1976_v21, %s5620_s15  ;;  %v1764_v55 = vpop.f32.mrf.mxu3 }
 0x478   : > { %3628 = vrot.lane.b32.xlu2 %v3605_v31, %s5625_s28  ;;  %v3764_v31 = vld [vmem:[#allocation2 + $0x1d7] sm:$0x1] }
 0x479   : > { %v7501_v42 = vpop.permute.xlu0 %3052 }
 0x47a   : > { %v7509_v21 = vpop.permute.xlu2 %3006  ;;  %v1726_v52 = vpop.f32.mrf.mxu2 }
 0x47c   : > { %2528 = vrot.lane.b32.xlu1 %v1977_v22, %s5620_s15 }
 0x47e   : > { %v7516_v1 = vpop.permute.xlu1 %3054 }
 0x47f   : > { %3779 = vrot.lane.b32.xlu0 %v3761_v2, %s5622_s25 }
 0x480   : > { %3739 = vrot.lane.b32.xlu2 %v3717_v20, %s5623_s13 }
 0x481   : > { %v2497_v35 = vpop.permute.xlu0 %2496 }
 0x482   : > { %2751 = vst.msk [vmem:[#allocation2 + $0x298] sm:$0x1] %vm2673_vm6, %v2497_v35  ;;  %v7518_v2 = vpop.permute.xlu2 %3179  ;;  %v1979_v35 = vmul.f32 %v6756_v13, %v1723_v6  ;;  %v3718_v6 = vld [vmem:[#allocation2 + $0x246] sm:$0x1]  ;;  %v1729_v53 = vpop.f32.mrf.mxu2 }
 0x483   : > { %8333 = vst [vmem:[#allocation90_spill] sm:$0xff] %v7518_v2  ;;  %v1767_v2 = vpop.f32.mrf.mxu3 }
 0x484   : > { %3781 = vrot.lane.b32.xlu1 %v3762_v8, %s5622_s25 }
 0x486   : > { %v7525_v22 = vpop.permute.xlu1 %3227 }
 0x487   : > { %3785 = vrot.lane.b32.xlu0 %v3764_v31, %s5622_s25  ;;  %8334 = vst [vmem:[#allocation91_spill] sm:$0xff] %v7525_v22 }
 0x488   : > { %2524 = vrot.lane.b32.xlu2 %v1975_v3, %s5620_s15 }
 0x489   : > { %v2503_v12 = vpop.permute.xlu0 %2502 }
 0x48a   : > { %v7527_v20 = vpop.permute.xlu2 %3323  ;;  %v1978_v12 = vmul.f32 %v6756_v13, %v1720_v33  ;;  %v1985_v33 = vmul.f32 %v6389_v16, %v1767_v2  ;;  %v3765_v2 = vld [vmem:[#allocation2 + $0x20f] sm:$0x1] }
 0x48b   : > { %8335 = vst [vmem:[#allocation92_spill] sm:$0xff] %v7527_v20  ;;  %v1980_v20 = vmul.f32 %v6756_v13, %v1726_v52  ;;  %v1770_v22 = vpop.f32.mrf.mxu3 }
 0x48c   : > { %2540 = vrot.lane.b32.xlu1 %v1983_v44, %s5620_s15 }
 0x48e   : > { %v7536_v3 = vpop.permute.xlu1 %3371 }
 0x48f   : > { %2532 = vrot.lane.b32.xlu0 %v1979_v35, %s5620_s15  ;;  %8336 = vst [vmem:[#allocation93_spill] sm:$0xff] %v7536_v3  ;;  %v1732_v3 = vpop.f32.mrf.mxu2 }
 0x490   : > { %2530 = vrot.lane.b32.xlu2 %v1978_v12, %s5620_s15  ;;  %v1982_v52 = vmul.f32 %v6756_v13, %v1732_v3  ;;  %v3807_v3 = vld [vmem:[#allocation2 + $0xc0] sm:$0x1] }
 0x491   : > { %v7529_v31 = vpop.permute.xlu0 %3131 }
 0x492   : > { %v7538_v35 = vpop.permute.xlu2 %3434 }
 0x493   : > { %8337 = vst [vmem:[#allocation94_spill] sm:$0xff] %v7538_v35 }
 0x494   : > { %2534 = vrot.lane.b32.xlu1 %v1980_v20, %s5620_s15  ;;  %v1773_v20 = vpop.f32.mrf.mxu3 }
 0x496   : > { %v7547_v12 = vpop.permute.xlu1 %3165 }
 0x497   : > { %3741 = vrot.lane.b32.xlu0 %v3718_v6, %s5623_s13  ;;  %8339 = vst [vmem:[#allocation96_spill] sm:$0xff] %v7547_v12  ;;  %v3808_v12 = vld [vmem:[#allocation2 + $0xf8] sm:$0x1] }
 0x498   : > { %3783 = vrot.lane.b32.xlu2 %v3763_v56, %s5622_s25 }
 0x499   : > { %v7540_v8 = vpop.permute.xlu0 %3275 }
 0x49a   : > { %8338 = vst [vmem:[#allocation95_spill] sm:$0xff] %v7540_v8  ;;  %v7549_v44 = vpop.permute.xlu2 %3117  ;;  %v1984_v8 = vmul.f32 %v6389_v16, %v1764_v55  ;;  %v1986_v55 = vmul.f32 %v6389_v16, %v1770_v22 }
 0x49c   : > { %3787 = vrot.lane.b32.xlu1 %v3765_v2, %s5622_s25 }
 0x49f   : > { %2544 = vrot.lane.b32.xlu0 %v1985_v33, %s5620_s15  ;;  %v7558_v33 = vpop.permute.xlu1 %3309 }
 0x4a0   : > { %2542 = vrot.lane.b32.xlu2 %v1984_v8, %s5620_s15  ;;  %8341 = vst [vmem:[#allocation98_spill] sm:$0xff] %v7558_v33  ;;  %v1776_v33 = vpop.f32.mrf.mxu3 }
 0x4a1   : > { %v7551_v6 = vpop.permute.xlu0 %3213 }
 0x4a2   : > { %8340 = vst [vmem:[#allocation97_spill] sm:$0xff] %v7551_v6  ;;  %v7560_v56 = vpop.permute.xlu2 %3261  ;;  %v1981_v6 = vmul.f32 %v6756_v13, %v1729_v53 }
 0x4a3   : > { %8342 = vst [vmem:[#allocation99_spill] sm:$0xff] %v7560_v56  ;;  %v1988_v56 = vmul.f32 %v6389_v16, %v1776_v33  ;;  %v3810_v33 = vld [vmem:[#allocation2 + $0x168] sm:$0x1] }
 0x4a4   : > { %2546 = vrot.lane.b32.xlu1 %v1986_v55, %s5620_s15  ;;  %v3811_v55 = vld [vmem:[#allocation2 + $0x1a0] sm:$0x1] }
 0x4a7   : > { %2538 = vrot.lane.b32.xlu0 %v1982_v52, %s5620_s15  ;;  %v2505_v8 = vpop.permute.xlu1 %2504 }
 0x4a8   : > { %2536 = vrot.lane.b32.xlu2 %v1981_v6, %s5620_s15  ;;  %v1987_v6 = vmul.f32 %v6389_v16, %v1773_v20  ;;  %v3813_v20 = vld [vmem:[#allocation2 + $0x210] sm:$0x1] }
 0x4a9   : > { %v7562_v35 = vpop.permute.xlu0 %3357 }
 0x4aa   : > { %8343 = vst [vmem:[#allocation100_spill] sm:$0xff] %v7562_v35  ;;  %v2513_v2 = vpop.permute.xlu2 %2512  ;;  %v3766_v35 = vld [vmem:[#allocation2 + $0x247] sm:$0x1] }
 0x4ab   : > { %v3809_v2 = vld [vmem:[#allocation2 + $0x130] sm:$0x1] }
 0x4ac   : > { %3825 = vrot.lane.b32.xlu1 %v3808_v12, %s5624_s16 }
 0x4af   : > { %3823 = vrot.lane.b32.xlu0 %v3807_v3, %s5624_s16  ;;  %v7575_v13 = vpop.permute.xlu1 %3482 }
 0x4b0   : > { %3789 = vrot.lane.b32.xlu2 %v3766_v35, %s5622_s25 }
 0x4b1   : > { %v7569_v52 = vpop.permute.xlu0 %3530 }
 0x4b2   : > { %v7577_v22 = vpop.permute.xlu2 %3578 }
 0x4b4   : > { %3831 = vrot.lane.b32.xlu1 %v3811_v55, %s5624_s16 }
 0x4b7   : > { %2550 = vrot.lane.b32.xlu0 %v1988_v56, %s5620_s15  ;;  %v7585_v12 = vpop.permute.xlu1 %3626  ;;  %v1779_v56 = vpop.f32.mrf.mxu3 }
 0x4b8   : > { %2548 = vrot.lane.b32.xlu2 %v1987_v6, %s5620_s15  ;;  %8345 = vst [vmem:[#allocation102_spill] sm:$0xff] %v7585_v12  ;;  %v1989_v8 = vmul.f32 %v6389_v16, %v1779_v56  ;;  %v3812_v12 = vld [vmem:[#allocation2 + $0x1d8] sm:$0x1]  ;;  %v3856_v16 = vld [vmem:[#allocation2 + $0xf9] sm:$0x1] }
 0x4b9   : > { %v7579_v53 = vpop.permute.xlu0 %3674 }
 0x4ba   : > { %8344 = vst [vmem:[#allocation101_spill] sm:$0xff] %v7579_v53  ;;  %v2507_v35 = vpop.permute.xlu2 %2506  ;;  %v3814_v53 = vld [vmem:[#allocation2 + $0x248] sm:$0x1] }
 0x4bb   : > { %2756 = vst.msk [vmem:[#allocation2 + $0x2c0] sm:$0xff] %vm2666_vm3, %v2507_v35 }
 0x4bc   : > { %2552 = vrot.lane.b32.xlu1 %v1989_v8, %s5620_s15  ;;  %v3857_v8 = vld [vmem:[#allocation2 + $0x131] sm:$0x1] }
 0x4bf   : > { %3829 = vrot.lane.b32.xlu0 %v3810_v33, %s5624_s16  ;;  %v7592_v6 = vpop.permute.xlu1 %3737 }
 0x4c0   : > { %3827 = vrot.lane.b32.xlu2 %v3809_v2, %s5624_s16  ;;  %8346 = vst [vmem:[#allocation103_spill] sm:$0xff] %v7592_v6  ;;  %v3855_v2 = vld [vmem:[#allocation2 + $0xc1] sm:$0x1]  ;;  %v3903_v6 = vld [vmem:[#allocation2 + $0xc2] sm:$0x1] }
 0x4c1   : > { %v2515_v3 = vpop.permute.xlu0 %2514 }
 0x4c2   : > { %v2519_v55 = vpop.permute.xlu2 %2518 }
 0x4c4   : > { %3837 = vrot.lane.b32.xlu1 %v3814_v53, %s5624_s16 }
 0x4c7   : > { %3835 = vrot.lane.b32.xlu0 %v3813_v20, %s5624_s16  ;;  %v2517_v35 = vpop.permute.xlu1 %2516  ;;  %v3859_v20 = vld [vmem:[#allocation2 + $0x1a1] sm:$0x1] }
 0x4c8   : > { %3833 = vrot.lane.b32.xlu2 %v3812_v12, %s5624_s16  ;;  %v3862_v35 = vld [vmem:[#allocation2 + $0x249] sm:$0x1] }
 0x4c9   : > { %v2509_v33 = vpop.permute.xlu0 %2508 }
 0x4ca   : > { %2757 = vst.msk [vmem:[#allocation2 + $0x2c8] sm:$0xff] %vm2666_vm3, %v2509_v33  ;;  %v7598_v56 = vpop.permute.xlu2 %3484  ;;  %v3860_v33 = vld [vmem:[#allocation2 + $0x1d9] sm:$0x1] }
 0x4cb   : > { %8347 = vst [vmem:[#allocation104_spill] sm:$0xff] %v7598_v56  ;;  %v3955_v56 = vld [vmem:[#allocation2 + $0x1a3] sm:$0x1] }
 0x4cc   : > { %3875 = vrot.lane.b32.xlu1 %v3857_v8, %s5626_s26 }
 0x4cf   : > { %3873 = vrot.lane.b32.xlu0 %v3856_v16, %s5626_s26  ;;  %v2511_v53 = vpop.permute.xlu1 %2510  ;;  %v3858_v16 = vld [vmem:[#allocation2 + $0x169] sm:$0x1] }
 0x4d0   : > { %3871 = vrot.lane.b32.xlu2 %v3855_v2, %s5626_s26  ;;  %2758 = vst.msk [vmem:[#allocation2 + $0x2d0] sm:$0x1] %vm2673_vm6, %v2511_v53  ;;  %v3905_v53 = vld [vmem:[#allocation2 + $0x132] sm:$0x1] }
 0x4d1   : > { %v7600_v3 = vpop.permute.xlu0 %3436 }
 0x4d2   : > { %8348 = vst [vmem:[#allocation105_spill] sm:$0xff] %v7600_v3  ;;  %v7605_v55 = vpop.permute.xlu2 %3628  ;;  %v3956_v3 = vld [vmem:[#allocation2 + $0x1db] sm:$0x1] }
 0x4d3   : > { %8349 = vst [vmem:[#allocation106_spill] sm:$0xff] %v7605_v55  ;;  %v3861_v55 = vld [vmem:[#allocation2 + $0x211] sm:$0x1] }
 0x4d4   : > { %3881 = vrot.lane.b32.xlu1 %v3860_v33, %s5626_s26 }
 0x4d7   : > { %3879 = vrot.lane.b32.xlu0 %v3859_v20, %s5626_s26  ;;  %v7613_v8 = vpop.permute.xlu1 %3532 }
 0x4d8   : > { %3877 = vrot.lane.b32.xlu2 %v3858_v16, %s5626_s26  ;;  %8351 = vst [vmem:[#allocation108_spill] sm:$0xff] %v7613_v8  ;;  %v3904_v8 = vld [vmem:[#allocation2 + $0xfa] sm:$0x1] }
 0x4d9   : > { %v7608_v12 = vpop.permute.xlu0 %3580 }
 0x4da   : > { %8350 = vst [vmem:[#allocation107_spill] sm:$0xff] %v7608_v12  ;;  %v7615_v2 = vpop.permute.xlu2 %3739  ;;  %v3906_v12 = vld [vmem:[#allocation2 + $0x16a] sm:$0x1] }
 0x4db   : > { %8352 = vst [vmem:[#allocation109_spill] sm:$0xff] %v7615_v2  ;;  %v3907_v2 = vld [vmem:[#allocation2 + $0x1a2] sm:$0x1] }
 0x4dc   : > { %3919 = vrot.lane.b32.xlu1 %v3903_v6, %s5625_s28 }
 0x4df   : > { %3885 = vrot.lane.b32.xlu0 %v3862_v35, %s5626_s26  ;;  %v7620_v33 = vpop.permute.xlu1 %3676 }
 0x4e0   : > { %3883 = vrot.lane.b32.xlu2 %v3861_v55, %s5626_s26  ;;  %8353 = vst [vmem:[#allocation110_spill] sm:$0xff] %v7620_v33  ;;  %v3909_v33 = vld [vmem:[#allocation2 + $0x212] sm:$0x1] }
 0x4e1   : > { %v2521_v20 = vpop.permute.xlu0 %2520 }
 0x4e2   : > { %v2525_v16 = vpop.permute.xlu2 %2524  ;;  %v3908_v20 = vld [vmem:[#allocation2 + $0x1da] sm:$0x1] }
 0x4e3   : > { %2765 = vst.msk [vmem:[#allocation2 + $0x308] sm:$0x1] %vm2673_vm6, %v2525_v16  ;;  %v3951_v16 = vld [vmem:[#allocation2 + $0xc3] sm:$0x1] }
 0x4e4   : > { %3925 = vrot.lane.b32.xlu1 %v3906_v12, %s5625_s28 }
 0x4e7   : > { %3923 = vrot.lane.b32.xlu0 %v3905_v53, %s5625_s28  ;;  %v2523_v6 = vpop.permute.xlu1 %2522 }
 0x4e8   : > { %3921 = vrot.lane.b32.xlu2 %v3904_v8, %s5625_s28  ;;  %2764 = vst.msk [vmem:[#allocation2 + $0x300] sm:$0xff] %vm2666_vm3, %v2523_v6  ;;  %v3954_v6 = vld [vmem:[#allocation2 + $0x16b] sm:$0x1] }
 0x4e9   : > { %v2527_v35 = vpop.permute.xlu0 %2526 }
 0x4ea   : > { %v2531_v55 = vpop.permute.xlu2 %2530 }
 0x4eb   : > { %v3910_v55 = vld [vmem:[#allocation2 + $0x24a] sm:$0x1] }
 0x4ec   : > { %3931 = vrot.lane.b32.xlu1 %v3909_v33, %s5625_s28 }
 0x4ef   : > { %3929 = vrot.lane.b32.xlu0 %v3908_v20, %s5625_s28  ;;  %v2529_v12 = vpop.permute.xlu1 %2528  ;;  %v3952_v20 = vld [vmem:[#allocation2 + $0xfb] sm:$0x1] }
 0x4f0   : > { %3927 = vrot.lane.b32.xlu2 %v3907_v2, %s5625_s28  ;;  %v3957_v12 = vld [vmem:[#allocation2 + $0x213] sm:$0x1] }
 0x4f1   : > { %v7627_v53 = vpop.permute.xlu0 %3779 }
 0x4f2   : > { %8354 = vst [vmem:[#allocation111_spill] sm:$0xff] %v7627_v53  ;;  %v7632_v8 = vpop.permute.xlu2 %3783 }
 0x4f3   : > { %8355 = vst [vmem:[#allocation112_spill] sm:$0xff] %v7632_v8 }
 0x4f4   : > { %3969 = vrot.lane.b32.xlu1 %v3952_v20, %s5627_s7 }
 0x4f7   : > { %3967 = vrot.lane.b32.xlu0 %v3951_v16, %s5627_s7  ;;  %v7639_v33 = vpop.permute.xlu1 %3781  ;;  %v3953_v16 = vld [vmem:[#allocation2 + $0x133] sm:$0x1] }
 0x4f8   : > { %3933 = vrot.lane.b32.xlu2 %v3910_v55, %s5625_s28  ;;  %8357 = vst [vmem:[#allocation114_spill] sm:$0xff] %v7639_v33  ;;  %v3958_v55 = vld [vmem:[#allocation2 + $0x24b] sm:$0x1]  ;;  %v4016_v33 = vld [vmem:[#allocation2 + $0xfd] sm:$0x1] }
 0x4f9   : > { %v7634_v35 = vpop.permute.xlu0 %3785 }
 0x4fa   : > { %8356 = vst [vmem:[#allocation113_spill] sm:$0xff] %v7634_v35  ;;  %v2543_v2 = vpop.permute.xlu2 %2542 }
 0x4fc   : > { %3975 = vrot.lane.b32.xlu1 %v3955_v56, %s5627_s7 }
 0x4ff   : > { %3973 = vrot.lane.b32.xlu0 %v3954_v6, %s5627_s7  ;;  %v2541_v35 = vpop.permute.xlu1 %2540 }
 0x500   : > { %3971 = vrot.lane.b32.xlu2 %v3953_v16, %s5627_s7  ;;  %v4018_v16 = vld [vmem:[#allocation2 + $0x16d] sm:$0x1]  ;;  %v4020_v35 = vld [vmem:[#allocation2 + $0x1dd] sm:$0x1] }
 0x501   : > { %v2533_v53 = vpop.permute.xlu0 %2532 }
 0x502   : > { %v2537_v20 = vpop.permute.xlu2 %2536  ;;  %v4017_v53 = vld [vmem:[#allocation2 + $0x135] sm:$0x1] }
 0x504   : > { %3981 = vrot.lane.b32.xlu1 %v3958_v55, %s5627_s7  ;;  %v4021_v55 = vld [vmem:[#allocation2 + $0x215] sm:$0x1] }
 0x507   : > { %3979 = vrot.lane.b32.xlu0 %v3957_v12, %s5627_s7  ;;  %v2535_v6 = vpop.permute.xlu1 %2534 }
 0x508   : > { %3977 = vrot.lane.b32.xlu2 %v3956_v3, %s5627_s7 }
 0x509   : > { %v7644_v8 = vpop.permute.xlu0 %3741 }
 0x50a   : > { %8358 = vst [vmem:[#allocation115_spill] sm:$0xff] %v7644_v8  ;;  %v7649_v56 = vpop.permute.xlu2 %3789  ;;  %v4019_v8 = vld [vmem:[#allocation2 + $0x1a5] sm:$0x1] }
 0x50b   : > { %8359 = vst [vmem:[#allocation116_spill] sm:$0xff] %v7649_v56  ;;  %v4064_v56 = vld [vmem:[#allocation2 + $0xfe] sm:$0x1] }
 0x50c   : > { %4036 = vrot.lane.b32.xlu1 %v4018_v16, %s5623_s13  ;;  %v2781_v16 = vld [vmem:[#allocation2 + $0x38] sm:$0x1] }
 0x50f   : > { %4034 = vrot.lane.b32.xlu0 %v4017_v53, %s5623_s13  ;;  %v7654_v12 = vpop.permute.xlu1 %3787  ;;  %v4023_v53 = vld [vmem:[#allocation2 + $0x285] sm:$0x1] }
 0x510   : > { %4032 = vrot.lane.b32.xlu2 %v4016_v33, %s5623_s13  ;;  %8360 = vst [vmem:[#allocation117_spill] sm:$0xff] %v7654_v12 }
 0x511   : > { %v2545_v2 = vpop.permute.xlu0 %2544 }
 0x512   : > { %v2549_v20 = vpop.permute.xlu2 %2548 }
 0x513   : > { %v4022_v20 = vld [vmem:[#allocation2 + $0x24d] sm:$0x1] }
 0x514   : > { %4042 = vrot.lane.b32.xlu1 %v4021_v55, %s5623_s13 }
 0x517   : > { %4040 = vrot.lane.b32.xlu0 %v4020_v35, %s5623_s13  ;;  %v2547_v6 = vpop.permute.xlu1 %2546  ;;  %v2837_v35 = vadd.f32 %v7471_v37, %v2781_v16  ;;  %v4067_v37 = vld [vmem:[#allocation2 + $0x1a6] sm:$0x1]  ;;  %v4065_v16 = vld [vmem:[#allocation2 + $0x136] sm:$0x1] }
 0x518   : > { %4038 = vrot.lane.b32.xlu2 %v4019_v8, %s5623_s13 }
 0x519   : > { %v2539_v3 = vpop.permute.xlu0 %2538  ;;  %v2885_v8 = vadd.f32 %v7489_v29, %v2837_v35 }
 0x51a   : > { %v7659_v2 = vpop.permute.xlu2 %3827  ;;  %v4066_v3 = vld [vmem:[#allocation2 + $0x16e] sm:$0x1] }
 0x51b   : > { %8361 = vst [vmem:[#allocation118_spill] sm:$0xff] %v7659_v2  ;;  %v2933_v2 = vadd.f32 %v7497_v38, %v2885_v8 }
 0x51c   : > { %4080 = vrot.lane.b32.xlu1 %v4064_v56, %s5622_s25  ;;  %v4069_v56 = vld [vmem:[#allocation2 + $0x216] sm:$0x1] }
 0x51d   : > { %v2981_v29 = vadd.f32 %v7491_v62, %v2933_v2 }
 0x51f   : > { %4046 = vrot.lane.b32.xlu0 %v4023_v53, %s5623_s13  ;;  %v7668_v55 = vpop.permute.xlu1 %3825  ;;  %v3029_v38 = vadd.f32 %v7509_v21, %v2981_v29  ;;  %v4112_v21 = vld [vmem:[#allocation2 + $0xff] sm:$0x1] }
 0x520   : > { %4044 = vrot.lane.b32.xlu2 %v4022_v20, %s5623_s13 }
 0x521   : > { %v7661_v33 = vpop.permute.xlu0 %3823  ;;  %v3077_v2 = vadd.f32 %v7516_v1, %v3029_v38 }
 0x522   : > { %8362 = vst [vmem:[#allocation119_spill] sm:$0xff] %v7661_v33  ;;  %v7670_v53 = vpop.permute.xlu2 %3833  ;;  %v2786_v33 = vld [vmem:[#allocation2 + $0x150] sm:$0x1] }
 0x523   : > { %8363 = vst [vmem:[#allocation120_spill] sm:$0xff] %v7670_v53  ;;  %v2842_v12 = vadd.f32 %v7323_v14, %v2786_v33  ;;  %v2784_v14 = vld [vmem:[#allocation2 + $0xe0] sm:$0x1]  ;;  %v2785_v53 = vld [vmem:[#allocation2 + $0x118] sm:$0x1] }
 0x524   : > { %4086 = vrot.lane.b32.xlu1 %v4067_v37, %s5622_s25  ;;  %v2840_v37 = vadd.f32 %v7173_v25, %v2784_v14 }
 0x525   : > { %v2890_v8 = vadd.f32 %v7328_v57, %v2842_v12  ;;  %v2841_v57 = vadd.f32 %v7261_v41, %v2785_v53  ;;  %v2787_v12 = vld [vmem:[#allocation2 + $0x188] sm:$0x1] }
 0x526   : > { %v2843_v25 = vadd.f32 %v7403_v0, %v2787_v12  ;;  %v2888_v38 = vadd.f32 %v7155_v43, %v2840_v37 }
 0x527   : > { %4084 = vrot.lane.b32.xlu0 %v4066_v3, %s5622_s25  ;;  %v7678_v35 = vpop.permute.xlu1 %3831  ;;  %v2938_v33 = vadd.f32 %v7332_v32, %v2890_v8  ;;  %v2889_v41 = vadd.f32 %v7246_v46, %v2841_v57 }
 0x528   : > { %4082 = vrot.lane.b32.xlu2 %v4065_v16, %s5622_s25  ;;  %v4070_v16 = vld [vmem:[#allocation2 + $0x24e] sm:$0x1] }
 0x529   : > { %v2551_v6 = vpop.permute.xlu0 %2550  ;;  %v2986_v32 = vadd.f32 %v7330_v26, %v2938_v33  ;;  %v2936_v26 = vadd.f32 %v7187_v59, %v2888_v38  ;;  %v2937_v46 = vadd.f32 %v7244_v4, %v2889_v41 }
 0x52a   : > { %v7680_v20 = vpop.permute.xlu2 %3871  ;;  %v2780_v6 = vld [vmem:[#allocation2] sm:$0x1] }
 0x52b   : > { %v2836_v62 = vadd.f32 %v7478_v48, %v2780_v6  ;;  %v3086_v48 = vld [vmem:[#allocation2 + $0x77] sm:$0x1]  ;;  %v3034_v53 = vadd.f32 %v7338_v39, %v2986_v32  ;;  %v2985_v37 = vadd.f32 %v7269_v11, %v2937_v46 }
 0x52c   : > { %4092 = vrot.lane.b32.xlu1 %v4070_v16, %s5622_s25  ;;  %v3094_v14 = vadd.f32 %v3086_v48, %v3077_v2  ;;  %v2891_v16 = vadd.f32 %v7395_v40, %v2843_v25  ;;  %v4116_v48 = vld [vmem:[#allocation2 + $0x1df] sm:$0x1] }
 0x52d   : > { %v2884_v8 = vadd.f32 %v7487_v36, %v2836_v62  ;;  %v3082_v43 = vadd.f32 %v7342_v5, %v3034_v53  ;;  %v4115_v36 = vld [vmem:[#allocation2 + $0x1a7] sm:$0x1]  ;;  %v2984_v5 = vadd.f32 %v7180_v50, %v2936_v26  ;;  %v3091_v62 = vld [vmem:[#allocation2 + $0x18f] sm:$0x1]  ;;  %v3033_v50 = vadd.f32 %v7255_v7, %v2985_v37  ;;  %v2783_v7 = vld [vmem:[#allocation2 + $0xa8] sm:$0x1] }
 0x52e   : > { %v3142_v33 = vadd.f32 %v7033_v10, %v3094_v14  ;;  %v2939_v59 = vadd.f32 %v7408_v45, %v2891_v16  ;;  %v2839_v14 = vadd.f32 %v7061_v58, %v2783_v7  ;;  %v3085_v53 = vld [vmem:[#allocation2 + $0x3f] sm:$0x1]  ;;  %v8364_v26 = vld [vmem:[#allocation13_spill] sm:$0xff]  ;;  %v4119_v58 = vld [vmem:[#allocation2 + $0x287] sm:$0x1] }
 0x52f   : > { %4090 = vrot.lane.b32.xlu0 %v4069_v56, %s5622_s25  ;;  %v4068_v56 = vld [vmem:[#allocation2 + $0x1de] sm:$0x1]  ;;  %v2553_v29 = vpop.permute.xlu1 %2552  ;;  %v2932_v0 = vadd.f32 %v7480_v23, %v2884_v8  ;;  %v2782_v23 = vld [vmem:[#allocation2 + $0x70] sm:$0x1]  ;;  %v3032_v25 = vadd.f32 %v7163_v9, %v2984_v5  ;;  %v4161_v37 = vld [vmem:[#allocation2 + $0x138] sm:$0x1] }
 0x530   : > { %4088 = vrot.lane.b32.xlu2 %v4068_v56, %s5622_s25  ;;  %v4113_v56 = vld [vmem:[#allocation2 + $0x137] sm:$0x1]  ;;  %v3190_v2 = vadd.f32 %v7003_v30, %v3142_v33  ;;  %v2838_v4 = vadd.f32 %v7005_v19, %v2782_v23  ;;  %v2987_v12 = vadd.f32 %v7410_v47, %v2939_v59  ;;  %v4114_v29 = vld [vmem:[#allocation2 + $0x16f] sm:$0x1]  ;;  %v8368_v23 = vld [vmem:[#allocation80_spill] sm:$0xff] }
 0x531   : > { %v7683_v3 = vpop.permute.xlu0 %3829  ;;  %v2980_v39 = vadd.f32 %v7499_v17, %v2932_v0  ;;  %v3099_v17 = vadd.f32 %v3091_v62, %v3082_v43  ;;  %v4118_v47 = vld [vmem:[#allocation2 + $0x24f] sm:$0x1]  ;;  %v8365_v33 = vld [vmem:[#allocation22_spill] sm:$0xff]  ;;  %v3092_v43 = vld [vmem:[#allocation2 + $0x1c7] sm:$0x1] }
 0x532   : > { %v7696_v1 = vpop.permute.xlu2 %3877  ;;  %v3238_v11 = vadd.f32 %v7030_v60, %v3190_v2  ;;  %v2886_v30 = vadd.f32 %v6987_v61, %v2838_v4  ;;  %v3035_v38 = vadd.f32 %v7401_v27, %v2987_v12  ;;  %v3080_v61 = vadd.f32 %v7197_v18, %v3032_v25  ;;  %v8369_v62 = vld [vmem:[#allocation55_spill] sm:$0xff]  ;;  %v8376_v7 = vld [vmem:[#allocation54_spill] sm:$0xff] }
 0x533   : > { %v3028_v45 = vadd.f32 %v7507_v15, %v2980_v39  ;;  %v3147_v32 = vadd.f32 %v7417_v49, %v3099_v17  ;;  %v3081_v27 = vadd.f32 %v7252_v63, %v3033_v50  ;;  %v2887_v18 = vadd.f32 %v8365_v33, %v2839_v14  ;;  %v3089_v63 = vld [vmem:[#allocation2 + $0x11f] sm:$0x1]  ;;  %v4117_v39 = vld [vmem:[#allocation2 + $0x217] sm:$0x1] }
 0x534   : > { %4130 = vrot.lane.b32.xlu1 %v4113_v56, %s5624_s16  ;;  %v2934_v8 = vadd.f32 %v6982_v28, %v2886_v30  ;;  %v3090_v56 = vld [vmem:[#allocation2 + $0x157] sm:$0x1]  ;;  %v8370_v4 = vld [vmem:[#allocation71_spill] sm:$0xff]  ;;  %v8374_v30 = vld [vmem:[#allocation96_spill] sm:$0xff] }
 0x535   : > { %v3195_v19 = vadd.f32 %v7433_v34, %v3147_v32  ;;  %v3076_v49 = vadd.f32 %v7501_v42, %v3028_v45  ;;  %v3286_v34 = vadd.f32 %v7045_v24, %v3238_v11  ;;  %v3083_v42 = vadd.f32 %v7415_v54, %v3035_v38  ;;  %v8367_v54 = vld [vmem:[#allocation24_spill] sm:$0xff]  ;;  %v8371_v12 = vld [vmem:[#allocation11_spill] sm:$0xff]  ;;  %v8372_v45 = vld [vmem:[#allocation82_spill] sm:$0xff] }
 0x536   : > { %v2982_v0 = vadd.f32 %v8364_v26, %v2934_v8  ;;  %v3097_v24 = vadd.f32 %v3089_v63, %v3080_v61  ;;  %v2935_v59 = vadd.f32 %v8367_v54, %v2887_v18  ;;  %v8378_v8 = vld [vmem:[#allocation10_spill] sm:$0xff]  ;;  %v4162_v18 = vld [vmem:[#allocation2 + $0x170] sm:$0x1]  ;;  %v8385_v54 = vld [vmem:[#allocation99_spill] sm:$0xff] }
 0x537   : > { %4128 = vrot.lane.b32.xlu0 %v4112_v21, %s5624_s16  ;;  %v4071_v21 = vld [vmem:[#allocation2 + $0x286] sm:$0x1]  ;;  %v7715_v40 = vpop.permute.xlu1 %3837  ;;  %v3243_v41 = vadd.f32 %v7419_v51, %v3195_v19  ;;  %v3093_v16 = vadd.f32 %v3085_v53, %v3076_v49  ;;  %v3100_v51 = vadd.f32 %v3092_v43, %v3083_v42  ;;  %v8379_v42 = vld [vmem:[#allocation81_spill] sm:$0xff]  ;;  %v8380_v53 = vld [vmem:[#allocation90_spill] sm:$0xff] }
 0x538   : > { %4094 = vrot.lane.b32.xlu2 %v4071_v21, %s5622_s25  ;;  %v3098_v21 = vadd.f32 %v3090_v56, %v3081_v27  ;;  %v3145_v2 = vadd.f32 %v8369_v62, %v3097_v24  ;;  %v8377_v27 = vld [vmem:[#allocation69_spill] sm:$0xff]  ;;  %v4160_v56 = vld [vmem:[#allocation2 + $0x100] sm:$0x1] }
 0x539   : > { %v7700_v6 = vpop.permute.xlu0 %3835  ;;  %v3141_v28 = vadd.f32 %v7549_v44, %v3093_v16  ;;  %v3291_v5 = vadd.f32 %v8368_v23, %v3243_v41  ;;  %v3030_v44 = vadd.f32 %v8371_v12, %v2982_v0  ;;  %v3148_v25 = vadd.f32 %v7529_v31, %v3100_v51  ;;  %v3391_v41 = vld [vmem:[#allocation2 + $0xb6] sm:$0x1]  ;;  %v8381_v0 = vld [vmem:[#allocation97_spill] sm:$0xff]  ;;  %v4164_v24 = vld [vmem:[#allocation2 + $0x1e0] sm:$0x1] }
 0x53a   : > { %v7717_v10 = vpop.permute.xlu2 %3883  ;;  %v3146_v17 = vadd.f32 %v8370_v4, %v3098_v21  ;;  %v3193_v61 = vadd.f32 %v8376_v7, %v3145_v2  ;;  %v8382_v63 = vld [vmem:[#allocation25_spill] sm:$0xff]  ;;  %v8386_v51 = vld [vmem:[#allocation27_spill] sm:$0xff]  ;;  %v8388_v12 = vld [vmem:[#allocation58_spill] sm:$0xff] }
 0x53b   : > { %v3339_v32 = vadd.f32 %v8372_v45, %v3291_v5  ;;  %v3189_v38 = vadd.f32 %v8374_v30, %v3141_v28  ;;  %v3078_v14 = vadd.f32 %v8378_v8, %v3030_v44  ;;  %v3196_v16 = vadd.f32 %v8380_v53, %v3148_v25  ;;  %v3087_v43 = vld [vmem:[#allocation2 + $0xaf] sm:$0x1]  ;;  %v8384_v28 = vld [vmem:[#allocation67_spill] sm:$0xff]  ;;  %v8389_v45 = vld [vmem:[#allocation74_spill] sm:$0xff] }
 0x53c   : > { %4136 = vrot.lane.b32.xlu1 %v4116_v48, %s5624_s16  ;;  %v8373_v48 = vld [vmem:[#allocation15_spill] sm:$0xff]  ;;  %v8391_v30 = vld [vmem:[#allocation28_spill] sm:$0xff]  ;;  %v8396_v53 = vld [vmem:[#allocation57_spill] sm:$0xff] }
 0x53d   : > { %v3387_v31 = vadd.f32 %v8379_v42, %v3339_v32  ;;  %v3237_v33 = vadd.f32 %v8381_v0, %v3189_v38  ;;  %v3095_v5 = vadd.f32 %v3087_v43, %v3078_v14  ;;  %v8387_v62 = vld [vmem:[#allocation91_spill] sm:$0xff]  ;;  %v8395_v42 = vld [vmem:[#allocation30_spill] sm:$0xff]  ;;  %v8400_v43 = vld [vmem:[#allocation92_spill] sm:$0xff] }
 0x53e   : > { %v3244_v2 = vadd.f32 %v8387_v62, %v3196_v16  ;;  %v8390_v25 = vld [vmem:[#allocation35_spill] sm:$0xff]  ;;  %v8397_v0 = vld [vmem:[#allocation70_spill] sm:$0xff] }
 0x53f   : > { %4134 = vrot.lane.b32.xlu0 %v4115_v36, %s5624_s16  ;;  %v7738_v9 = vpop.permute.xlu1 %3875  ;;  %v8366_v36 = vld [vmem:[#allocation12_spill] sm:$0xff]  ;;  %v3143_v38 = vadd.f32 %v8391_v30, %v3095_v5  ;;  %v8393_v7 = vld [vmem:[#allocation95_spill] sm:$0xff]  ;;  %v8407_v30 = vld [vmem:[#allocation93_spill] sm:$0xff] }
 0x540   : > { %4132 = vrot.lane.b32.xlu2 %v4114_v29, %s5624_s16  ;;  %v3334_v46 = vadd.f32 %v8366_v36, %v3286_v34  ;;  %v3194_v34 = vadd.f32 %v8377_v27, %v3146_v17  ;;  %v8383_v36 = vld [vmem:[#allocation56_spill] sm:$0xff] }
 0x541   : > { %v7722_v57 = vpop.permute.xlu0 %3873  ;;  %v3088_v27 = vld [vmem:[#allocation2 + $0xe7] sm:$0x1] }
 0x542   : > { %v7740_v60 = vpop.permute.xlu2 %3921  ;;  %v3382_v29 = vadd.f32 %v8373_v48, %v3334_v46  ;;  %v3241_v46 = vadd.f32 %v8383_v36, %v3193_v61  ;;  %v3292_v61 = vadd.f32 %v8393_v7, %v3244_v2  ;;  %v8405_v2 = vld [vmem:[#allocation68_spill] sm:$0xff]  ;;  %v8409_v7 = vld [vmem:[#allocation41_spill] sm:$0xff] }
 0x544   : > { %4142 = vrot.lane.b32.xlu1 %v4119_v58, %s5624_s16  ;;  %v3399_v26 = vadd.f32 %v3391_v41, %v3382_v29  ;;  %v3242_v58 = vadd.f32 %v8384_v28, %v3194_v34  ;;  %v3289_v44 = vadd.f32 %v8388_v12, %v3241_v46  ;;  %v8394_v34 = vld [vmem:[#allocation98_spill] sm:$0xff]  ;;  %v3340_v36 = vadd.f32 %v8400_v43, %v3292_v61  ;;  %v4167_v46 = vld [vmem:[#allocation2 + $0x288] sm:$0x1] }
 0x545   : > { %v8401_v28 = vld [vmem:[#allocation100_spill] sm:$0xff] }
 0x546   : > { %v3290_v32 = vadd.f32 %v8389_v45, %v3242_v58  ;;  %v3447_v48 = vadd.f32 %v8390_v25, %v3399_v26  ;;  %v3337_v16 = vadd.f32 %v8396_v53, %v3289_v44  ;;  %v8406_v44 = vld [vmem:[#allocation36_spill] sm:$0xff]  ;;  %v3390_v25 = vld [vmem:[#allocation2 + $0x7e] sm:$0x1] }
 0x547   : > { %4140 = vrot.lane.b32.xlu0 %v4118_v47, %s5624_s16  ;;  %v7765_v50 = vpop.permute.xlu1 %3881  ;;  %v8375_v47 = vld [vmem:[#allocation21_spill] sm:$0xff]  ;;  %v4208_v53 = vld [vmem:[#allocation2 + $0x101] sm:$0x1] }
 0x548   : > { %4138 = vrot.lane.b32.xlu2 %v4117_v39, %s5624_s16  ;;  %v2983_v49 = vadd.f32 %v8375_v47, %v2935_v59  ;;  %v3396_v39 = vld [vmem:[#allocation2 + $0x1ce] sm:$0x1]  ;;  %v3285_v59 = vadd.f32 %v8385_v54, %v3237_v33  ;;  %v8392_v47 = vld [vmem:[#allocation94_spill] sm:$0xff]  ;;  %v3338_v26 = vadd.f32 %v8397_v0, %v3290_v32  ;;  %v8403_v54 = vld [vmem:[#allocation44_spill] sm:$0xff] }
 0x549   : > { %v7745_v15 = vpop.permute.xlu0 %3879  ;;  %v8398_v33 = vld [vmem:[#allocation29_spill] sm:$0xff] }
 0x54a   : > { %v7767_v11 = vpop.permute.xlu2 %3927  ;;  %v3031_v21 = vadd.f32 %v8382_v63, %v2983_v49  ;;  %v3333_v8 = vadd.f32 %v8394_v34, %v3285_v59  ;;  %v4163_v63 = vld [vmem:[#allocation2 + $0x1a8] sm:$0x1]  ;;  %v3386_v12 = vadd.f32 %v8405_v2, %v3338_v26  ;;  %v3395_v34 = vld [vmem:[#allocation2 + $0x196] sm:$0x1]  ;;  %v8411_v0 = vld [vmem:[#allocation33_spill] sm:$0xff] }
 0x54b   : > { %v8419_v2 = vld [vmem:[#allocation26_spill] sm:$0xff] }
 0x54c   : > { %4180 = vrot.lane.b32.xlu1 %v4162_v18, %s5626_s26  ;;  %v3079_v23 = vadd.f32 %v8386_v51, %v3031_v21  ;;  %v3495_v18 = vadd.f32 %v8398_v33, %v3447_v48  ;;  %v8399_v21 = vld [vmem:[#allocation40_spill] sm:$0xff]  ;;  %v3381_v58 = vadd.f32 %v8401_v28, %v3333_v8  ;;  %v8412_v33 = vld [vmem:[#allocation102_spill] sm:$0xff] }
 0x54d   : > { %v8416_v28 = vld [vmem:[#allocation42_spill] sm:$0xff] }
 0x54e   : > { %v3096_v14 = vadd.f32 %v3088_v27, %v3079_v23  ;;  %v3543_v45 = vadd.f32 %v8406_v44, %v3495_v18  ;;  %v3394_v27 = vld [vmem:[#allocation2 + $0x15e] sm:$0x1]  ;;  %v8420_v44 = vld [vmem:[#allocation46_spill] sm:$0xff] }
 0x54f   : > { %4178 = vrot.lane.b32.xlu0 %v4161_v37, %s5626_s26  ;;  %v3404_v37 = vadd.f32 %v3396_v39, %v3387_v31  ;;  %v7789_v4 = vpop.permute.xlu1 %3919  ;;  %v3191_v31 = vadd.f32 %v8395_v42, %v3143_v38  ;;  %v3388_v38 = vadd.f32 %v8407_v30, %v3340_v36  ;;  %v3397_v42 = vld [vmem:[#allocation2 + $0x206] sm:$0x1]  ;;  %v8415_v36 = vld [vmem:[#allocation14_spill] sm:$0xff] }
 0x550   : > { %4176 = vrot.lane.b32.xlu2 %v4160_v56, %s5626_s26  ;;  %v4165_v56 = vld [vmem:[#allocation2 + $0x218] sm:$0x1]  ;;  %v8422_v30 = vld [vmem:[#allocation72_spill] sm:$0xff] }
 0x551   : > { %v7771_v19 = vpop.permute.xlu0 %3885  ;;  %v3452_v49 = vadd.f32 %v8392_v47, %v3404_v37  ;;  %v8404_v37 = vld [vmem:[#allocation59_spill] sm:$0xff]  ;;  %v3398_v47 = vadd.f32 %v3390_v25, %v3381_v58  ;;  %v3405_v18 = vadd.f32 %v3397_v42, %v3388_v38  ;;  %v8421_v25 = vld [vmem:[#allocation101_spill] sm:$0xff] }
 0x552   : > { %v7791_v17 = vpop.permute.xlu2 %3933  ;;  %v3385_v62 = vadd.f32 %v8404_v37, %v3337_v16  ;;  %v4166_v16 = vld [vmem:[#allocation2 + $0x250] sm:$0x1] }
 0x553   : > { %v3500_v41 = vadd.f32 %v7575_v13, %v3452_v49  ;;  %v8402_v13 = vld [vmem:[#allocation23_spill] sm:$0xff] }
 0x554   : > { %4186 = vrot.lane.b32.xlu1 %v4165_v56, %s5626_s26  ;;  %v3239_v39 = vadd.f32 %v8402_v13, %v3191_v31  ;;  %v8408_v49 = vld [vmem:[#allocation31_spill] sm:$0xff]  ;;  %v3402_v8 = vadd.f32 %v3394_v27, %v3385_v62  ;;  %v8410_v31 = vld [vmem:[#allocation37_spill] sm:$0xff]  ;;  %v4210_v56 = vld [vmem:[#allocation2 + $0x171] sm:$0x1] }
 0x555   : > { %v3548_v51 = vadd.f32 %v7569_v52, %v3500_v41  ;;  %v3591_v41 = vadd.f32 %v8410_v31, %v3543_v45  ;;  %v8417_v13 = vld [vmem:[#allocation105_spill] sm:$0xff]  ;;  %v8425_v27 = vld [vmem:[#allocation104_spill] sm:$0xff] }
 0x556   : > { %v3287_v52 = vadd.f32 %v8408_v49, %v3239_v39  ;;  %v3453_v39 = vadd.f32 %v8417_v13, %v3405_v18  ;;  %v4211_v31 = vld [vmem:[#allocation2 + $0x1a9] sm:$0x1] }
 0x557   : > { %4184 = vrot.lane.b32.xlu0 %v4164_v24, %s5626_s26  ;;  %v3144_v24 = vadd.f32 %v8399_v21, %v3096_v14  ;;  %v7816_v23 = vpop.permute.xlu1 %3925  ;;  %v3596_v48 = vadd.f32 %v7577_v22, %v3548_v51  ;;  %v3403_v14 = vadd.f32 %v3395_v34, %v3386_v12  ;;  %v8418_v51 = vld [vmem:[#allocation32_spill] sm:$0xff] }
 0x558   : > { %4182 = vrot.lane.b32.xlu2 %v4163_v63, %s5626_s26  ;;  %v3335_v26 = vadd.f32 %v8411_v0, %v3287_v52  ;;  %v8413_v63 = vld [vmem:[#allocation73_spill] sm:$0xff]  ;;  %v3639_v37 = vadd.f32 %v8418_v51, %v3591_v41  ;;  %v8424_v52 = vld [vmem:[#allocation18_spill] sm:$0xff]  ;;  %v3501_v34 = vadd.f32 %v8425_v27, %v3453_v39  ;;  %v4209_v41 = vld [vmem:[#allocation2 + $0x139] sm:$0x1] }
 0x559   : > { %v7796_v29 = vpop.permute.xlu0 %3923  ;;  %v3192_v59 = vadd.f32 %v8403_v54, %v3144_v24  ;;  %v3644_v22 = vadd.f32 %v8412_v33, %v3596_v48  ;;  %v3450_v21 = vadd.f32 %v8413_v63, %v3402_v8  ;;  %v8414_v24 = vld [vmem:[#allocation85_spill] sm:$0xff]  ;;  %v4213_v33 = vld [vmem:[#allocation2 + $0x219] sm:$0x1]  ;;  %v3696_v39 = vld [vmem:[#allocation2 + $0xf5] sm:$0x1] }
 0x55a   : > { %v7818_v5 = vpop.permute.xlu2 %3971  ;;  %v3451_v43 = vadd.f32 %v8414_v24, %v3403_v14  ;;  %v3383_v12 = vadd.f32 %v8419_v2, %v3335_v26  ;;  %v3701_v8 = vld [vmem:[#allocation2 + $0x20d] sm:$0x1]  ;;  %v8426_v14 = vld [vmem:[#allocation38_spill] sm:$0xff]  ;;  %v3393_v2 = vld [vmem:[#allocation2 + $0x126] sm:$0x1] }
 0x55b   : > { %v3240_v61 = vadd.f32 %v8409_v7, %v3192_v59  ;;  %v3692_v48 = vadd.f32 %v8421_v25, %v3644_v22  ;;  %v3498_v38 = vadd.f32 %v8422_v30, %v3450_v21  ;;  %v3687_v42 = vadd.f32 %v8426_v14, %v3639_v37  ;;  %v8428_v22 = vld [vmem:[#allocation76_spill] sm:$0xff]  ;;  %v8430_v21 = vld [vmem:[#allocation17_spill] sm:$0xff]  ;;  %v8440_v14 = vld [vmem:[#allocation107_spill] sm:$0xff] }
 0x55c   : > { %4224 = vrot.lane.b32.xlu1 %v4208_v53, %s5625_s28  ;;  %v8427_v53 = vld [vmem:[#allocation43_spill] sm:$0xff]  ;;  %v8435_v30 = vld [vmem:[#allocation117_spill] sm:$0xff] }
 0x55d   : > { %v3288_v58 = vadd.f32 %v8416_v28, %v3240_v61  ;;  %v3392_v61 = vld [vmem:[#allocation2 + $0xee] sm:$0x1]  ;;  %v3709_v26 = vadd.f32 %v3701_v8, %v3692_v48  ;;  %v3546_v18 = vadd.f32 %v8428_v22, %v3498_v38  ;;  %v8443_v22 = vld [vmem:[#allocation63_spill] sm:$0xff] }
 0x55e   : > { %v3400_v0 = vadd.f32 %v3392_v61, %v3383_v12  ;;  %v8434_v12 = vld [vmem:[#allocation78_spill] sm:$0xff]  ;;  %v8438_v61 = vld [vmem:[#allocation48_spill] sm:$0xff] }
 0x55f   : > { %4190 = vrot.lane.b32.xlu0 %v4167_v46, %s5626_s26  ;;  %v3446_v46 = vadd.f32 %v8415_v36, %v3398_v47  ;;  %v3932_v54 = vpop.permute.xlu1 %3931  ;;  %v3336_v45 = vadd.f32 %v8420_v44, %v3288_v58  ;;  %v8423_v47 = vld [vmem:[#allocation84_spill] sm:$0xff]  ;;  %v8433_v58 = vld [vmem:[#allocation109_spill] sm:$0xff]  ;;  %v3594_v44 = vadd.f32 %v8434_v12, %v3546_v18 }
 0x560   : > { %4188 = vrot.lane.b32.xlu2 %v4166_v16, %s5626_s26  ;;  %v3499_v49 = vadd.f32 %v8423_v47, %v3451_v43  ;;  %v8431_v43 = vld [vmem:[#allocation49_spill] sm:$0xff]  ;;  %v3757_v13 = vadd.f32 %v8433_v58, %v3709_v26  ;;  %v8436_v47 = vld [vmem:[#allocation88_spill] sm:$0xff] }
 0x561   : > { %v7823_v32 = vpop.permute.xlu0 %3929  ;;  %v3494_v7 = vadd.f32 %v8424_v52, %v3446_v46  ;;  %v3384_v16 = vadd.f32 %v8427_v53, %v3336_v45  ;;  %v3448_v36 = vadd.f32 %v8431_v43, %v3400_v0  ;;  %v8432_v46 = vld [vmem:[#allocation108_spill] sm:$0xff]  ;;  %v3704_v45 = vadd.f32 %v3696_v39, %v3687_v42  ;;  %v8441_v53 = vld [vmem:[#allocation75_spill] sm:$0xff] }
 0x562   : > { %v7840_v59 = vpop.permute.xlu2 %3977  ;;  %v3549_v28 = vadd.f32 %v8432_v46, %v3501_v34  ;;  %v3805_v38 = vadd.f32 %v8435_v30, %v3757_v13  ;;  %v8437_v52 = vld [vmem:[#allocation16_spill] sm:$0xff]  ;;  %v3642_v0 = vadd.f32 %v8441_v53, %v3594_v44  ;;  %v8449_v44 = vld [vmem:[#allocation50_spill] sm:$0xff]  ;;  %v8450_v30 = vld [vmem:[#allocation53_spill] sm:$0xff] }
 0x563   : > { %v3542_v24 = vadd.f32 %v8430_v21, %v3494_v7  ;;  %v3401_v48 = vadd.f32 %v3393_v2, %v3384_v16  ;;  %v3496_v27 = vadd.f32 %v8438_v61, %v3448_v36  ;;  %v8439_v34 = vld [vmem:[#allocation60_spill] sm:$0xff]  ;;  %v8444_v21 = vld [vmem:[#allocation87_spill] sm:$0xff] }
 0x564   : > { %4230 = vrot.lane.b32.xlu1 %v4211_v31, %s5625_s28  ;;  %v3597_v31 = vadd.f32 %v8440_v14, %v3549_v28  ;;  %v8442_v42 = vld [vmem:[#allocation52_spill] sm:$0xff]  ;;  %v8447_v28 = vld [vmem:[#allocation106_spill] sm:$0xff] }
 0x565   : > { %v3590_v7 = vadd.f32 %v8437_v52, %v3542_v24  ;;  %v3449_v8 = vadd.f32 %v8439_v34, %v3401_v48  ;;  %v3752_v26 = vadd.f32 %v8442_v42, %v3704_v45  ;;  %v4212_v16 = vld [vmem:[#allocation2 + $0x1e1] sm:$0x1]  ;;  %v8453_v34 = vld [vmem:[#allocation19_spill] sm:$0xff]  ;;  %v8454_v14 = vld [vmem:[#allocation110_spill] sm:$0xff] }
 0x566   : > { %v8445_v43 = vld [vmem:[#allocation20_spill] sm:$0xff]  ;;  %v3645_v58 = vadd.f32 %v8447_v28, %v3597_v31  ;;  %v4257_v42 = vld [vmem:[#allocation2 + $0x13a] sm:$0x1] }
 0x567   : > { %4228 = vrot.lane.b32.xlu0 %v4210_v56, %s5625_s28  ;;  %v8429_v56 = vld [vmem:[#allocation83_spill] sm:$0xff]  ;;  %v7863_v51 = vpop.permute.xlu1 %3969  ;;  %v3497_v18 = vadd.f32 %v8443_v22, %v3449_v8  ;;  %v3638_v36 = vadd.f32 %v8445_v43, %v3590_v7  ;;  %v3800_v45 = vadd.f32 %v8449_v44, %v3752_v26  ;;  %v8452_v7 = vld [vmem:[#allocation86_spill] sm:$0xff]  ;;  %v4215_v26 = vld [vmem:[#allocation2 + $0x289] sm:$0x1] }
 0x568   : > { %4226 = vrot.lane.b32.xlu2 %v4209_v41, %s5625_s28  ;;  %v3547_v63 = vadd.f32 %v8429_v56, %v3499_v49  ;;  %v3853_v41 = vadd.f32 %v7700_v6, %v3805_v38  ;;  %v8446_v6 = vld [vmem:[#allocation45_spill] sm:$0xff]  ;;  %v3699_v8 = vld [vmem:[#allocation2 + $0x19d] sm:$0x1]  ;;  %v3693_v31 = vadd.f32 %v8454_v14, %v3645_v58  ;;  %v8459_v44 = vld [vmem:[#allocation112_spill] sm:$0xff] }
 0x569   : > { %v7843_v62 = vpop.permute.xlu0 %3967  ;;  %v3544_v46 = vadd.f32 %v8446_v6, %v3496_v27  ;;  %v3848_v27 = vadd.f32 %v7668_v55, %v3800_v45  ;;  %v4259_v55 = vld [vmem:[#allocation2 + $0x1aa] sm:$0x1]  ;;  %v3702_v6 = vld [vmem:[#allocation2 + $0x245] sm:$0x1] }
 0x56a   : > { %v7865_v37 = vpop.permute.xlu2 %4032  ;;  %v3595_v49 = vadd.f32 %v8436_v47, %v3547_v63  ;;  %v3901_v56 = vadd.f32 %v7717_v10, %v3853_v41  ;;  %v4256_v63 = vld [vmem:[#allocation2 + $0x102] sm:$0x1]  ;;  %v8448_v10 = vld [vmem:[#allocation79_spill] sm:$0xff]  ;;  %v8451_v47 = vld [vmem:[#allocation62_spill] sm:$0xff]  ;;  %v3710_v28 = vadd.f32 %v3702_v6, %v3693_v31 }
 0x56b   : > { %v3690_v12 = vadd.f32 %v8448_v10, %v3642_v0  ;;  %v3592_v38 = vadd.f32 %v8450_v30, %v3544_v46  ;;  %v4006_v41 = vld [vmem:[#allocation2 + $0x24c] sm:$0x1]  ;;  %v3896_v0 = vadd.f32 %v7722_v57, %v3848_v27  ;;  %v8458_v10 = vld [vmem:[#allocation103_spill] sm:$0xff]  ;;  %v8465_v31 = vld [vmem:[#allocation116_spill] sm:$0xff] }
 0x56c   : > { %v3643_v24 = vadd.f32 %v8444_v21, %v3595_v49  ;;  %v3949_v13 = vadd.f32 %v3932_v54, %v3901_v56  ;;  %v3545_v49 = vadd.f32 %v8451_v47, %v3497_v18  ;;  %v3686_v54 = vadd.f32 %v8453_v34, %v3638_v36  ;;  %v8456_v18 = vld [vmem:[#allocation61_spill] sm:$0xff]  ;;  %v3695_v21 = vld [vmem:[#allocation2 + $0xbd] sm:$0x1]  ;;  %v8469_v6 = vld [vmem:[#allocation66_spill] sm:$0xff] }
 0x56d   : > { %v3707_v53 = vadd.f32 %v3699_v8, %v3690_v12  ;;  %v3944_v57 = vadd.f32 %v7740_v60, %v3896_v0  ;;  %v8460_v47 = vld [vmem:[#allocation65_spill] sm:$0xff] }
 0x56e   : > { %v3691_v61 = vadd.f32 %v8452_v7, %v3643_v24  ;;  %v3593_v56 = vadd.f32 %v8456_v18, %v3545_v49  ;;  %v8457_v24 = vld [vmem:[#allocation89_spill] sm:$0xff]  ;;  %v3703_v46 = vadd.f32 %v3695_v21, %v3686_v54  ;;  %v8464_v54 = vld [vmem:[#allocation34_spill] sm:$0xff] }
 0x56f   : > { %4234 = vrot.lane.b32.xlu0 %v4213_v33, %s5625_s28  ;;  %v4214_v33 = vld [vmem:[#allocation2 + $0x251] sm:$0x1]  ;;  %v7888_v39 = vpop.permute.xlu1 %3975  ;;  %v3755_v43 = vadd.f32 %v8457_v24, %v3707_v53  ;;  %v8463_v27 = vld [vmem:[#allocation113_spill] sm:$0xff]  ;;  %v4001_v53 = vld [vmem:[#allocation2 + $0x134] sm:$0x1] }
 0x570   : > { %4236 = vrot.lane.b32.xlu1 %v4214_v33, %s5625_s28  ;;  %4232 = vrot.lane.b32.xlu2 %v4212_v16, %s5625_s28  ;;  %v8455_v16 = vld [vmem:[#allocation51_spill] sm:$0xff]  ;;  %v3641_v49 = vadd.f32 %v8460_v47, %v3593_v56  ;;  %v3751_v8 = vadd.f32 %v8464_v54, %v3703_v46  ;;  %v3697_v0 = vld [vmem:[#allocation2 + $0x12d] sm:$0x1]  ;;  %v4258_v18 = vld [vmem:[#allocation2 + $0x172] sm:$0x1] }
 0x571   : > { %v7868_v25 = vpop.permute.xlu0 %3973  ;;  %v3640_v22 = vadd.f32 %v8455_v16, %v3592_v38  ;;  %v3803_v45 = vadd.f32 %v8459_v44, %v3755_v43  ;;  %v4263_v54 = vld [vmem:[#allocation2 + $0x28a] sm:$0x1] }
 0x572   : > { %v7890_v2 = vpop.permute.xlu2 %4038 }
 0x573   : > { %v3851_v14 = vadd.f32 %v7678_v35, %v3803_v45  ;;  %v4262_v35 = vld [vmem:[#allocation2 + $0x252] sm:$0x1] }
 0x577   : > { %4272 = vrot.lane.b32.xlu0 %v4256_v63, %s5627_s7  ;;  %v3700_v63 = vld [vmem:[#allocation2 + $0x1d5] sm:$0x1]  ;;  %v3982_v58 = vpop.permute.xlu1 %3981 }
 0x578   : > { %4274 = vrot.lane.b32.xlu1 %v4257_v42, %s5627_s7  ;;  %4238 = vrot.lane.b32.xlu2 %v4215_v26, %s5625_s28  ;;  %v3708_v36 = vadd.f32 %v3700_v63, %v3691_v61  ;;  %v8462_v61 = vld [vmem:[#allocation115_spill] sm:$0xff]  ;;  %v3899_v26 = vadd.f32 %v7745_v15, %v3851_v14 }
 0x579   : > { %v3980_v48 = vpop.permute.xlu0 %3979  ;;  %v3758_v60 = vadd.f32 %v8462_v61, %v3710_v28  ;;  %v4261_v14 = vld [vmem:[#allocation2 + $0x21a] sm:$0x1] }
 0x57a   : > { %v3997_v52 = vadd.f32 %v3980_v48, %v3949_v13  ;;  %v4045_v13 = vpop.permute.xlu2 %4044  ;;  %v3756_v12 = vadd.f32 %v8458_v10, %v3708_v36  ;;  %v3992_v48 = vadd.f32 %v7863_v51, %v3944_v57  ;;  %v8466_v51 = vld [vmem:[#allocation120_spill] sm:$0xff]  ;;  %v3947_v36 = vadd.f32 %v7767_v11, %v3899_v26  ;;  %v8471_v11 = vld [vmem:[#allocation111_spill] sm:$0xff] }
 0x57c   : > { %v4014_v33 = vadd.f32 %v4006_v41, %v3997_v52  ;;  %v8461_v52 = vld [vmem:[#allocation47_spill] sm:$0xff]  ;;  %v3804_v34 = vadd.f32 %v8463_v27, %v3756_v12  ;;  %v3806_v41 = vadd.f32 %v8465_v31, %v3758_v60  ;;  %v4009_v16 = vadd.f32 %v4001_v53, %v3992_v48  ;;  %v3698_v48 = vld [vmem:[#allocation2 + $0x165] sm:$0x1] }
 0x57d   : > { %v3688_v7 = vadd.f32 %v8461_v52, %v3640_v22  ;;  %v8467_v22 = vld [vmem:[#allocation64_spill] sm:$0xff]  ;;  %v3995_v44 = vadd.f32 %v7888_v39, %v3947_v36  ;;  %v4004_v27 = vld [vmem:[#allocation2 + $0x1dc] sm:$0x1] }
 0x57e   : > { %v7911_v30 = vadd.f32 %v4045_v13, %v4014_v33  ;;  %v3852_v42 = vadd.f32 %v8466_v51, %v3804_v34  ;;  %v4260_v33 = vld [vmem:[#allocation2 + $0x1e2] sm:$0x1]  ;;  %v3689_v56 = vadd.f32 %v8467_v22, %v3641_v49  ;;  %v3854_v21 = vadd.f32 %v7715_v40, %v3806_v41  ;;  %v8470_v13 = vld [vmem:[#allocation119_spill] sm:$0xff] }
 0x57f   : > { %4278 = vrot.lane.b32.xlu0 %v4259_v55, %s5627_s7  ;;  %v3705_v63 = vadd.f32 %v3697_v0, %v3688_v7  ;;  %v8468_v55 = vld [vmem:[#allocation39_spill] sm:$0xff]  ;;  %v4037_v28 = vpop.permute.xlu1 %4036  ;;  %v8472_v7 = vld [vmem:[#allocation118_spill] sm:$0xff] }
 0x580   : > { %4280 = vrot.lane.b32.xlu1 %v4260_v33, %s5627_s7  ;;  %4276 = vrot.lane.b32.xlu2 %v4258_v18, %s5627_s7  ;;  %v3799_v24 = vadd.f32 %v8468_v55, %v3751_v8  ;;  %v3900_v43 = vadd.f32 %v7765_v50, %v3852_v42  ;;  %v3902_v57 = vadd.f32 %v7771_v19, %v3854_v21 }
 0x581   : > { %v4035_v38 = vpop.permute.xlu0 %4034  ;;  %v3753_v46 = vadd.f32 %v8469_v6, %v3705_v63  ;;  %v3706_v49 = vadd.f32 %v3698_v48, %v3689_v56  ;;  %v4012_v8 = vadd.f32 %v4004_v27, %v3995_v44  ;;  %v4000_v63 = vld [vmem:[#allocation2 + $0xfc] sm:$0x1]  ;;  %v4326_v44 = vld [vmem:[#allocation2 + $0x254] sm:$0x1] }
 0x582   : > { %v4057_v15 = vadd.f32 %v4035_v38, %v4009_v16  ;;  %v4083_v40 = vpop.permute.xlu2 %4082  ;;  %v3847_v10 = vadd.f32 %v8470_v13, %v3799_v24  ;;  %v3948_v12 = vadd.f32 %v7823_v32, %v3900_v43  ;;  %v3950_v47 = vadd.f32 %v7791_v17, %v3902_v57  ;;  %v8473_v32 = vld [vmem:[#allocation77_spill] sm:$0xff]  ;;  %v4005_v17 = vld [vmem:[#allocation2 + $0x214] sm:$0x1]  ;;  %v4321_v43 = vld [vmem:[#allocation2 + $0x13c] sm:$0x1] }
 0x583   : > { %v3801_v38 = vadd.f32 %v8471_v11, %v3753_v46  ;;  %v3754_v34 = vadd.f32 %v8473_v32, %v3706_v49  ;;  %v4002_v24 = vld [vmem:[#allocation2 + $0x16c] sm:$0x1]  ;;  %v4003_v13 = vld [vmem:[#allocation2 + $0x1a4] sm:$0x1] }
 0x584   : > { %v7935_v45 = vadd.f32 %v4083_v40, %v4057_v15  ;;  %v3895_v52 = vadd.f32 %v7680_v20, %v3847_v10  ;;  %v3996_v19 = vadd.f32 %v7840_v59, %v3948_v12  ;;  %v3998_v60 = vadd.f32 %v3982_v58, %v3950_v47  ;;  %v4322_v20 = vld [vmem:[#allocation2 + $0x174] sm:$0x1] }
 0x585   : > { %v3849_v61 = vadd.f32 %v8472_v7, %v3801_v38  ;;  %v8474_v59 = vld [vmem:[#allocation114_spill] sm:$0xff]  ;;  %v4371_v7 = vld [vmem:[#allocation2 + $0x1ad] sm:$0x1] }
 0x586   : > { %v3943_v39 = vadd.f32 %v7789_v4, %v3895_v52  ;;  %v3802_v41 = vadd.f32 %v8474_v59, %v3754_v34  ;;  %v4013_v53 = vadd.f32 %v4005_v17, %v3996_v19  ;;  %v4007_v4 = vld [vmem:[#allocation2 + $0x284] sm:$0x1]  ;;  %v4369_v52 = vld [vmem:[#allocation2 + $0x13d] sm:$0x1]  ;;  %v4327_v19 = vld [vmem:[#allocation2 + $0x28c] sm:$0x1] }
 0x587   : > { %4284 = vrot.lane.b32.xlu0 %v4262_v35, %s5627_s7  ;;  %v3897_v31 = vadd.f32 %v7738_v9, %v3849_v61  ;;  %v4043_v42 = vpop.permute.xlu1 %4042  ;;  %v4015_v9 = vadd.f32 %v4007_v4, %v3998_v60 }
 0x588   : > { %4286 = vrot.lane.b32.xlu1 %v4263_v54, %s5627_s7  ;;  %4282 = vrot.lane.b32.xlu2 %v4261_v14, %s5627_s7  ;;  %v3991_v58 = vadd.f32 %v7843_v62, %v3943_v39  ;;  %v3850_v33 = vadd.f32 %v7683_v3, %v3802_v41  ;;  %v4061_v16 = vadd.f32 %v4043_v42, %v4013_v53  ;;  %v4325_v3 = vld [vmem:[#allocation2 + $0x21c] sm:$0x1]  ;;  %v4372_v39 = vld [vmem:[#allocation2 + $0x1e5] sm:$0x1]  ;;  %v4370_v54 = vld [vmem:[#allocation2 + $0x175] sm:$0x1] }
 0x589   : > { %v4041_v50 = vpop.permute.xlu0 %4040  ;;  %v3945_v51 = vadd.f32 %v7796_v29, %v3897_v31  ;;  %v4323_v29 = vld [vmem:[#allocation2 + $0x1ac] sm:$0x1]  ;;  %v4417_v53 = vld [vmem:[#allocation2 + $0x13e] sm:$0x1] }
 0x58a   : > { %v4060_v0 = vadd.f32 %v4041_v50, %v4012_v8  ;;  %v4089_v26 = vpop.permute.xlu2 %4088  ;;  %v3898_v21 = vadd.f32 %v7696_v1, %v3850_v33  ;;  %v4008_v35 = vadd.f32 %v4000_v63, %v3991_v58  ;;  %v4324_v50 = vld [vmem:[#allocation2 + $0x1e4] sm:$0x1]  ;;  %v4374_v8 = vld [vmem:[#allocation2 + $0x255] sm:$0x1]  ;;  %v4373_v58 = vld [vmem:[#allocation2 + $0x21d] sm:$0x1] }
 0x58b   : > { %v3993_v56 = vadd.f32 %v7818_v5, %v3945_v51  ;;  %v4376_v33 = vld [vmem:[#allocation2 + $0x2c5] sm:$0x1] }
 0x58c   : > { %v7952_v18 = vadd.f32 %v4089_v26, %v4060_v0  ;;  %v3946_v55 = vadd.f32 %v7816_v23, %v3898_v21  ;;  %v4056_v15 = vadd.f32 %v7865_v37, %v4008_v35  ;;  %v4328_v37 = vld [vmem:[#allocation2 + $0x2c4] sm:$0x1] }
 0x58d   : > { %v4010_v36 = vadd.f32 %v4002_v24, %v3993_v56  ;;  %v4423_v24 = vld [vmem:[#allocation2 + $0x28e] sm:$0x1] }
 0x58e   : > { %v3994_v5 = vadd.f32 %v7868_v25, %v3946_v55  ;;  %v4421_v55 = vld [vmem:[#allocation2 + $0x21e] sm:$0x1] }
 0x58f   : > { %4339 = vrot.lane.b32.xlu0 %v4322_v20, %s5623_s13  ;;  %v4058_v6 = vadd.f32 %v4037_v28, %v4010_v36  ;;  %v4081_v1 = vpop.permute.xlu1 %4080 }
 0x590   : > { %4341 = vrot.lane.b32.xlu1 %v4323_v29, %s5623_s13  ;;  %4337 = vrot.lane.b32.xlu2 %v4321_v43, %s5623_s13  ;;  %v4104_v57 = vadd.f32 %v4081_v1, %v4056_v15  ;;  %v4011_v12 = vadd.f32 %v4003_v13, %v3994_v5  ;;  %v4422_v1 = vld [vmem:[#allocation2 + $0x256] sm:$0x1] }
 0x591   : > { %v4047_v22 = vpop.permute.xlu0 %4046 }
 0x592   : > { %v4063_v62 = vadd.f32 %v4047_v22, %v4015_v9  ;;  %v4095_v46 = vpop.permute.xlu2 %4094  ;;  %v4059_v25 = vadd.f32 %v7890_v2, %v4011_v12 }
 0x594   : > { %v4111_v23 = vadd.f32 %v4095_v46, %v4063_v62  ;;  %v4466_v46 = vld [vmem:[#allocation2 + $0x177] sm:$0x1] }
 0x597   : > { %4345 = vrot.lane.b32.xlu0 %v4325_v3, %s5623_s13  ;;  %v4087_v28 = vpop.permute.xlu1 %4086 }
 0x598   : > { %4347 = vrot.lane.b32.xlu1 %v4326_v44, %s5623_s13  ;;  %4343 = vrot.lane.b32.xlu2 %v4324_v50, %s5623_s13  ;;  %v4107_v11 = vadd.f32 %v4087_v28, %v4059_v25  ;;  %v4467_v44 = vld [vmem:[#allocation2 + $0x1af] sm:$0x1]  ;;  %v4465_v50 = vld [vmem:[#allocation2 + $0x13f] sm:$0x1] }
 0x599   : > { %v4085_v40 = vpop.permute.xlu0 %4084 }
 0x59a   : > { %v4106_v10 = vadd.f32 %v4085_v40, %v4058_v6  ;;  %v4133_v48 = vpop.permute.xlu2 %4132  ;;  %v4424_v6 = vld [vmem:[#allocation2 + $0x2c6] sm:$0x1] }
 0x59c   : > { %v4154_v38 = vadd.f32 %v4133_v48, %v4106_v10 }
 0x59f   : > { %4351 = vrot.lane.b32.xlu0 %v4328_v37, %s5623_s13  ;;  %v4093_v61 = vpop.permute.xlu1 %4092  ;;  %v4469_v37 = vld [vmem:[#allocation2 + $0x21f] sm:$0x1] }
 0x5a0   : > { %4385 = vrot.lane.b32.xlu1 %v4369_v52, %s5622_s25  ;;  %4349 = vrot.lane.b32.xlu2 %v4327_v19, %s5623_s13  ;;  %v4110_v2 = vadd.f32 %v4093_v61, %v7911_v30  ;;  %v4375_v30 = vld [vmem:[#allocation2 + $0x28d] sm:$0x1]  ;;  %v4468_v52 = vld [vmem:[#allocation2 + $0x1e7] sm:$0x1] }
 0x5a1   : > { %v4091_v47 = vpop.permute.xlu0 %4090  ;;  %v4472_v19 = vld [vmem:[#allocation2 + $0x2c7] sm:$0x1] }
 0x5a2   : > { %v4109_v49 = vadd.f32 %v4091_v47, %v4061_v16  ;;  %v4139_v60 = vpop.permute.xlu2 %4138  ;;  %v4420_v16 = vld [vmem:[#allocation2 + $0x1e6] sm:$0x1] }
 0x5a4   : > { %v4157_v27 = vadd.f32 %v4139_v60, %v4109_v49  ;;  %v4470_v49 = vld [vmem:[#allocation2 + $0x257] sm:$0x1] }
 0x5a7   : > { %4389 = vrot.lane.b32.xlu0 %v4371_v7, %s5622_s25  ;;  %v4131_v14 = vpop.permute.xlu1 %4130 }
 0x5a8   : > { %4391 = vrot.lane.b32.xlu1 %v4372_v39, %s5622_s25  ;;  %4387 = vrot.lane.b32.xlu2 %v4370_v54, %s5622_s25  ;;  %v4153_v17 = vadd.f32 %v4131_v14, %v7935_v45  ;;  %v4418_v45 = vld [vmem:[#allocation2 + $0x176] sm:$0x1]  ;;  %v4471_v39 = vld [vmem:[#allocation2 + $0x28f] sm:$0x1]  ;;  %v4515_v54 = vld [vmem:[#allocation2 + $0x1b0] sm:$0x1] }
 0x5a9   : > { %v4129_v32 = vpop.permute.xlu0 %4128 }
 0x5aa   : > { %v4152_v34 = vadd.f32 %v4129_v32, %v4104_v57  ;;  %v4177_v31 = vpop.permute.xlu2 %4176 }
 0x5ac   : > { %v4200_v20 = vadd.f32 %v4177_v31, %v4152_v34  ;;  %v4513_v34 = vld [vmem:[#allocation2 + $0x140] sm:$0x1] }
 0x5af   : > { %4395 = vrot.lane.b32.xlu0 %v4374_v8, %s5622_s25  ;;  %v4137_v0 = vpop.permute.xlu1 %4136 }
 0x5b0   : > { %4397 = vrot.lane.b32.xlu1 %v4375_v30, %s5622_s25  ;;  %4393 = vrot.lane.b32.xlu2 %v4373_v58, %s5622_s25  ;;  %v4156_v51 = vadd.f32 %v4137_v0, %v7952_v18  ;;  %v4419_v18 = vld [vmem:[#allocation2 + $0x1ae] sm:$0x1]  ;;  %v4516_v30 = vld [vmem:[#allocation2 + $0x1e8] sm:$0x1]  ;;  %v4514_v58 = vld [vmem:[#allocation2 + $0x178] sm:$0x1] }
 0x5b1   : > { %v4135_v59 = vpop.permute.xlu0 %4134  ;;  %v4518_v0 = vld [vmem:[#allocation2 + $0x258] sm:$0x1] }
 0x5b2   : > { %v4155_v41 = vadd.f32 %v4135_v59, %v4107_v11  ;;  %v4183_v4 = vpop.permute.xlu2 %4182 }
 0x5b4   : > { %v4203_v42 = vadd.f32 %v4183_v4, %v4155_v41  ;;  %v4305_v41 = vld [vmem:[#allocation2 + $0x13b] sm:$0x1] }
 0x5b7   : > { %4433 = vrot.lane.b32.xlu0 %v4417_v53, %s5624_s16  ;;  %v4143_v22 = vpop.permute.xlu1 %4142 }
 0x5b8   : > { %4435 = vrot.lane.b32.xlu1 %v4418_v45, %s5624_s16  ;;  %4399 = vrot.lane.b32.xlu2 %v4376_v33, %s5622_s25  ;;  %v4159_v63 = vadd.f32 %v4143_v22, %v4111_v23  ;;  %v4308_v33 = vld [vmem:[#allocation2 + $0x1e3] sm:$0x1]  ;;  %v4517_v22 = vld [vmem:[#allocation2 + $0x220] sm:$0x1] }
 0x5b9   : > { %v4141_v26 = vpop.permute.xlu0 %4140 }
 0x5ba   : > { %v4158_v9 = vadd.f32 %v4141_v26, %v4110_v2  ;;  %v4189_v56 = vpop.permute.xlu2 %4188 }
 0x5bc   : > { %v4206_v62 = vadd.f32 %v4189_v56, %v4158_v9 }
 0x5bf   : > { %4439 = vrot.lane.b32.xlu0 %v4420_v16, %s5624_s16  ;;  %v4181_v29 = vpop.permute.xlu1 %4180  ;;  %v4519_v16 = vld [vmem:[#allocation2 + $0x290] sm:$0x1] }
 0x5c0   : > { %4441 = vrot.lane.b32.xlu1 %v4421_v55, %s5624_s16  ;;  %4437 = vrot.lane.b32.xlu2 %v4419_v18, %s5624_s16  ;;  %v4202_v36 = vadd.f32 %v4181_v29, %v4154_v38  ;;  %v4311_v29 = vld [vmem:[#allocation2 + $0x28b] sm:$0x1] }
 0x5c1   : > { %v4179_v21 = vpop.permute.xlu0 %4178 }
 0x5c2   : > { %v4201_v35 = vadd.f32 %v4179_v21, %v4153_v17  ;;  %v4227_v43 = vpop.permute.xlu2 %4226 }
 0x5c4   : > { %v4249_v3 = vadd.f32 %v4227_v43, %v4201_v35  ;;  %v4562_v43 = vld [vmem:[#allocation2 + $0x179] sm:$0x1] }
 0x5c7   : > { %4445 = vrot.lane.b32.xlu0 %v4423_v24, %s5624_s16  ;;  %v4187_v57 = vpop.permute.xlu1 %4186 }
 0x5c8   : > { %4447 = vrot.lane.b32.xlu1 %v4424_v6, %s5624_s16  ;;  %4443 = vrot.lane.b32.xlu2 %v4422_v1, %s5624_s16  ;;  %v4205_v40 = vadd.f32 %v4187_v57, %v4157_v27 }
 0x5c9   : > { %v4185_v15 = vpop.permute.xlu0 %4184 }
 0x5ca   : > { %v4204_v5 = vadd.f32 %v4185_v15, %v4156_v51  ;;  %v4233_v23 = vpop.permute.xlu2 %4232  ;;  %v4564_v15 = vld [vmem:[#allocation2 + $0x1e9] sm:$0x1] }
 0x5cc   : > { %v7987_v13 = vadd.f32 %v4233_v23, %v4204_v5  ;;  %v4306_v5 = vld [vmem:[#allocation2 + $0x173] sm:$0x1] }
 0x5cf   : > { %4483 = vrot.lane.b32.xlu0 %v4466_v46, %s5626_s26  ;;  %v4225_v25 = vpop.permute.xlu1 %4224 }
 0x5d0   : > { %4485 = vrot.lane.b32.xlu1 %v4467_v44, %s5626_s26  ;;  %4481 = vrot.lane.b32.xlu2 %v4465_v50, %s5626_s26  ;;  %v4248_v48 = vadd.f32 %v4225_v25, %v4200_v20  ;;  %v4307_v44 = vld [vmem:[#allocation2 + $0x1ab] sm:$0x1]  ;;  %v4567_v50 = vld [vmem:[#allocation2 + $0x291] sm:$0x1]  ;;  %v4309_v25 = vld [vmem:[#allocation2 + $0x21b] sm:$0x1] }
 0x5d1   : > { %v4191_v10 = vpop.permute.xlu0 %4190 }
 0x5d2   : > { %v4207_v12 = vadd.f32 %v4191_v10, %v4159_v63  ;;  %v4239_v28 = vpop.permute.xlu2 %4238  ;;  %v4561_v63 = vld [vmem:[#allocation2 + $0x141] sm:$0x1] }
 0x5d3   : > { %v4565_v10 = vld [vmem:[#allocation2 + $0x221] sm:$0x1] }
 0x5d4   : > { %v7992_v11 = vadd.f32 %v4239_v28, %v4207_v12  ;;  %v4563_v12 = vld [vmem:[#allocation2 + $0x1b1] sm:$0x1] }
 0x5d7   : > { %4489 = vrot.lane.b32.xlu0 %v4469_v37, %s5626_s26  ;;  %v4231_v7 = vpop.permute.xlu1 %4230 }
 0x5d8   : > { %4491 = vrot.lane.b32.xlu1 %v4470_v49, %s5626_s26  ;;  %4487 = vrot.lane.b32.xlu2 %v4468_v52, %s5626_s26  ;;  %v4251_v60 = vadd.f32 %v4231_v7, %v4203_v42  ;;  %v4566_v7 = vld [vmem:[#allocation2 + $0x259] sm:$0x1] }
 0x5d9   : > { %v4229_v38 = vpop.permute.xlu0 %4228 }
 0x5da   : > { %v4250_v47 = vadd.f32 %v4229_v38, %v4202_v36  ;;  %v4277_v61 = vpop.permute.xlu2 %4276  ;;  %v4520_v36 = vld [vmem:[#allocation2 + $0x2c8] sm:$0x1] }
 0x5dc   : > { %v7997_v2 = vadd.f32 %v4277_v61, %v4250_v47  ;;  %v4310_v61 = vld [vmem:[#allocation2 + $0x253] sm:$0x1] }
 0x5de   : > { %v4315_v37 = vadd.f32 %v4307_v44, %v7997_v2 }
 0x5df   : > { %4495 = vrot.lane.b32.xlu0 %v4472_v19, %s5626_s26  ;;  %v4568_v19 = vld [vmem:[#allocation2 + $0x2c9] sm:$0x1] }
 0x5e0   : > { %4529 = vrot.lane.b32.xlu1 %v4513_v34, %s5625_s28  ;;  %4493 = vrot.lane.b32.xlu2 %v4471_v39, %s5626_s26 }
 0x5e1   : > { %v4235_v27 = vpop.permute.xlu0 %4234 }
 0x5e2   : > { %v4253_v32 = vadd.f32 %v4235_v27, %v4205_v40  ;;  %v4237_v8 = vpop.permute.xlu1 %4236  ;;  %v4283_v14 = vpop.permute.xlu2 %4282  ;;  %v4312_v27 = vld [vmem:[#allocation2 + $0x2c3] sm:$0x1] }
 0x5e3   : > { %v4254_v31 = vadd.f32 %v4237_v8, %v4206_v62 }
 0x5e4   : > { %v8002_v17 = vadd.f32 %v4283_v14, %v4253_v32 }
 0x5e6   : > { %v4318_v2 = vadd.f32 %v4310_v61, %v8002_v17 }
 0x5e7   : > { %4533 = vrot.lane.b32.xlu0 %v4515_v54, %s5625_s28 }
 0x5e8   : > { %4535 = vrot.lane.b32.xlu1 %v4516_v30, %s5625_s28  ;;  %4531 = vrot.lane.b32.xlu2 %v4514_v58, %s5625_s28 }
 0x5e9   : > { %v4273_v20 = vpop.permute.xlu0 %4272 }
 0x5ea   : > { %v4296_v59 = vadd.f32 %v4273_v20, %v4248_v48  ;;  %v4275_v4 = vpop.permute.xlu1 %4274  ;;  %v4338_v51 = vpop.permute.xlu2 %4337  ;;  %v4628_v20 = vld [vmem:[#allocation2 + $0x1eb] sm:$0x1] }
 0x5eb   : > { %v4297_v42 = vadd.f32 %v4275_v4, %v4249_v3 }
 0x5ec   : > { %v4313_v53 = vadd.f32 %v4305_v41, %v4296_v59  ;;  %v4626_v59 = vld [vmem:[#allocation2 + $0x17b] sm:$0x1] }
 0x5ed   : > { %v4314_v46 = vadd.f32 %v4306_v5, %v4297_v42  ;;  %v4630_v41 = vld [vmem:[#allocation2 + $0x25b] sm:$0x1]  ;;  %v4629_v42 = vld [vmem:[#allocation2 + $0x223] sm:$0x1] }
 0x5ee   : > { %v8007_v26 = vadd.f32 %v4338_v51, %v4313_v53  ;;  %v4631_v51 = vld [vmem:[#allocation2 + $0x293] sm:$0x1] }
 0x5ef   : > { %4539 = vrot.lane.b32.xlu0 %v4518_v0, %s5625_s28 }
 0x5f0   : > { %4541 = vrot.lane.b32.xlu1 %v4519_v16, %s5625_s28  ;;  %4537 = vrot.lane.b32.xlu2 %v4517_v22, %s5625_s28 }
 0x5f1   : > { %v4279_v9 = vpop.permute.xlu0 %4278 }
 0x5f2   : > { %v4299_v45 = vadd.f32 %v4279_v9, %v4251_v60  ;;  %v4281_v62 = vpop.permute.xlu1 %4280  ;;  %v4344_v21 = vpop.permute.xlu2 %4343  ;;  %v4627_v60 = vld [vmem:[#allocation2 + $0x1b3] sm:$0x1]  ;;  %v4633_v9 = vld [vmem:[#allocation2 + $0x303] sm:$0x1] }
 0x5f3   : > { %v4300_v35 = vadd.f32 %v4281_v62, %v7987_v13  ;;  %v4632_v62 = vld [vmem:[#allocation2 + $0x2cb] sm:$0x1] }
 0x5f4   : > { %v4316_v56 = vadd.f32 %v4308_v33, %v4299_v45 }
 0x5f6   : > { %v8013_v55 = vadd.f32 %v4344_v21, %v4316_v56  ;;  %v4676_v21 = vld [vmem:[#allocation2 + $0x1ec] sm:$0x1] }
 0x5f7   : > { %4577 = vrot.lane.b32.xlu0 %v4561_v63, %s5627_s7 }
 0x5f8   : > { %4579 = vrot.lane.b32.xlu1 %v4562_v43, %s5627_s7  ;;  %4543 = vrot.lane.b32.xlu2 %v4520_v36, %s5625_s28 }
 0x5f9   : > { %v4285_v18 = vpop.permute.xlu0 %4284 }
 0x5fa   : > { %v4302_v24 = vadd.f32 %v4285_v18, %v4254_v31  ;;  %v4287_v6 = vpop.permute.xlu1 %4286  ;;  %v4350_v1 = vpop.permute.xlu2 %4349 }
 0x5fb   : > { %v4303_v57 = vadd.f32 %v4287_v6, %v7992_v11  ;;  %v4317_v11 = vadd.f32 %v4309_v25, %v4300_v35 }
 0x5fc   : > { %v4319_v3 = vadd.f32 %v4311_v29, %v4302_v24 }
 0x5fd   : > { %v4320_v39 = vadd.f32 %v4312_v27, %v4303_v57  ;;  %v4728_v27 = vld [vmem:[#allocation2 + $0x2cd] sm:$0x1] }
 0x5fe   : > { %v8019_v23 = vadd.f32 %v4350_v1, %v4319_v3  ;;  %v4675_v3 = vld [vmem:[#allocation2 + $0x1b4] sm:$0x1] }
 0x5ff   : > { %4583 = vrot.lane.b32.xlu0 %v4564_v15, %s5627_s7  ;;  %v4679_v15 = vld [vmem:[#allocation2 + $0x294] sm:$0x1] }
 0x600   : > { %4585 = vrot.lane.b32.xlu1 %v4565_v10, %s5627_s7  ;;  %4581 = vrot.lane.b32.xlu2 %v4563_v12, %s5627_s7  ;;  %v4722_v10 = vld [vmem:[#allocation2 + $0x17d] sm:$0x1] }
 0x601   : > { %v4340_v40 = vpop.permute.xlu0 %4339 }
 0x602   : > { %v4362_v13 = vadd.f32 %v4340_v40, %v4314_v46  ;;  %v4342_v28 = vpop.permute.xlu1 %4341  ;;  %v4388_v48 = vpop.permute.xlu2 %4387 }
 0x603   : > { %v4363_v38 = vadd.f32 %v4342_v28, %v4315_v37 }
 0x604   : > { %v8025_v47 = vadd.f32 %v4388_v48, %v4362_v13  ;;  %v4678_v13 = vld [vmem:[#allocation2 + $0x25c] sm:$0x1]  ;;  %v4723_v48 = vld [vmem:[#allocation2 + $0x1b5] sm:$0x1] }
 0x607   : > { %4589 = vrot.lane.b32.xlu0 %v4567_v50, %s5627_s7 }
 0x608   : > { %4591 = vrot.lane.b32.xlu1 %v4568_v19, %s5627_s7  ;;  %4587 = vrot.lane.b32.xlu2 %v4566_v7, %s5627_s7 }
 0x609   : > { %v4346_v49 = vpop.permute.xlu0 %4345 }
 0x60a   : > { %v4365_v52 = vadd.f32 %v4346_v49, %v4317_v11  ;;  %v4348_v32 = vpop.permute.xlu1 %4347  ;;  %v4394_v34 = vpop.permute.xlu2 %4393  ;;  %v4681_v11 = vld [vmem:[#allocation2 + $0x304] sm:$0x1] }
 0x60b   : > { %v4366_v54 = vadd.f32 %v4348_v32, %v4318_v2  ;;  %v4724_v2 = vld [vmem:[#allocation2 + $0x1ed] sm:$0x1] }
 0x60c   : > { %v4413_v8 = vadd.f32 %v4394_v34, %v4365_v52 }
 0x60f   : > { %4644 = vrot.lane.b32.xlu0 %v4627_v60, %s5623_s13  ;;  %v4726_v60 = vld [vmem:[#allocation2 + $0x25d] sm:$0x1] }
 0x610   : > { %4646 = vrot.lane.b32.xlu1 %v4628_v20, %s5623_s13  ;;  %4642 = vrot.lane.b32.xlu2 %v4626_v59, %s5623_s13  ;;  %v4727_v20 = vld [vmem:[#allocation2 + $0x295] sm:$0x1]  ;;  %v4771_v59 = vld [vmem:[#allocation2 + $0x1b6] sm:$0x1] }
 0x611   : > { %v4352_v14 = vpop.permute.xlu0 %4351 }
 0x612   : > { %v4368_v31 = vadd.f32 %v4352_v14, %v4320_v39  ;;  %v4386_v17 = vpop.permute.xlu1 %4385  ;;  %v4400_v30 = vpop.permute.xlu2 %4399 }
 0x613   : > { %v4409_v58 = vadd.f32 %v4386_v17, %v8007_v26  ;;  %v4674_v26 = vld [vmem:[#allocation2 + $0x17c] sm:$0x1] }
 0x614   : > { %v4416_v53 = vadd.f32 %v4400_v30, %v4368_v31  ;;  %v4729_v31 = vld [vmem:[#allocation2 + $0x305] sm:$0x1] }
 0x617   : > { %4650 = vrot.lane.b32.xlu0 %v4630_v41, %s5623_s13 }
 0x618   : > { %4652 = vrot.lane.b32.xlu1 %v4631_v51, %s5623_s13  ;;  %4648 = vrot.lane.b32.xlu2 %v4629_v42, %s5623_s13  ;;  %v4770_v51 = vld [vmem:[#allocation2 + $0x17e] sm:$0x1] }
 0x619   : > { %v4390_v0 = vpop.permute.xlu0 %4389  ;;  %v4774_v42 = vld [vmem:[#allocation2 + $0x25e] sm:$0x1] }
 0x61a   : > { %v4411_v4 = vadd.f32 %v4390_v0, %v4363_v38  ;;  %v4392_v45 = vpop.permute.xlu1 %4391  ;;  %v4438_v33 = vpop.permute.xlu2 %4437  ;;  %v4725_v38 = vld [vmem:[#allocation2 + $0x225] sm:$0x1] }
 0x61b   : > { %v4412_v16 = vadd.f32 %v4392_v45, %v8013_v55  ;;  %v4677_v55 = vld [vmem:[#allocation2 + $0x224] sm:$0x1] }
 0x61c   : > { %v4459_v22 = vadd.f32 %v4438_v33, %v4411_v4  ;;  %v4772_v4 = vld [vmem:[#allocation2 + $0x1ee] sm:$0x1] }
 0x61f   : > { %4656 = vrot.lane.b32.xlu0 %v4633_v9, %s5623_s13 }
 0x620   : > { %4690 = vrot.lane.b32.xlu1 %v4674_v26, %s5622_s25  ;;  %4654 = vrot.lane.b32.xlu2 %v4632_v62, %s5623_s13  ;;  %v4773_v26 = vld [vmem:[#allocation2 + $0x226] sm:$0x1] }
 0x621   : > { %v4396_v56 = vpop.permute.xlu0 %4395  ;;  %v4777_v62 = vld [vmem:[#allocation2 + $0x306] sm:$0x1] }
 0x622   : > { %v4414_v63 = vadd.f32 %v4396_v56, %v4366_v54  ;;  %v4398_v35 = vpop.permute.xlu1 %4397  ;;  %v4444_v18 = vpop.permute.xlu2 %4443 }
 0x623   : > { %v4415_v24 = vadd.f32 %v4398_v35, %v8019_v23  ;;  %v4680_v23 = vld [vmem:[#allocation2 + $0x2cc] sm:$0x1] }
 0x624   : > { %v4462_v29 = vadd.f32 %v4444_v18, %v4414_v63  ;;  %v4775_v63 = vld [vmem:[#allocation2 + $0x296] sm:$0x1] }
 0x627   : > { %4694 = vrot.lane.b32.xlu0 %v4676_v21, %s5622_s25 }
 0x628   : > { %4696 = vrot.lane.b32.xlu1 %v4677_v55, %s5622_s25  ;;  %4692 = vrot.lane.b32.xlu2 %v4675_v3, %s5622_s25  ;;  %v4776_v55 = vld [vmem:[#allocation2 + $0x2ce] sm:$0x1]  ;;  %v4820_v3 = vld [vmem:[#allocation2 + $0x1ef] sm:$0x1] }
 0x629   : > { %v4434_v43 = vpop.permute.xlu0 %4433 }
 0x62a   : > { %v4457_v36 = vadd.f32 %v4434_v43, %v4409_v58  ;;  %v4436_v5 = vpop.permute.xlu1 %4435  ;;  %v4482_v6 = vpop.permute.xlu2 %4481 }
 0x62b   : > { %v4458_v1 = vadd.f32 %v4436_v5, %v8025_v47 }
 0x62c   : > { %v4505_v46 = vadd.f32 %v4482_v6, %v4457_v36  ;;  %v4818_v36 = vld [vmem:[#allocation2 + $0x17f] sm:$0x1] }
 0x62f   : > { %4700 = vrot.lane.b32.xlu0 %v4679_v15, %s5622_s25 }
 0x630   : > { %4702 = vrot.lane.b32.xlu1 %v4680_v23, %s5622_s25  ;;  %4698 = vrot.lane.b32.xlu2 %v4678_v13, %s5622_s25  ;;  %v4821_v23 = vld [vmem:[#allocation2 + $0x227] sm:$0x1]  ;;  %v4819_v13 = vld [vmem:[#allocation2 + $0x1b7] sm:$0x1] }
 0x631   : > { %v4440_v57 = vpop.permute.xlu0 %4439 }
 0x632   : > { %v4460_v40 = vadd.f32 %v4440_v57, %v4412_v16  ;;  %v4442_v12 = vpop.permute.xlu1 %4441  ;;  %v4488_v44 = vpop.permute.xlu2 %4487 }
 0x633   : > { %v4461_v50 = vadd.f32 %v4442_v12, %v4413_v8  ;;  %v4823_v12 = vld [vmem:[#allocation2 + $0x297] sm:$0x1] }
 0x634   : > { %v4508_v37 = vadd.f32 %v4488_v44, %v4460_v40  ;;  %v4610_v40 = vld [vmem:[#allocation2 + $0x17a] sm:$0x1] }
 0x637   : > { %4738 = vrot.lane.b32.xlu0 %v4722_v10, %s5624_s16 }
 0x638   : > { %4740 = vrot.lane.b32.xlu1 %v4723_v48, %s5624_s16  ;;  %4704 = vrot.lane.b32.xlu2 %v4681_v11, %s5622_s25  ;;  %v4613_v11 = vld [vmem:[#allocation2 + $0x222] sm:$0x1]  ;;  %s327_s25 = sand.u32 1, %s5593_s30  }
 0x639   : > { %v4446_v25 = vpop.permute.xlu0 %4445  ;;  %s5199_s13 = sshll.u32 %s327_s25, 3  ;;  %s5087_s27 = scalar_lea.sflag [#allocation5], %s327_s25 }
 0x63a   : > { %v4463_v28 = vadd.f32 %v4446_v25, %v4415_v24  ;;  %v4448_v47 = vpop.permute.xlu1 %4447  ;;  %v4494_v49 = vpop.permute.xlu2 %4493 }
 0x63b   : > { %v4464_v52 = vadd.f32 %v4448_v47, %v4416_v53  ;;  %v4822_v47 = vld [vmem:[#allocation2 + $0x25f] sm:$0x1] }
 0x63c   : > { %v4511_v19 = vadd.f32 %v4494_v49, %v4463_v28 }
 0x63f   : > { %4744 = vrot.lane.b32.xlu0 %v4725_v38, %s5624_s16  ;;  %v4824_v38 = vld [vmem:[#allocation2 + $0x2cf] sm:$0x1] }
 0x640   : > { %4746 = vrot.lane.b32.xlu1 %v4726_v60, %s5624_s16  ;;  %4742 = vrot.lane.b32.xlu2 %v4724_v2, %s5624_s16 }
 0x641   : > { %v4484_v7 = vpop.permute.xlu0 %4483 }
 0x642   : > { %v4506_v61 = vadd.f32 %v4484_v7, %v4458_v1  ;;  %v4486_v32 = vpop.permute.xlu1 %4485  ;;  %v4532_v34 = vpop.permute.xlu2 %4531 }
 0x643   : > { %v4507_v39 = vadd.f32 %v4486_v32, %v4459_v22  ;;  %v4616_v32 = vld [vmem:[#allocation2 + $0x2ca] sm:$0x1] }
 0x644   : > { %v4554_v54 = vadd.f32 %v4532_v34, %v4506_v61  ;;  %v4867_v34 = vld [vmem:[#allocation2 + $0x1b8] sm:$0x1] }
 0x647   : > { %4750 = vrot.lane.b32.xlu0 %v4728_v27, %s5624_s16 }
 0x648   : > { %4752 = vrot.lane.b32.xlu1 %v4729_v31, %s5624_s16  ;;  %4748 = vrot.lane.b32.xlu2 %v4727_v20, %s5624_s16  ;;  %s8124_s16 = scalar_lea.vmem [#allocation4], %s5199_s13  ;;  %s5543_s13 = scalar_lea.hbm %s8244_s8, 32 }
 0x649   : > { %v4490_v8 = vpop.permute.xlu0 %4489 }
 0x64a   : > { %v4509_v14 = vadd.f32 %v4490_v8, %v4461_v50  ;;  %v4492_v41 = vpop.permute.xlu1 %4491  ;;  %v4538_v17 = vpop.permute.xlu2 %4537  ;;  %v4869_v8 = vld [vmem:[#allocation2 + $0x228] sm:$0x1] }
 0x64b   : > { %v4510_v30 = vadd.f32 %v4492_v41, %v4462_v29 }
 0x64c   : > { %v8059_v58 = vadd.f32 %v4538_v17, %v4509_v14  ;;  %v4611_v14 = vld [vmem:[#allocation2 + $0x1b2] sm:$0x1] }
 0x64f   : > { %4788 = vrot.lane.b32.xlu0 %v4771_v59, %s5626_s26 }
 0x650   : > { %4790 = vrot.lane.b32.xlu1 %v4772_v4, %s5626_s26  ;;  %4786 = vrot.lane.b32.xlu2 %v4770_v51, %s5626_s26  ;;  %v4612_v4 = vld [vmem:[#allocation2 + $0x1ea] sm:$0x1]  ;;  %v4872_v51 = vld [vmem:[#allocation2 + $0x2d0] sm:$0x1] }
 0x651   : > { %v4496_v53 = vpop.permute.xlu0 %4495 }
 0x652   : > { %v4512_v0 = vadd.f32 %v4496_v53, %v4464_v52  ;;  %v4530_v9 = vpop.permute.xlu1 %4529  ;;  %v4544_v45 = vpop.permute.xlu2 %4543  ;;  %v4866_v52 = vld [vmem:[#allocation2 + $0x180] sm:$0x1] }
 0x653   : > { %v4553_v33 = vadd.f32 %v4530_v9, %v4505_v46  ;;  %v4870_v53 = vld [vmem:[#allocation2 + $0x260] sm:$0x1]  ;;  %v4614_v9 = vld [vmem:[#allocation2 + $0x25a] sm:$0x1] }
 0x654   : > { %v8064_v16 = vadd.f32 %v4544_v45, %v4512_v0  ;;  %v4868_v0 = vld [vmem:[#allocation2 + $0x1f0] sm:$0x1] }
 0x657   : > { %4794 = vrot.lane.b32.xlu0 %v4774_v42, %s5626_s26 }
 0x658   : > { %4796 = vrot.lane.b32.xlu1 %v4775_v63, %s5626_s26  ;;  %4792 = vrot.lane.b32.xlu2 %v4773_v26, %s5626_s26 }
 0x659   : > { %v4534_v22 = vpop.permute.xlu0 %4533 }
 0x65a   : > { %v4555_v56 = vadd.f32 %v4534_v22, %v4507_v39  ;;  %v4536_v21 = vpop.permute.xlu1 %4535  ;;  %v4582_v35 = vpop.permute.xlu2 %4581  ;;  %v4825_v39 = vld [vmem:[#allocation2 + $0x307] sm:$0x1] }
 0x65b   : > { %v4556_v18 = vadd.f32 %v4536_v21, %v4508_v37  ;;  %v4871_v21 = vld [vmem:[#allocation2 + $0x298] sm:$0x1] }
 0x65c   : > { %v8069_v24 = vadd.f32 %v4582_v35, %v4555_v56  ;;  %v4615_v35 = vld [vmem:[#allocation2 + $0x292] sm:$0x1] }
 0x65e   : > { %v4620_v42 = vadd.f32 %v4612_v4, %v8069_v24  ;;  %v4617_v24 = vld [vmem:[#allocation2 + $0x302] sm:$0x1] }
 0x65f   : > { %4800 = vrot.lane.b32.xlu0 %v4777_v62, %s5626_s26  ;;  %v4873_v62 = vld [vmem:[#allocation2 + $0x308] sm:$0x1] }
 0x660   : > { %4834 = vrot.lane.b32.xlu1 %v4818_v36, %s5625_s28  ;;  %4798 = vrot.lane.b32.xlu2 %v4776_v55, %s5626_s26 }
 0x661   : > { %v4540_v29 = vpop.permute.xlu0 %4539 }
 0x662   : > { %v4558_v43 = vadd.f32 %v4540_v29, %v4510_v30  ;;  %v4542_v15 = vpop.permute.xlu1 %4541  ;;  %v4588_v5 = vpop.permute.xlu2 %4587 }
 0x663   : > { %v4559_v6 = vadd.f32 %v4542_v15, %v4511_v19 }
 0x664   : > { %v8074_v1 = vadd.f32 %v4588_v5, %v4558_v43  ;;  %v4914_v5 = vld [vmem:[#allocation3] sm:$0x1] }
 0x665   : > { %5383 = vpush %v4914_v5 }
 0x667   : > { %4838 = vrot.lane.b32.xlu0 %v4820_v3, %s5625_s28 }
 0x668   : > { %4840 = vrot.lane.b32.xlu1 %v4821_v23, %s5625_s28  ;;  %4836 = vrot.lane.b32.xlu2 %v4819_v13, %s5625_s28 }
 0x669   : > { %v4578_v46 = vpop.permute.xlu0 %4577 }
 0x66a   : > { %v4601_v57 = vadd.f32 %v4578_v46, %v4553_v33  ;;  %v4580_v44 = vpop.permute.xlu1 %4579  ;;  %v4643_v50 = vpop.permute.xlu2 %4642 }
 0x66b   : > { %v4602_v37 = vadd.f32 %v4580_v44, %v4554_v54 }
 0x66c   : > { %v4618_v10 = vadd.f32 %v4610_v40, %v4601_v57 }
 0x66d   : > { %v4619_v59 = vadd.f32 %v4611_v14, %v4602_v37 }
 0x66e   : > { %v8079_v25 = vadd.f32 %v4643_v50, %v4618_v10 }
 0x66f   : > { %4844 = vrot.lane.b32.xlu0 %v4823_v12, %s5625_s28 }
 0x670   : > { %4846 = vrot.lane.b32.xlu1 %v4824_v38, %s5625_s28  ;;  %4842 = vrot.lane.b32.xlu2 %v4822_v47, %s5625_s28 }
 0x671   : > { %v4584_v28 = vpop.permute.xlu0 %4583 }
 0x672   : > { %v4604_v48 = vadd.f32 %v4584_v28, %v4556_v18  ;;  %v4586_v19 = vpop.permute.xlu1 %4585  ;;  %v4649_v7 = vpop.permute.xlu2 %4648  ;;  %v4623_v18 = vadd.f32 %v4615_v35, %v8074_v1 }
 0x673   : > { %v4605_v61 = vadd.f32 %v4586_v19, %v8059_v58 }
 0x674   : > { %v4621_v49 = vadd.f32 %v4613_v11, %v4604_v48 }
 0x675   : > { %v4622_v22 = vadd.f32 %v4614_v9, %v4605_v61 }
 0x676   : > { %v4669_v60 = vadd.f32 %v4649_v7, %v4621_v49 }
 0x677   : > { %4882 = vrot.lane.b32.xlu0 %v4866_v52, %s5627_s7 }
 0x678   : > { %4884 = vrot.lane.b32.xlu1 %v4867_v34, %s5627_s7  ;;  %4848 = vrot.lane.b32.xlu2 %v4825_v39, %s5625_s28  ;;  %s5373_s28 = sshll.u32 %s5605_s11, 4 }
 0x679   : > { %v4590_v2 = vpop.permute.xlu0 %4589  ;;  %s5098_s26 = sadd.s32 %s5373_s28, %s5803_s18  ;;  %s5100_s18 = sshll.u32 %s8124_s16, 4  ;;  %s5101_s18 = int_to_ptr.vmem [resolvable:$true] %s5100_s18 }
 0x67a   : > { %v4607_v27 = vadd.f32 %v4590_v2, %v4559_v6  ;;  %v4592_v31 = vpop.permute.xlu1 %4591  ;;  %v4655_v20 = vpop.permute.xlu2 %4654  ;;  %s5099_s11 = scalar_lea.hbm %s8244_s8, %s5098_s26 }
 0x67b   : > { %v4608_v41 = vadd.f32 %v4592_v31, %v8064_v16  ;;  %s8191_s22 = sshll.u32 %s5099_s11, 4  ;;  %s5103_s22 = int_to_ptr.hbm [resolvable:$true] %s8191_s22 }
 0x67c   : > { %v4624_v54 = vadd.f32 %v4616_v32, %v4607_v27  ;;  %s5537_s10 = sshra.s32 %s5103_s22, 4  ;;  %s5538_s10 = int_to_ptr.hbm [resolvable:$true] %s5537_s10 }
 0x67d   : > { %v4625_v36 = vadd.f32 %v4617_v24, %v4608_v41  ;;  %s5539_s23 = scalar_lea.hbm %s5538_s10, 8  ;;  %p5544_p2 = scmp.lt.s32.totalorder %s5538_s10, %s8244_s8 }
 0x67e   : > { %v4672_v17 = vadd.f32 %v4655_v20, %v4624_v54  ;;  %p5540_p13 = scmp.ne.s32.totalorder %s5538_s10, %s5539_s23  ;;  %p5545_p4 = scmp.lt.s32.totalorder %s5543_s13, %s5539_s23 }
 0x67f   : > { %4888 = vrot.lane.b32.xlu0 %v4869_v8, %s5627_s7 }
 0x680   : > { %4890 = vrot.lane.b32.xlu1 %v4870_v53, %s5627_s7  ;;  %4886 = vrot.lane.b32.xlu2 %v4868_v0, %s5627_s7  ;;  %p5541_p0 = pnand %p5540_p13, %p5729_p3  ;;  %p5546_p5 = por %p5545_p4, %p5544_p2 }
 0x681   : > { %v4645_v30 = vpop.permute.xlu0 %4644 }
 0x682   : > { %v4667_v58 = vadd.f32 %v4645_v30, %v4619_v59  ;;  %v4647_v45 = vpop.permute.xlu1 %4646  ;;  %v4693_v33 = vpop.permute.xlu2 %4692  ;;  %p5542_p1 = pneg %p5541_p0 }
 0x683   : > { %v4668_v16 = vadd.f32 %v4647_v45, %v4620_v42 }
 0x684   : > { %v8093_v56 = vadd.f32 %v4693_v33, %v4667_v58  ;;  %p5547_p6 = pnand %p5546_p5, %p5542_p1 }
 0x687   : > { %4894 = vrot.lane.b32.xlu0 %v4872_v51, %s5627_s7 }
 0x688   : > { %4896 = vrot.lane.b32.xlu1 %v4873_v62, %s5627_s7  ;;  %4892 = vrot.lane.b32.xlu2 %v4871_v21, %s5627_s7 }
 0x689   : > { %v4651_v63 = vpop.permute.xlu0 %4650 }
 0x68a   : > { %v4670_v26 = vadd.f32 %v4651_v63, %v4622_v22  ;;  %v4653_v29 = vpop.permute.xlu1 %4652  ;;  %v4699_v43 = vpop.permute.xlu2 %4698 }
 0x68b   : > { %v4671_v55 = vadd.f32 %v4653_v29, %v4623_v18 }
 0x68c   : > { %v8098_v3 = vadd.f32 %v4699_v43, %v4670_v26 }
 0x691   : > { %v4657_v15 = vpop.permute.xlu0 %4656 }
 0x692   : > { %v4673_v6 = vadd.f32 %v4657_v15, %v4625_v36  ;;  %v4691_v46 = vpop.permute.xlu1 %4690  ;;  %v4705_v57 = vpop.permute.xlu2 %4704 }
 0x693   : > { %v4714_v40 = vadd.f32 %v4691_v46, %v8079_v25 }
 0x694   : > { %v8101_v23 = vadd.f32 %v4705_v57, %v4673_v6 }
 0x696   : > { %s5384_s15 = spop %5383 }
 0x697   : > { %v8107_v33 = vstv %s5384_s15 }
 0x699   : > { %v4695_v13 = vpop.permute.xlu0 %4694 }
 0x69a   : > { %v4697_v10 = vpop.permute.xlu1 %4696  ;;  %v4743_v1 = vpop.permute.xlu2 %4742  ;;  %v4716_v53 = vadd.f32 %v4695_v13, %v4668_v16 }
 0x69b   : > { %v4717_v12 = vadd.f32 %v4697_v10, %v4669_v60 }
 0x69c   : > { %v4764_v0 = vadd.f32 %v4743_v1, %v4716_v53 }
 0x6a1   : > { %v4701_v44 = vpop.permute.xlu0 %4700 }
 0x6a2   : > { %v4719_v50 = vadd.f32 %v4701_v44, %v4671_v55  ;;  %v4703_v37 = vpop.permute.xlu1 %4702  ;;  %v4749_v28 = vpop.permute.xlu2 %4748 }
 0x6a3   : > { %v4720_v48 = vadd.f32 %v4703_v37, %v4672_v17 }
 0x6a4   : > { %v4767_v11 = vadd.f32 %v4749_v28, %v4719_v50 }
 0x6a9   : > { %v4739_v38 = vpop.permute.xlu0 %4738 }
 0x6aa   : > { %v4762_v47 = vadd.f32 %v4739_v38, %v4714_v40  ;;  %v4741_v49 = vpop.permute.xlu1 %4740  ;;  %v4787_v52 = vpop.permute.xlu2 %4786 }
 0x6ab   : > { %v4763_v35 = vadd.f32 %v4741_v49, %v8093_v56 }
 0x6ac   : > { %v4810_v19 = vadd.f32 %v4787_v52, %v4762_v47 }
 0x6b1   : > { %v4745_v7 = vpop.permute.xlu0 %4744 }
 0x6b2   : > { %v4765_v61 = vadd.f32 %v4745_v7, %v4717_v12  ;;  %v4747_v25 = vpop.permute.xlu1 %4746  ;;  %v4793_v2 = vpop.permute.xlu2 %4792 }
 0x6b3   : > { %v4766_v40 = vadd.f32 %v4747_v25, %v8098_v3 }
 0x6b4   : > { %v4813_v27 = vadd.f32 %v4793_v2, %v4765_v61 }
 0x6b9   : > { %v4751_v32 = vpop.permute.xlu0 %4750 }
 0x6ba   : > { %v4768_v34 = vadd.f32 %v4751_v32, %v4720_v48  ;;  %v4753_v39 = vpop.permute.xlu1 %4752  ;;  %v4799_v60 = vpop.permute.xlu2 %4798 }
 0x6bb   : > { %v4769_v52 = vadd.f32 %v4753_v39, %v8101_v23 }
 0x6bc   : > { %v8103_v54 = vadd.f32 %v4799_v60, %v4768_v34 }
 0x6c1   : > { %v4789_v8 = vpop.permute.xlu0 %4788 }
 0x6c2   : > { %v4791_v14 = vpop.permute.xlu1 %4790  ;;  %v4837_v31 = vpop.permute.xlu2 %4836  ;;  %v4811_v18 = vadd.f32 %v4789_v8, %v4763_v35 }
 0x6c3   : > { %v4812_v51 = vadd.f32 %v4791_v14, %v4764_v0 }
 0x6c4   : > { %v4859_v43 = vadd.f32 %v4837_v31, %v4811_v18 }
 0x6c9   : > { %v4795_v20 = vpop.permute.xlu0 %4794 }
 0x6ca   : > { %v4797_v59 = vpop.permute.xlu1 %4796  ;;  %v4843_v41 = vpop.permute.xlu2 %4842  ;;  %v4814_v1 = vadd.f32 %v4795_v20, %v4766_v40 }
 0x6cb   : > { %v4815_v24 = vadd.f32 %v4797_v59, %v4767_v11 }
 0x6cc   : > { %v4862_v28 = vadd.f32 %v4843_v41, %v4814_v1 }
 0x6d1   : > { %v4801_v17 = vpop.permute.xlu0 %4800 }
 0x6d2   : > { %v4835_v30 = vpop.permute.xlu1 %4834  ;;  %v8105_v58 = vpop.permute.xlu2 %4848  ;;  %v4817_v34 = vadd.f32 %v4801_v17, %v4769_v52 }
 0x6d3   : > { %v4858_v15 = vadd.f32 %v4835_v30, %v4810_v19 }
 0x6d4   : > { %v4865_v0 = vadd.f32 %v8105_v58, %v4817_v34 }
 0x6d9   : > { %v4839_v4 = vpop.permute.xlu0 %4838 }
 0x6da   : > { %v4860_v42 = vadd.f32 %v4839_v4, %v4812_v51  ;;  %v4841_v9 = vpop.permute.xlu1 %4840  ;;  %v4887_v45 = vpop.permute.xlu2 %4886 }
 0x6db   : > { %v4861_v3 = vadd.f32 %v4841_v9, %v4813_v27 }
 0x6dc   : > { %v4908_v22 = vadd.f32 %v4887_v45, %v4860_v42 }
 0x6de   : > { %v4919_v63 = vadd.f32 %v8107_v33, %v4908_v22 }
 0x6e0   : > { %v5365_v26 = vmul.f32 -1.442695, %v4919_v63 }
 0x6e1   : > { %v4845_v21 = vpop.permute.xlu0 %4844 }
 0x6e2   : > { %5472 = vpow2.f32 %v5365_v26  ;;  %v8110_v62 = vpop.permute.xlu1 %4846  ;;  %v4863_v36 = vadd.f32 %v4845_v21, %v4815_v24  ;;  %v4893_v6 = vpop.permute.xlu2 %4892 }
 0x6e3   : > { %v4864_v42 = vadd.f32 %v8110_v62, %v8103_v54 }
 0x6e4   : > { %v4911_v46 = vadd.f32 %v4893_v6, %v4863_v36 }
 0x6e6   : > { %v4922_v56 = vadd.f32 %v8107_v33, %v4911_v46 }
 0x6e8   : > { %v5473_v16 = vpop.eup %5472  ;;  %v5368_v37 = vmul.f32 -1.442695, %v4922_v56 }
 0x6e9   : > { %v4951_v29 = vadd.f32 1.0, %v5473_v16  ;;  %v4883_v57 = vpop.permute.xlu0 %4882 }
 0x6ea   : > { %v4885_v55 = vpop.permute.xlu1 %4884  ;;  %v4906_v10 = vadd.f32 %v4883_v57, %v4858_v15 }
 0x6eb   : > { %5474 = vrcp.f32 %v4951_v29  ;;  %v4907_v5 = vadd.f32 %v4885_v55, %v4859_v43  ;;  %v4996_v19 = vand.u32 2147483647, %v4951_v29  ;;  %v4998_v7 = vand.u32 2147483648, %v4951_v29 }
 0x6ec   : > { %v4917_v44 = vadd.f32 %v8107_v33, %v4906_v10  ;;  %vm4992_vm8 = vweird.f32 %v4951_v29 }
 0x6ed   : > { %v4918_v13 = vadd.f32 %v8107_v33, %v4907_v5  ;;  %vm4997_vm10 = vcmp.eq.f32.partialorder %v4996_v19, 8.507059e+37  ;;  %v4999_v23 = vor.u32 1.1754944e-38, %v4998_v7 }
 0x6ee   : > { %v5363_v11 = vmul.f32 -1.442695, %v4917_v44 }
 0x6ef   : > { %v5364_v12 = vmul.f32 -1.442695, %v4918_v13 }
 0x6f1   : > { %v5475_v50 = vpop.eup %5474  ;;  %5476 = vpow2.f32 %v5364_v12  ;;  %v4889_v61 = vpop.permute.xlu0 %4888 }
 0x6f2   : > { %v4988_v48 = vmul.f32 %v5475_v50, %v4951_v29  ;;  %5478 = vpow2.f32 %v5368_v37  ;;  %v4891_v38 = vpop.permute.xlu1 %4890  ;;  %vm4993_vm7 = vweird.f32 %v5475_v50  ;;  %v4909_v32 = vadd.f32 %v4889_v61, %v4861_v3 }
 0x6f3   : > { %5480 = vpow2.f32 %v5363_v11  ;;  %v4910_v49 = vadd.f32 %v4891_v38, %v4862_v28  ;;  %vm4994_vm9 = vmor %vm4992_vm8, %vm4993_vm7 }
 0x6f4   : > { %v4989_v47 = vsub.f32 1.0, %v4988_v48  ;;  %v4920_v14 = vadd.f32 %v8107_v33, %v4909_v32 }
 0x6f5   : > { %v4921_v2 = vadd.f32 %v8107_v33, %v4910_v49 }
 0x6f6   : > { %v4990_v25 = vmul.f32 %v5475_v50, %v4989_v47  ;;  %v5366_v30 = vmul.f32 -1.442695, %v4920_v14 }
 0x6f7   : > { %v5477_v60 = vpop.eup %5476  ;;  %v5367_v27 = vmul.f32 -1.442695, %v4921_v2 }
 0x6f8   : > { %v4991_v8 = vadd.f32 %v5475_v50, %v4990_v25  ;;  %v5479_v31 = vpop.eup %5478  ;;  %v4950_v39 = vadd.f32 1.0, %v5477_v60 }
 0x6f9   : > { %v5481_v20 = vpop.eup %5480  ;;  %v4954_v41 = vadd.f32 1.0, %v5479_v31  ;;  %5482 = vpow2.f32 %v5367_v27  ;;  %v4895_v22 = vpop.permute.xlu0 %4894 }
 0x6fa   : > { %v4995_v59 = vsel %vm4994_vm9, %v5475_v50, %v4991_v8  ;;  %5484 = vrcp.f32 %v4950_v39  ;;  %v4897_v17 = vpop.permute.xlu1 %4896  ;;  %v8128_v4 = vadd.f32 1.0, %v5481_v20  ;;  %v4912_v26 = vadd.f32 %v4895_v22, %v4864_v42 }
 0x6fb   : > { %v5000_v53 = vsel %vm4997_vm10, %v4999_v23, %v4995_v59  ;;  %5486 = vrcp.f32 %v4954_v41  ;;  %v4913_v51 = vadd.f32 %v4897_v17, %v4865_v0  ;;  %v4981_v16 = vand.u32 2147483647, %v4950_v39 }
 0x6fc   : > { %5080 = vst.msk [vmem:[%s8124_s16 + $0x2] sm:$0x1] %vm5077_vm11, %v5000_v53  ;;  %5488 = vpow2.f32 %v5366_v30  ;;  %vm4977_vm12 = vweird.f32 %v4950_v39  ;;  %v4983_v29 = vand.u32 2147483648, %v4950_v39  ;;  %vm5037_vm13 = vweird.f32 %v4954_v41 }
 0x6fd   : > { %5490 = vrcp.f32 %v8128_v4  ;;  %v4924_v45 = vadd.f32 %v8107_v33, %v4913_v51  ;;  %v5041_v62 = vand.u32 2147483647, %v4954_v41  ;;  %v5043_v5 = vand.u32 2147483648, %v4954_v41 }
 0x6fe   : > { %v4923_v6 = vadd.f32 %v8107_v33, %v4912_v26  ;;  %vm8140_vm15 = vcmp.eq.f32.partialorder %v4981_v16, 8.507059e+37  ;;  %v4966_v10 = vand.u32 2147483647, %v8128_v4  ;;  %v4984_v1 = vor.u32 1.1754944e-38, %v4983_v29 }
 0x6ff   : > { %v5483_v9 = vpop.eup %5482  ;;  %v5370_v18 = vmul.f32 -1.442695, %v4924_v45  ;;  %vm8147_vm1 = vcmp.eq.f32.partialorder %v5041_v62, 8.507059e+37  ;;  %v5044_v37 = vor.u32 1.1754944e-38, %v5043_v5  ;;  %v4968_v28 = vand.u32 2147483648, %v8128_v4 }
 0x700   : > { %v5485_v58 = vpop.eup %5484  ;;  %v8134_v63 = vadd.f32 1.0, %v5483_v9  ;;  %v5369_v48 = vmul.f32 -1.442695, %v4923_v6  ;;  %vm4962_vm5 = vweird.f32 %v8128_v4  ;;  %vm8158_vm6 = vcmp.eq.f32.partialorder %v4966_v10, 8.507059e+37 }
 0x701   : > { %v5487_v21 = vpop.eup %5486  ;;  %v4973_v35 = vmul.f32 %v5485_v58, %v4950_v39  ;;  %vm4978_vm14 = vweird.f32 %v5485_v58  ;;  %v4969_v34 = vor.u32 1.1754944e-38, %v4968_v28 }
 0x702   : > { %v5489_v24 = vpop.eup %5488  ;;  %v5033_v43 = vmul.f32 %v5487_v21, %v4954_v41  ;;  %5492 = vrcp.f32 %v8134_v63  ;;  %vm5038_vm0 = vweird.f32 %v5487_v21  ;;  %vm4979_vm2 = vmor %vm4977_vm12, %vm4978_vm14  ;;  %v5026_v60 = vand.u32 2147483647, %v8134_v63 }
 0x703   : > { %v4974_v54 = vsub.f32 1.0, %v4973_v35  ;;  %v8137_v36 = vadd.f32 1.0, %v5489_v24  ;;  %v5491_v55 = vpop.eup %5490  ;;  %5494 = vpow2.f32 %v5370_v18  ;;  %vm5039_vm3 = vmor %vm5037_vm13, %vm5038_vm0  ;;  %v5028_v8 = vand.u32 2147483648, %v8134_v63 }
 0x704   : > { %v5034_v15 = vsub.f32 1.0, %v5033_v43  ;;  %v4958_v40 = vmul.f32 %v5491_v55, %v8128_v4  ;;  %vm4963_vm4 = vweird.f32 %v5491_v55  ;;  %vm5022_vm9 = vweird.f32 %v8134_v63 }
 0x705   : > { %v4975_v46 = vmul.f32 %v5485_v58, %v4974_v54  ;;  %5496 = vrcp.f32 %v8137_v36  ;;  %vm4964_vm7 = vmor %vm4962_vm5, %vm4963_vm4  ;;  %vm5027_vm12 = vcmp.eq.f32.partialorder %v5026_v60, 8.507059e+37  ;;  %v5029_v59 = vor.u32 1.1754944e-38, %v5028_v8 }
 0x706   : > { %v5035_v13 = vmul.f32 %v5487_v21, %v5034_v15  ;;  %v4959_v33 = vsub.f32 1.0, %v4958_v40  ;;  %5498 = vpow2.f32 %v5369_v48  ;;  %v5013_v41 = vand.u32 2147483648, %v8137_v36 }
 0x707   : > { %v4976_v56 = vadd.f32 %v5485_v58, %v4975_v46  ;;  %v5011_v17 = vand.u32 2147483647, %v8137_v36  ;;  %vm5007_vm14 = vweird.f32 %v8137_v36 }
 0x708   : > { %v5493_v44 = vpop.eup %5492  ;;  %v5036_v50 = vadd.f32 %v5487_v21, %v5035_v13  ;;  %v4960_v38 = vmul.f32 %v5491_v55, %v4959_v33  ;;  %v5014_v45 = vor.u32 1.1754944e-38, %v5013_v41 }
 0x709   : > { %v4980_v11 = vsel %vm4979_vm2, %v5485_v58, %v4976_v56  ;;  %v5018_v3 = vmul.f32 %v5493_v44, %v8134_v63  ;;  %v5495_v47 = vpop.eup %5494  ;;  %vm5023_vm8 = vweird.f32 %v5493_v44  ;;  %vm5012_vm0 = vcmp.eq.f32.partialorder %v5011_v17, 8.507059e+37 }
 0x70a   : > { %v4985_v49 = vsel %vm8140_vm15, %v4984_v1, %v4980_v11  ;;  %v5040_v52 = vsel %vm5039_vm3, %v5487_v21, %v5036_v50  ;;  %v4961_v61 = vadd.f32 %v5491_v55, %v4960_v38  ;;  %v4956_v2 = vadd.f32 1.0, %v5495_v47  ;;  %vm5024_vm10 = vmor %vm5022_vm9, %vm5023_vm8 }
 0x70b   : > { %5079 = vst.msk [vmem:[%s8124_s16 + $0x1] sm:$0x1] %vm5077_vm11, %v4985_v49  ;;  %v5045_v7 = vsel %vm8147_vm1, %v5044_v37, %v5040_v52  ;;  %v5019_v25 = vsub.f32 1.0, %v5018_v3  ;;  %v5497_v32 = vpop.eup %5496 }
 0x70c   : > { %5083 = vst.msk [vmem:[%s8124_s16 + $0x5] sm:$0x1] %vm5077_vm11, %v5045_v7  ;;  %v4965_v27 = vsel %vm4964_vm7, %v5491_v55, %v4961_v61  ;;  %v5003_v31 = vmul.f32 %v5497_v32, %v8137_v36  ;;  %5500 = vrcp.f32 %v4956_v2  ;;  %vm5008_vm13 = vweird.f32 %v5497_v32  ;;  %v5499_v0 = vpop.eup %5498 }
 0x70d   : > { %v5020_v14 = vmul.f32 %v5493_v44, %v5019_v25  ;;  %v4970_v23 = vsel %vm8158_vm6, %v4969_v34, %v4965_v27  ;;  %v4955_v42 = vadd.f32 1.0, %v5499_v0  ;;  %vm5009_vm15 = vmor %vm5007_vm14, %vm5008_vm13  ;;  %v5073_v21 = vand.u32 2147483648, %v4956_v2 }
 0x70e   : > { %5078 = vst.msk [vmem:[%s8124_s16] sm:$0x1] %vm5077_vm11, %v4970_v23  ;;  %v5004_v20 = vsub.f32 1.0, %v5003_v31  ;;  %v5071_v16 = vand.u32 2147483647, %v4956_v2  ;;  %vm5067_vm2 = vweird.f32 %v4956_v2 }
 0x70f   : > { %v5021_v39 = vadd.f32 %v5493_v44, %v5020_v14  ;;  %5502 = vrcp.f32 %v4955_v42  ;;  %v5074_v29 = vor.u32 1.1754944e-38, %v5073_v21  ;;  %v5058_v55 = vand.u32 2147483648, %v4955_v42 }
 0x710   : > { %v5005_v53 = vmul.f32 %v5497_v32, %v5004_v20  ;;  %vm5072_vm4 = vcmp.eq.f32.partialorder %v5071_v16, 8.507059e+37  ;;  %v5056_v5 = vand.u32 2147483647, %v4955_v42  ;;  %vm5052_vm6 = vweird.f32 %v4955_v42 }
 0x711   : > { %v5025_v30 = vsel %vm5024_vm10, %v5493_v44, %v5021_v39  ;;  %v5059_v46 = vor.u32 1.1754944e-38, %v5058_v55 }
 0x712   : > { %v5030_v4 = vsel %vm5027_vm12, %v5029_v59, %v5025_v30  ;;  %v5006_v51 = vadd.f32 %v5497_v32, %v5005_v53  ;;  %v5501_v9 = vpop.eup %5500  ;;  %vm5057_vm8 = vcmp.eq.f32.partialorder %v5056_v5, 8.507059e+37 }
 0x713   : > { %5082 = vst.msk [vmem:[%s8124_s16 + $0x4] sm:$0x1] %vm5077_vm11, %v5030_v4  ;;  %v5063_v58 = vmul.f32 %v5501_v9, %v4956_v2  ;;  %vm5068_vm1 = vweird.f32 %v5501_v9 }
 0x714   : > { %v5010_v22 = vsel %vm5009_vm15, %v5497_v32, %v5006_v51  ;;  %vm5069_vm3 = vmor %vm5067_vm2, %vm5068_vm1 }
 0x715   : > { %v5015_v63 = vsel %vm5012_vm0, %v5014_v45, %v5010_v22  ;;  %v5064_v26 = vsub.f32 1.0, %v5063_v58  ;;  %v5503_v18 = vpop.eup %5502 }
 0x716   : > { %5081 = vst.msk [vmem:[%s8124_s16 + $0x3] sm:$0x1] %vm5077_vm11, %v5015_v63  ;;  %v5048_v43 = vmul.f32 %v5503_v18, %v4955_v42  ;;  %vm5053_vm5 = vweird.f32 %v5503_v18 }
 0x717   : > { %v5065_v35 = vmul.f32 %v5501_v9, %v5064_v26  ;;  %vm5054_vm7 = vmor %vm5052_vm6, %vm5053_vm5 }
 0x718   : > { %v5049_v36 = vsub.f32 1.0, %v5048_v43 }
 0x719   : > { %v5066_v24 = vadd.f32 %v5501_v9, %v5065_v35 }
 0x71a   : > { %v5050_v15 = vmul.f32 %v5503_v18, %v5049_v36 }
 0x71b   : > { %v5070_v54 = vsel %vm5069_vm3, %v5501_v9, %v5066_v24 }
 0x71c   : > { %v5075_v62 = vsel %vm5072_vm4, %v5074_v29, %v5070_v54  ;;  %v5051_v6 = vadd.f32 %v5503_v18, %v5050_v15 }
 0x71d   : > { %5085 = vst.msk [vmem:[%s8124_s16 + $0x7] sm:$0x1] %vm5077_vm11, %v5075_v62 }
 0x71e   : > { %v5055_v57 = vsel %vm5054_vm7, %v5503_v18, %v5051_v6 }
 0x71f   : > { %v5060_v40 = vsel %vm5057_vm8, %v5059_v46, %v5055_v57 }
 0x720   : > { %5084 = vst.msk [vmem:[%s8124_s16 + $0x6] sm:$0x1] %vm5077_vm11, %v5060_v40 }
 0x721   : > { %5550 = shalt.err (!%p5547_p6)
}
 0x722   : > { %s5628_s25 = smov 16   ;;  %s5629_s16 = smov 1  }
 0x723   : > { %5385 = dma.vmem_to_hbm [thread:$0]  (%p5729_p3), %s5101_s18, 128, %s5103_s22, %s5087_s27, %s5628_s25, %s5628_s25, %s5629_s16  }
 0x724 PF: > { %p5391_p7 = scmp.ge.s32.totalorder %s5617_s14, 2  ;;  %s5117_s7 = sand.u32 1, %s5589_s29  }
 0x725   : > { %s5118_s21 = scalar_lea.sflag [#allocation5], %s5117_s7 }
 0x726   : > { %p5388_p9 = pnand %p5391_p7, %p5738_p8 }
 0x728   : > { %p5389_p10 = pneg %p5388_p9 }
 0x72a   : > { %5584 = dma.done.wait (%p5389_p10), %s5118_s21, 128  }
 0x72b   : > { %5586 = vsyncadd (%p5389_p10), %s5118_s21, 4294967168  ;;  %s23_s14 = sadd.s32 1, %s5617_s14   ;;  %s8481_s11 = sld [smem:[#allocation7_spill]] }
 0x72c   : > { %p20_p11 = scmp.ge.s32.totalorder %s23_s14, 6   ;;  %s8482_s19 = sld [smem:[#allocation8_spill]] }
 0x72d   : > { %s8483_s13 = sld [smem:[#allocation9_spill]]  ;;  %s8484_s29 = smov %s5593_s30 }
 0x72e   : > { %s8485_s30 = smov %s5597_s9  ;;  %s8486_s9 = smov %s5747_s24 }
 0x72f   : > { %s8487_s10 = smov %s5609_s12  ;;  %22 = sbr.rel (!%p20_p11) target bundleno = 8 (0x8), region = 98 }
 0x732   : > { %s8488_s12 = smov %s8482_s19 }
 0x734   :  { %5124 = vsyncpa [#allocation5], 1 }
 0x735   :  { %5126 = vsyncpa [#allocation5 + $0x1], 1 }

</bundles_post_ra>
